<compile_context>
chip_gen: v7x
topology: tpu7x:2x2x1
jax: 0.10.0
libtpu: 0.0.40
codegen_flags: <defaults>
</compile_context>

<pallas_src>
import functools

import jax
import jax.numpy as jnp
from jax import lax
from jax.experimental import pallas as pl
from jax.experimental.pallas import tpu as pltpu


def _controller_kernel(w_x0_ref, w_h0_ref, w_f_ref, b_ref, w_head_ref,
                       b_head_ref, u_ref, dec_out_ref, prob_out_ref,
                       *, H, L, S, C, SC_pad):
    """Full S-step controller rollout in one kernel invocation.

    w_x0_ref  : [1, 4H]  f32        layer-0 input->gates weight row (in_dim=1)
    w_h0_ref  : [H, 4H]  bf16       layer-0 hidden->gates weight
    w_f_ref   : [L-1, 2H, 4H] bf16  fused [input; hidden]->gates, layers >= 1
    b_ref     : [L, 1, 4H] f32      combined gate bias (b_ih + b_hh), i|f|g|o
    w_head_ref: [H, SC_pad] bf16    lane-dense (padded) classifier weights
    b_head_ref: [1, SC_pad] f32     lane-dense (padded) classifier biases
    u_ref     : [1, U_pad] f32      uniforms for inverse-CDF sampling
    dec_out_ref : [1, S] int32      sampled indices
    prob_out_ref: [1, S] float32    probabilities of the sampled indices
    """
    f32 = jnp.float32
    bf16 = jnp.bfloat16
    G = 4 * H
    SC = S * C

    # ---- load every parameter once; resident across the unrolled rollout ----
    # (vreg-pressure guardrail: at H>=64 move w_f / w_h0 reads into the loop.)
    w_x0 = w_x0_ref[...]                          # [1, 4H]   f32 (VPU operand)
    w_h0 = w_h0_ref[...]                          # [H, 4H]   bf16 (MXU RHS)
    w_f = [w_f_ref[l] for l in range(L - 1)]      # each [2H, 4H] bf16
    b = [b_ref[l] for l in range(L)]              # each [1, 4H]  f32
    w_head = w_head_ref[...]                      # [H, SC_pad]   bf16
    b_head = b_head_ref[...]                      # [1, SC_pad]   f32
    u_all = u_ref[...]                            # [1, U_pad]    f32

    # ---- constants (hoisted out of the step loop) ----
    lane_g = lax.broadcasted_iota(jnp.int32, (1, G), 1)
    sig_mask = (lane_g < 2 * H) | (lane_g >= 3 * H)   # i,f,o lanes (g -> tanh)
    lane_sc = lax.broadcasted_iota(jnp.int32, (1, SC_pad), 1)
    row_c = lax.broadcasted_iota(jnp.int32, (C, SC_pad), 0)
    col_c = lax.broadcasted_iota(jnp.int32, (C, SC_pad), 1)
    step_iota = lax.broadcasted_iota(jnp.int32, (1, S), 1)

    # ---- initial state: (h, c) = 0, scalar input x = 0 ----
    h = [jnp.zeros((1, H), f32) for _ in range(L)]
    c = [jnp.zeros((1, H), f32) for _ in range(L)]
    x = jnp.zeros((1, 1), f32)                    # sampled index, vector form

    dec_vec = jnp.zeros((1, S), jnp.int32)
    prob_vec = jnp.zeros((1, S), f32)

    for step in range(S):                         # statically unrolled rollout
        # ---------- one LSTM step over all layers (seq=1, batch=1) ----------
        layer_in = None
        for l in range(L):
            if l == 0:
                # in_dim == 1: input->gates is a VPU broadcast multiply.
                gates = (x * w_x0
                         + jnp.dot(h[0].astype(bf16), w_h0,
                                   preferred_element_type=f32)
                         + b[0])                                  # [1, 4H] f32
            else:
                # TODO(synk): with staged MXU RHS this concat becomes two
                # accumulated LHS passes; kept fused for portability.
                xin = jnp.concatenate([layer_in, h[l]], axis=-1)  # [1, 2H] f32
                gates = (jnp.dot(xin.astype(bf16), w_f[l - 1],
                                 preferred_element_type=f32)
                         + b[l])                                  # [1, 4H] f32
            # Single transcendental path: tanh(x) = 2*sigmoid(2x) - 1.
            # One EUP exp + one exact reciprocal over the full 4H gate vector,
            # merged per-lane (PyTorch gate order i|f|g|o preserved).
            z = jnp.where(sig_mask, gates, 2.0 * gates)
            s = 1.0 / (1.0 + jnp.exp(-z))         # exact recip (recurrent path)
            act = jnp.where(sig_mask, s, 2.0 * s - 1.0)
            i_g = act[:, 0 * H:1 * H]
            f_g = act[:, 1 * H:2 * H]
            g_g = act[:, 2 * H:3 * H]
            o_g = act[:, 3 * H:4 * H]
            c_new = f_g * c[l] + i_g * g_g
            h_new = o_g * jnp.tanh(c_new)
            h[l] = h_new
            c[l] = c_new
            layer_in = h_new                      # feeds the next layer
        h_last = layer_in                         # [1, H]  (top layer hidden)

        # ---------- per-step head (lane-dense padded slab) + softmax ----------
        logits = (jnp.dot(h_last.astype(bf16), w_head,
                          preferred_element_type=f32)
                  + b_head)                                       # [1, SC_pad]
        blk = (lane_sc >= step * C) & (lane_sc < (step + 1) * C)  # this step's C lanes
        lm = jnp.where(blk, logits, -1e30)
        m = jnp.max(lm, axis=-1, keepdims=True)
        e = jnp.where(blk, jnp.exp(lm - m), 0.0)
        denom = jnp.sum(e, axis=-1, keepdims=True)
        probs = e * pl.reciprocal(denom)          # exact recip: reported probs

        # ---------- inverse-CDF categorical sample (MXU-free) ----------
        u = u_all[:, step:step + 1]                               # [1, 1]
        tri = col_c <= (row_c + step * C)                         # [C, SC_pad]
        cum = jnp.sum(jnp.where(tri, probs, 0.0),
                      axis=-1, keepdims=True)                     # [C, 1] block CDF
        below = (cum < u).astype(f32)                             # [C, 1]
        dec_f = jnp.minimum(jnp.sum(below, axis=0, keepdims=True),
                            float(C - 1))                         # [1, 1] float index
        dec_i = dec_f.astype(jnp.int32)                           # [1, 1] int index
        sel = lane_sc == (dec_i + step * C)
        proba = jnp.sum(jnp.where(sel, probs, 0.0),
                        axis=-1, keepdims=True)                   # [1, 1]

        dec_vec = jnp.where(step_iota == step, dec_i, dec_vec)
        prob_vec = jnp.where(step_iota == step, proba, prob_vec)

        x = dec_f                                 # sampled index -> next input

    dec_out_ref[...] = dec_vec
    prob_out_ref[...] = prob_vec


def controller_forward(params, uniforms, *, H, L, S, C):
    """JAX wrapper: returns (decisions int32 [S], probs float32 [S])."""
    w_x0, w_h0, w_fused, b, w_head, b_head = params
    SC_pad = w_head.shape[1]

    # Lane-pad the uniforms into a single full vreg row ([1, >=128] f32).
    U_pad = max(128, ((S + 127) // 128) * 128)
    u_vec = jnp.zeros((1, U_pad), jnp.float32).at[0, :S].set(
        uniforms.astype(jnp.float32))

    kernel = functools.partial(_controller_kernel, H=H, L=L, S=S, C=C,
                               SC_pad=SC_pad)
    vmem = pl.BlockSpec(memory_space=pltpu.MemorySpace.VMEM)
    dec, probs = pl.pallas_call(
        kernel,
        out_shape=(jax.ShapeDtypeStruct((1, S), jnp.int32),
                   jax.ShapeDtypeStruct((1, S), jnp.float32)),
        in_specs=[vmem, vmem, vmem, vmem, vmem, vmem, vmem],
        out_specs=(vmem, vmem),
        # Total resident footprint ~100 KB: no VMEM tiling / vmem_limit needed
        # on any generation (v5e/v6e/v7x).
    )(w_x0, w_h0, w_fused, b, w_head, b_head, u_vec)
    return dec[0], probs[0]


def init_params(key, *, H, L, S, C):
    """Deterministic synthetic parameters matching the module's shapes,
    repacked host-side into the kernel layouts (MXU weights in bf16).

    nn.LSTM(1, H, L):
      layer 0: weight_ih [4H, 1], weight_hh [4H, H], biases [4H]
      layer>0: weight_ih [4H, H], weight_hh [4H, H], biases [4H]
    nn.Linear(H, C) per decision step.
    """
    keys = jax.random.split(key, 4 * L + 2 * S)
    ki = iter(keys)
    scale = 0.1

    w_x0 = None
    w_h0 = None
    w_fused = []
    b = []
    for l in range(L):
        in_dim = 1 if l == 0 else H
        w_ih_l = jax.random.normal(next(ki), (4 * H, in_dim), jnp.float32) * scale
        w_hh_l = jax.random.normal(next(ki), (4 * H, H), jnp.float32) * scale
        b_ih_l = jax.random.normal(next(ki), (4 * H,), jnp.float32) * scale
        b_hh_l = jax.random.normal(next(ki), (4 * H,), jnp.float32) * scale
        b.append((b_ih_l + b_hh_l).reshape(1, 4 * H))          # combined bias
        if l == 0:
            w_x0 = jnp.transpose(w_ih_l)                       # [1, 4H] f32 (VPU)
            w_h0 = jnp.transpose(w_hh_l).astype(jnp.bfloat16)  # [H, 4H] bf16 (MXU)
        else:
            # fused input-major weight: rows [0:H] = W_ih^T, rows [H:2H] = W_hh^T
            w_fused.append(jnp.concatenate(
                [jnp.transpose(w_ih_l), jnp.transpose(w_hh_l)],
                axis=0).astype(jnp.bfloat16))                  # [2H, 4H] bf16
    b = jnp.stack(b)                                           # [L, 1, 4H] f32
    if L > 1:
        w_fused = jnp.stack(w_fused)                           # [L-1, 2H, 4H] bf16
    else:
        w_fused = jnp.zeros((1, 2 * H, 4 * H), jnp.bfloat16)   # unused placeholder

    # lane-dense classifier heads, padded to a multiple of 128 lanes:
    # [H, SC_pad] bf16 and [1, SC_pad] f32
    SC = S * C
    SC_pad = max(128, ((SC + 127) // 128) * 128)
    w_head_cols = []
    b_head_cols = []
    for _ in range(S):
        w_head_cols.append(jax.random.normal(next(ki), (H, C), jnp.float32) * scale)
        b_head_cols.append(jax.random.normal(next(ki), (C,), jnp.float32) * scale)
    w_head_dense = jnp.concatenate(w_head_cols, axis=1)        # [H, S*C]
    b_head_dense = jnp.concatenate(b_head_cols)                # [S*C]
    w_head = jnp.zeros((H, SC_pad), jnp.float32).at[:, :SC].set(
        w_head_dense).astype(jnp.bfloat16)                     # [H, SC_pad] bf16
    b_head = jnp.zeros((1, SC_pad), jnp.float32).at[0, :SC].set(
        b_head_dense)                                          # [1, SC_pad] f32
    return w_x0, w_h0, w_fused, b, w_head, b_head


if __name__ == "__main__":
    NUMBER = 8                  # len(list_desc): number of sequential decisions
    HIDDEN = 32                 # hidden_size
    NUM_LAYERS = 2              # num_layers
    NUM_CHOICES = 4             # len(dict_params[desc]) for every desc (synthetic)

    key = jax.random.PRNGKey(0)
    kp, ku = jax.random.split(key)
    params = init_params(kp, H=HIDDEN, L=NUM_LAYERS, S=NUMBER, C=NUM_CHOICES)
    uniforms = jax.random.uniform(ku, (NUMBER,), jnp.float32)

    decisions, probs = controller_forward(
        params, uniforms, H=HIDDEN, L=NUM_LAYERS, S=NUMBER, C=NUM_CHOICES)
    decisions = jax.block_until_ready(decisions)
    probs = jax.block_until_ready(probs)

    assert decisions.shape == (NUMBER,) and decisions.dtype == jnp.int32
    assert probs.shape == (NUMBER,) and probs.dtype == jnp.float32
    assert bool(jnp.all((decisions >= 0) & (decisions < NUM_CHOICES)))
    assert bool(jnp.all((probs > 0.0) & (probs <= 1.0)))

    print("KERNEL_OK")
</pallas_src>

<mosaic_0001>
module attributes {stable_mosaic.version = 11 : i64} {
  func.func @_controller_kernel(%arg0: memref<1x128xf32, #tpu.memory_space<vmem>>, %arg1: memref<32x128xbf16, #tpu.memory_space<vmem>>, %arg2: memref<1x64x128xbf16, #tpu.memory_space<vmem>>, %arg3: memref<2x1x128xf32, #tpu.memory_space<vmem>>, %arg4: memref<32x128xbf16, #tpu.memory_space<vmem>>, %arg5: memref<1x128xf32, #tpu.memory_space<vmem>>, %arg6: memref<1x128xf32, #tpu.memory_space<vmem>>, %arg7: memref<1x8xi32, #tpu.memory_space<vmem>>, %arg8: memref<1x8xf32, #tpu.memory_space<vmem>>) attributes {dimension_semantics = [], scalar_prefetch = 0 : i64, scratch_operands = 0 : i64, tpu.core_type = #tpu.core_type<tc>} {
    %c0 = arith.constant 0 : index
    %c0_0 = arith.constant 0 : index
    %0 = vector.load %arg0[%c0, %c0_0] : memref<1x128xf32, #tpu.memory_space<vmem>>, vector<1x128xf32>
    %c0_1 = arith.constant 0 : index
    %c0_2 = arith.constant 0 : index
    %1 = vector.load %arg1[%c0_1, %c0_2] : memref<32x128xbf16, #tpu.memory_space<vmem>>, vector<32x128xbf16>
    %c0_3 = arith.constant 0 : index
    %c0_4 = arith.constant 0 : index
    %c0_5 = arith.constant 0 : index
    %2 = vector.load %arg2[%c0_3, %c0_4, %c0_5] : memref<1x64x128xbf16, #tpu.memory_space<vmem>>, vector<1x64x128xbf16>
    %3 = vector.shape_cast %2 : vector<1x64x128xbf16> to vector<64x128xbf16>
    %c0_6 = arith.constant 0 : index
    %c0_7 = arith.constant 0 : index
    %c0_8 = arith.constant 0 : index
    %4 = vector.load %arg3[%c0_6, %c0_7, %c0_8] : memref<2x1x128xf32, #tpu.memory_space<vmem>>, vector<1x1x128xf32>
    %5 = vector.shape_cast %4 : vector<1x1x128xf32> to vector<1x128xf32>
    %c1 = arith.constant 1 : index
    %c0_9 = arith.constant 0 : index
    %c0_10 = arith.constant 0 : index
    %6 = vector.load %arg3[%c1, %c0_9, %c0_10] : memref<2x1x128xf32, #tpu.memory_space<vmem>>, vector<1x1x128xf32>
    %7 = vector.shape_cast %6 : vector<1x1x128xf32> to vector<1x128xf32>
    %c0_11 = arith.constant 0 : index
    %c0_12 = arith.constant 0 : index
    %8 = vector.load %arg4[%c0_11, %c0_12] : memref<32x128xbf16, #tpu.memory_space<vmem>>, vector<32x128xbf16>
    %c0_13 = arith.constant 0 : index
    %c0_14 = arith.constant 0 : index
    %9 = vector.load %arg5[%c0_13, %c0_14] : memref<1x128xf32, #tpu.memory_space<vmem>>, vector<1x128xf32>
    %c0_15 = arith.constant 0 : index
    %c0_16 = arith.constant 0 : index
    %10 = vector.load %arg6[%c0_15, %c0_16] : memref<1x128xf32, #tpu.memory_space<vmem>>, vector<1x128xf32>
    %11 = tpu.iota {dimensions = array<i32: 1>} : vector<1x128xi32>
    %c64_i32 = arith.constant 64 : i32
    %12 = vector.broadcast %c64_i32 : i32 to vector<1x128xi32>
    %13 = arith.cmpi slt, %11, %12 : vector<1x128xi32>
    %c96_i32 = arith.constant 96 : i32
    %14 = vector.broadcast %c96_i32 : i32 to vector<1x128xi32>
    %15 = arith.cmpi sge, %11, %14 : vector<1x128xi32>
    %16 = arith.ori %13, %15 : vector<1x128xi1>
    %17 = tpu.iota {dimensions = array<i32: 1>} : vector<1x128xi32>
    %18 = tpu.iota {dimensions = array<i32: 0>} : vector<4x128xi32>
    %19 = tpu.iota {dimensions = array<i32: 1>} : vector<4x128xi32>
    %20 = tpu.iota {dimensions = array<i32: 1>} : vector<1x8xi32>
    %cst = arith.constant 0.000000e+00 : f32
    %21 = vector.broadcast %cst : f32 to vector<1x32xf32>
    %cst_17 = arith.constant 0.000000e+00 : f32
    %22 = vector.broadcast %cst_17 : f32 to vector<1x32xf32>
    %cst_18 = arith.constant 0.000000e+00 : f32
    %23 = vector.broadcast %cst_18 : f32 to vector<1x32xf32>
    %cst_19 = arith.constant 0.000000e+00 : f32
    %24 = vector.broadcast %cst_19 : f32 to vector<1x32xf32>
    %cst_20 = arith.constant 0.000000e+00 : f32
    %25 = vector.broadcast %cst_20 : f32 to vector<1x1xf32>
    %c0_i32 = arith.constant 0 : i32
    %26 = vector.broadcast %c0_i32 : i32 to vector<1x8xi32>
    %cst_21 = arith.constant 0.000000e+00 : f32
    %27 = vector.broadcast %cst_21 : f32 to vector<1x8xf32>
    %28 = vector.broadcast %25 : vector<1x1xf32> to vector<1x128xf32>
    %29 = arith.mulf %28, %0 : vector<1x128xf32>
    %30 = arith.truncf %21 : vector<1x32xf32> to vector<1x32xbf16>
    %cst_22 = arith.constant dense<0.000000e+00> : vector<1x128xf32>
    %31 = tpu.matmul %30, %1, %cst_22 {dimension_numbers = #tpu.dot_dimension_numbers<[1], [0], [0], [1], [0, 0, 1, 1], [], []>} : vector<1x32xbf16>, vector<32x128xbf16>, vector<1x128xf32> -> vector<1x128xf32>
    %32 = arith.addf %29, %31 : vector<1x128xf32>
    %33 = arith.addf %32, %5 : vector<1x128xf32>
    %cst_23 = arith.constant 2.000000e+00 : f32
    %34 = vector.broadcast %cst_23 : f32 to vector<1x128xf32>
    %35 = arith.mulf %34, %33 : vector<1x128xf32>
    %36 = arith.select %16, %33, %35 : vector<1x128xi1>, vector<1x128xf32>
    %cst_24 = arith.constant 0.000000e+00 : f32
    %37 = vector.broadcast %cst_24 : f32 to vector<1x128xf32>
    %38 = arith.subf %37, %36 : vector<1x128xf32>
    %39 = math.exp %38 : vector<1x128xf32>
    %cst_25 = arith.constant 1.000000e+00 : f32
    %40 = vector.broadcast %cst_25 : f32 to vector<1x128xf32>
    %41 = arith.addf %40, %39 : vector<1x128xf32>
    %cst_26 = arith.constant 1.000000e+00 : f32
    %42 = vector.broadcast %cst_26 : f32 to vector<1x128xf32>
    %43 = arith.divf %42, %41 : vector<1x128xf32>
    %cst_27 = arith.constant 2.000000e+00 : f32
    %44 = vector.broadcast %cst_27 : f32 to vector<1x128xf32>
    %45 = arith.mulf %44, %43 : vector<1x128xf32>
    %cst_28 = arith.constant 1.000000e+00 : f32
    %46 = vector.broadcast %cst_28 : f32 to vector<1x128xf32>
    %47 = arith.subf %45, %46 : vector<1x128xf32>
    %48 = arith.select %16, %43, %47 : vector<1x128xi1>, vector<1x128xf32>
    %49 = vector.extract_strided_slice %48 {offsets = [0, 0], sizes = [1, 32], strides = [1, 1]} : vector<1x128xf32> to vector<1x32xf32>
    %50 = vector.extract_strided_slice %48 {offsets = [0, 32], sizes = [1, 32], strides = [1, 1]} : vector<1x128xf32> to vector<1x32xf32>
    %51 = vector.extract_strided_slice %48 {offsets = [0, 64], sizes = [1, 32], strides = [1, 1]} : vector<1x128xf32> to vector<1x32xf32>
    %52 = vector.extract_strided_slice %48 {offsets = [0, 96], sizes = [1, 32], strides = [1, 1]} : vector<1x128xf32> to vector<1x32xf32>
    %53 = arith.mulf %50, %23 : vector<1x32xf32>
    %54 = arith.mulf %49, %51 : vector<1x32xf32>
    %55 = arith.addf %53, %54 : vector<1x32xf32>
    %56 = math.tanh %55 : vector<1x32xf32>
    %57 = arith.mulf %52, %56 : vector<1x32xf32>
    %58 = tpu.concatenate %57, %22 in 1 : vector<1x32xf32>, vector<1x32xf32> -> vector<1x64xf32>
    %59 = arith.truncf %58 : vector<1x64xf32> to vector<1x64xbf16>
    %cst_29 = arith.constant dense<0.000000e+00> : vector<1x128xf32>
    %60 = tpu.matmul %59, %3, %cst_29 {dimension_numbers = #tpu.dot_dimension_numbers<[1], [0], [0], [1], [0, 0, 1, 1], [], []>} : vector<1x64xbf16>, vector<64x128xbf16>, vector<1x128xf32> -> vector<1x128xf32>
    %61 = arith.addf %60, %7 : vector<1x128xf32>
    %cst_30 = arith.constant 2.000000e+00 : f32
    %62 = vector.broadcast %cst_30 : f32 to vector<1x128xf32>
    %63 = arith.mulf %62, %61 : vector<1x128xf32>
    %64 = arith.select %16, %61, %63 : vector<1x128xi1>, vector<1x128xf32>
    %cst_31 = arith.constant 0.000000e+00 : f32
    %65 = vector.broadcast %cst_31 : f32 to vector<1x128xf32>
    %66 = arith.subf %65, %64 : vector<1x128xf32>
    %67 = math.exp %66 : vector<1x128xf32>
    %cst_32 = arith.constant 1.000000e+00 : f32
    %68 = vector.broadcast %cst_32 : f32 to vector<1x128xf32>
    %69 = arith.addf %68, %67 : vector<1x128xf32>
    %cst_33 = arith.constant 1.000000e+00 : f32
    %70 = vector.broadcast %cst_33 : f32 to vector<1x128xf32>
    %71 = arith.divf %70, %69 : vector<1x128xf32>
    %cst_34 = arith.constant 2.000000e+00 : f32
    %72 = vector.broadcast %cst_34 : f32 to vector<1x128xf32>
    %73 = arith.mulf %72, %71 : vector<1x128xf32>
    %cst_35 = arith.constant 1.000000e+00 : f32
    %74 = vector.broadcast %cst_35 : f32 to vector<1x128xf32>
    %75 = arith.subf %73, %74 : vector<1x128xf32>
    %76 = arith.select %16, %71, %75 : vector<1x128xi1>, vector<1x128xf32>
    %77 = vector.extract_strided_slice %76 {offsets = [0, 0], sizes = [1, 32], strides = [1, 1]} : vector<1x128xf32> to vector<1x32xf32>
    %78 = vector.extract_strided_slice %76 {offsets = [0, 32], sizes = [1, 32], strides = [1, 1]} : vector<1x128xf32> to vector<1x32xf32>
    %79 = vector.extract_strided_slice %76 {offsets = [0, 64], sizes = [1, 32], strides = [1, 1]} : vector<1x128xf32> to vector<1x32xf32>
    %80 = vector.extract_strided_slice %76 {offsets = [0, 96], sizes = [1, 32], strides = [1, 1]} : vector<1x128xf32> to vector<1x32xf32>
    %81 = arith.mulf %78, %24 : vector<1x32xf32>
    %82 = arith.mulf %77, %79 : vector<1x32xf32>
    %83 = arith.addf %81, %82 : vector<1x32xf32>
    %84 = math.tanh %83 : vector<1x32xf32>
    %85 = arith.mulf %80, %84 : vector<1x32xf32>
    %86 = arith.truncf %85 : vector<1x32xf32> to vector<1x32xbf16>
    %cst_36 = arith.constant dense<0.000000e+00> : vector<1x128xf32>
    %87 = tpu.matmul %86, %8, %cst_36 {dimension_numbers = #tpu.dot_dimension_numbers<[1], [0], [0], [1], [0, 0, 1, 1], [], []>} : vector<1x32xbf16>, vector<32x128xbf16>, vector<1x128xf32> -> vector<1x128xf32>
    %88 = arith.addf %87, %9 : vector<1x128xf32>
    %c0_i32_37 = arith.constant 0 : i32
    %89 = vector.broadcast %c0_i32_37 : i32 to vector<1x128xi32>
    %90 = arith.cmpi sge, %17, %89 : vector<1x128xi32>
    %c4_i32 = arith.constant 4 : i32
    %91 = vector.broadcast %c4_i32 : i32 to vector<1x128xi32>
    %92 = arith.cmpi slt, %17, %91 : vector<1x128xi32>
    %93 = arith.andi %90, %92 : vector<1x128xi1>
    %cst_38 = arith.constant -1.000000e+30 : f32
    %94 = vector.broadcast %cst_38 : f32 to vector<1x128xf32>
    %95 = arith.select %93, %88, %94 : vector<1x128xi1>, vector<1x128xf32>
    %cst_39 = arith.constant dense<0xFF800000> : vector<1xf32>
    %96 = vector.multi_reduction <maximumf>, %95, %cst_39 [1] : vector<1x128xf32> to vector<1xf32>
    %97 = vector.shape_cast %96 : vector<1xf32> to vector<1x1xf32>
    %98 = vector.broadcast %97 : vector<1x1xf32> to vector<1x128xf32>
    %99 = arith.subf %95, %98 : vector<1x128xf32>
    %100 = math.exp %99 : vector<1x128xf32>
    %cst_40 = arith.constant 0.000000e+00 : f32
    %101 = vector.broadcast %cst_40 : f32 to vector<1x128xf32>
    %102 = arith.select %93, %100, %101 : vector<1x128xi1>, vector<1x128xf32>
    %cst_41 = arith.constant dense<0.000000e+00> : vector<1xf32>
    %103 = vector.multi_reduction <add>, %102, %cst_41 [1] : vector<1x128xf32> to vector<1xf32>
    %104 = vector.shape_cast %103 : vector<1xf32> to vector<1x1xf32>
    %105 = tpu.reciprocal %104 : vector<1x1xf32> -> vector<1x1xf32>
    %106 = vector.broadcast %105 : vector<1x1xf32> to vector<1x128xf32>
    %107 = arith.mulf %102, %106 : vector<1x128xf32>
    %108 = vector.extract_strided_slice %10 {offsets = [0, 0], sizes = [1, 1], strides = [1, 1]} : vector<1x128xf32> to vector<1x1xf32>
    %c0_i32_42 = arith.constant 0 : i32
    %109 = vector.broadcast %c0_i32_42 : i32 to vector<4x128xi32>
    %110 = arith.addi %18, %109 : vector<4x128xi32>
    %111 = arith.cmpi sle, %19, %110 : vector<4x128xi32>
    %cst_43 = arith.constant 0.000000e+00 : f32
    %112 = vector.shape_cast %107 : vector<1x128xf32> to vector<1x128xf32>
    %113 = vector.broadcast %112 : vector<1x128xf32> to vector<4x128xf32>
    %114 = vector.broadcast %cst_43 : f32 to vector<4x128xf32>
    %115 = arith.select %111, %113, %114 : vector<4x128xi1>, vector<4x128xf32>
    %cst_44 = arith.constant dense<0.000000e+00> : vector<4xf32>
    %116 = vector.multi_reduction <add>, %115, %cst_44 [1] : vector<4x128xf32> to vector<4xf32>
    %117 = vector.shape_cast %116 : vector<4xf32> to vector<4x1xf32>
    %118 = vector.broadcast %108 : vector<1x1xf32> to vector<4x1xf32>
    %119 = arith.cmpf olt, %117, %118 : vector<4x1xf32>
    %120 = arith.extui %119 : vector<4x1xi1> to vector<4x1xi32>
    %121 = arith.sitofp %120 : vector<4x1xi32> to vector<4x1xf32>
    %cst_45 = arith.constant dense<0.000000e+00> : vector<1xf32>
    %122 = vector.multi_reduction <add>, %121, %cst_45 [0] : vector<4x1xf32> to vector<1xf32>
    %123 = vector.shape_cast %122 : vector<1xf32> to vector<1x1xf32>
    %cst_46 = arith.constant 3.000000e+00 : f32
    %124 = vector.broadcast %cst_46 : f32 to vector<1x1xf32>
    %125 = arith.minimumf %123, %124 : vector<1x1xf32>
    %126 = arith.fptosi %125 : vector<1x1xf32> to vector<1x1xi32>
    %c0_i32_47 = arith.constant 0 : i32
    %127 = vector.broadcast %c0_i32_47 : i32 to vector<1x1xi32>
    %128 = arith.addi %126, %127 : vector<1x1xi32>
    %129 = vector.broadcast %128 : vector<1x1xi32> to vector<1x128xi32>
    %130 = arith.cmpi eq, %17, %129 : vector<1x128xi32>
    %cst_48 = arith.constant 0.000000e+00 : f32
    %131 = vector.broadcast %cst_48 : f32 to vector<1x128xf32>
    %132 = arith.select %130, %107, %131 : vector<1x128xi1>, vector<1x128xf32>
    %cst_49 = arith.constant dense<0.000000e+00> : vector<1xf32>
    %133 = vector.multi_reduction <add>, %132, %cst_49 [1] : vector<1x128xf32> to vector<1xf32>
    %134 = vector.shape_cast %133 : vector<1xf32> to vector<1x1xf32>
    %c0_i32_50 = arith.constant 0 : i32
    %135 = vector.broadcast %c0_i32_50 : i32 to vector<1x8xi32>
    %136 = arith.cmpi eq, %20, %135 : vector<1x8xi32>
    %137 = vector.shape_cast %126 : vector<1x1xi32> to vector<1x1xi32>
    %138 = vector.broadcast %137 : vector<1x1xi32> to vector<1x8xi32>
    %139 = arith.select %136, %138, %26 : vector<1x8xi1>, vector<1x8xi32>
    %c0_i32_51 = arith.constant 0 : i32
    %140 = vector.broadcast %c0_i32_51 : i32 to vector<1x8xi32>
    %141 = arith.cmpi eq, %20, %140 : vector<1x8xi32>
    %142 = vector.shape_cast %134 : vector<1x1xf32> to vector<1x1xf32>
    %143 = vector.broadcast %142 : vector<1x1xf32> to vector<1x8xf32>
    %144 = arith.select %141, %143, %27 : vector<1x8xi1>, vector<1x8xf32>
    %145 = vector.broadcast %125 : vector<1x1xf32> to vector<1x128xf32>
    %146 = arith.mulf %145, %0 : vector<1x128xf32>
    %147 = arith.truncf %57 : vector<1x32xf32> to vector<1x32xbf16>
    %cst_52 = arith.constant dense<0.000000e+00> : vector<1x128xf32>
    %148 = tpu.matmul %147, %1, %cst_52 {dimension_numbers = #tpu.dot_dimension_numbers<[1], [0], [0], [1], [0, 0, 1, 1], [], []>} : vector<1x32xbf16>, vector<32x128xbf16>, vector<1x128xf32> -> vector<1x128xf32>
    %149 = arith.addf %146, %148 : vector<1x128xf32>
    %150 = arith.addf %149, %5 : vector<1x128xf32>
    %cst_53 = arith.constant 2.000000e+00 : f32
    %151 = vector.broadcast %cst_53 : f32 to vector<1x128xf32>
    %152 = arith.mulf %151, %150 : vector<1x128xf32>
    %153 = arith.select %16, %150, %152 : vector<1x128xi1>, vector<1x128xf32>
    %cst_54 = arith.constant 0.000000e+00 : f32
    %154 = vector.broadcast %cst_54 : f32 to vector<1x128xf32>
    %155 = arith.subf %154, %153 : vector<1x128xf32>
    %156 = math.exp %155 : vector<1x128xf32>
    %cst_55 = arith.constant 1.000000e+00 : f32
    %157 = vector.broadcast %cst_55 : f32 to vector<1x128xf32>
    %158 = arith.addf %157, %156 : vector<1x128xf32>
    %cst_56 = arith.constant 1.000000e+00 : f32
    %159 = vector.broadcast %cst_56 : f32 to vector<1x128xf32>
    %160 = arith.divf %159, %158 : vector<1x128xf32>
    %cst_57 = arith.constant 2.000000e+00 : f32
    %161 = vector.broadcast %cst_57 : f32 to vector<1x128xf32>
    %162 = arith.mulf %161, %160 : vector<1x128xf32>
    %cst_58 = arith.constant 1.000000e+00 : f32
    %163 = vector.broadcast %cst_58 : f32 to vector<1x128xf32>
    %164 = arith.subf %162, %163 : vector<1x128xf32>
    %165 = arith.select %16, %160, %164 : vector<1x128xi1>, vector<1x128xf32>
    %166 = vector.extract_strided_slice %165 {offsets = [0, 0], sizes = [1, 32], strides = [1, 1]} : vector<1x128xf32> to vector<1x32xf32>
    %167 = vector.extract_strided_slice %165 {offsets = [0, 32], sizes = [1, 32], strides = [1, 1]} : vector<1x128xf32> to vector<1x32xf32>
    %168 = vector.extract_strided_slice %165 {offsets = [0, 64], sizes = [1, 32], strides = [1, 1]} : vector<1x128xf32> to vector<1x32xf32>
    %169 = vector.extract_strided_slice %165 {offsets = [0, 96], sizes = [1, 32], strides = [1, 1]} : vector<1x128xf32> to vector<1x32xf32>
    %170 = arith.mulf %167, %55 : vector<1x32xf32>
    %171 = arith.mulf %166, %168 : vector<1x32xf32>
    %172 = arith.addf %170, %171 : vector<1x32xf32>
    %173 = math.tanh %172 : vector<1x32xf32>
    %174 = arith.mulf %169, %173 : vector<1x32xf32>
    %175 = tpu.concatenate %174, %85 in 1 : vector<1x32xf32>, vector<1x32xf32> -> vector<1x64xf32>
    %176 = arith.truncf %175 : vector<1x64xf32> to vector<1x64xbf16>
    %cst_59 = arith.constant dense<0.000000e+00> : vector<1x128xf32>
    %177 = tpu.matmul %176, %3, %cst_59 {dimension_numbers = #tpu.dot_dimension_numbers<[1], [0], [0], [1], [0, 0, 1, 1], [], []>} : vector<1x64xbf16>, vector<64x128xbf16>, vector<1x128xf32> -> vector<1x128xf32>
    %178 = arith.addf %177, %7 : vector<1x128xf32>
    %cst_60 = arith.constant 2.000000e+00 : f32
    %179 = vector.broadcast %cst_60 : f32 to vector<1x128xf32>
    %180 = arith.mulf %179, %178 : vector<1x128xf32>
    %181 = arith.select %16, %178, %180 : vector<1x128xi1>, vector<1x128xf32>
    %cst_61 = arith.constant 0.000000e+00 : f32
    %182 = vector.broadcast %cst_61 : f32 to vector<1x128xf32>
    %183 = arith.subf %182, %181 : vector<1x128xf32>
    %184 = math.exp %183 : vector<1x128xf32>
    %cst_62 = arith.constant 1.000000e+00 : f32
    %185 = vector.broadcast %cst_62 : f32 to vector<1x128xf32>
    %186 = arith.addf %185, %184 : vector<1x128xf32>
    %cst_63 = arith.constant 1.000000e+00 : f32
    %187 = vector.broadcast %cst_63 : f32 to vector<1x128xf32>
    %188 = arith.divf %187, %186 : vector<1x128xf32>
    %cst_64 = arith.constant 2.000000e+00 : f32
    %189 = vector.broadcast %cst_64 : f32 to vector<1x128xf32>
    %190 = arith.mulf %189, %188 : vector<1x128xf32>
    %cst_65 = arith.constant 1.000000e+00 : f32
    %191 = vector.broadcast %cst_65 : f32 to vector<1x128xf32>
    %192 = arith.subf %190, %191 : vector<1x128xf32>
    %193 = arith.select %16, %188, %192 : vector<1x128xi1>, vector<1x128xf32>
    %194 = vector.extract_strided_slice %193 {offsets = [0, 0], sizes = [1, 32], strides = [1, 1]} : vector<1x128xf32> to vector<1x32xf32>
    %195 = vector.extract_strided_slice %193 {offsets = [0, 32], sizes = [1, 32], strides = [1, 1]} : vector<1x128xf32> to vector<1x32xf32>
    %196 = vector.extract_strided_slice %193 {offsets = [0, 64], sizes = [1, 32], strides = [1, 1]} : vector<1x128xf32> to vector<1x32xf32>
    %197 = vector.extract_strided_slice %193 {offsets = [0, 96], sizes = [1, 32], strides = [1, 1]} : vector<1x128xf32> to vector<1x32xf32>
    %198 = arith.mulf %195, %83 : vector<1x32xf32>
    %199 = arith.mulf %194, %196 : vector<1x32xf32>
    %200 = arith.addf %198, %199 : vector<1x32xf32>
    %201 = math.tanh %200 : vector<1x32xf32>
    %202 = arith.mulf %197, %201 : vector<1x32xf32>
    %203 = arith.truncf %202 : vector<1x32xf32> to vector<1x32xbf16>
    %cst_66 = arith.constant dense<0.000000e+00> : vector<1x128xf32>
    %204 = tpu.matmul %203, %8, %cst_66 {dimension_numbers = #tpu.dot_dimension_numbers<[1], [0], [0], [1], [0, 0, 1, 1], [], []>} : vector<1x32xbf16>, vector<32x128xbf16>, vector<1x128xf32> -> vector<1x128xf32>
    %205 = arith.addf %204, %9 : vector<1x128xf32>
    %c4_i32_67 = arith.constant 4 : i32
    %206 = vector.broadcast %c4_i32_67 : i32 to vector<1x128xi32>
    %207 = arith.cmpi sge, %17, %206 : vector<1x128xi32>
    %c8_i32 = arith.constant 8 : i32
    %208 = vector.broadcast %c8_i32 : i32 to vector<1x128xi32>
    %209 = arith.cmpi slt, %17, %208 : vector<1x128xi32>
    %210 = arith.andi %207, %209 : vector<1x128xi1>
    %cst_68 = arith.constant -1.000000e+30 : f32
    %211 = vector.broadcast %cst_68 : f32 to vector<1x128xf32>
    %212 = arith.select %210, %205, %211 : vector<1x128xi1>, vector<1x128xf32>
    %cst_69 = arith.constant dense<0xFF800000> : vector<1xf32>
    %213 = vector.multi_reduction <maximumf>, %212, %cst_69 [1] : vector<1x128xf32> to vector<1xf32>
    %214 = vector.shape_cast %213 : vector<1xf32> to vector<1x1xf32>
    %215 = vector.broadcast %214 : vector<1x1xf32> to vector<1x128xf32>
    %216 = arith.subf %212, %215 : vector<1x128xf32>
    %217 = math.exp %216 : vector<1x128xf32>
    %cst_70 = arith.constant 0.000000e+00 : f32
    %218 = vector.broadcast %cst_70 : f32 to vector<1x128xf32>
    %219 = arith.select %210, %217, %218 : vector<1x128xi1>, vector<1x128xf32>
    %cst_71 = arith.constant dense<0.000000e+00> : vector<1xf32>
    %220 = vector.multi_reduction <add>, %219, %cst_71 [1] : vector<1x128xf32> to vector<1xf32>
    %221 = vector.shape_cast %220 : vector<1xf32> to vector<1x1xf32>
    %222 = tpu.reciprocal %221 : vector<1x1xf32> -> vector<1x1xf32>
    %223 = vector.broadcast %222 : vector<1x1xf32> to vector<1x128xf32>
    %224 = arith.mulf %219, %223 : vector<1x128xf32>
    %225 = vector.extract_strided_slice %10 {offsets = [0, 1], sizes = [1, 1], strides = [1, 1]} : vector<1x128xf32> to vector<1x1xf32>
    %c4_i32_72 = arith.constant 4 : i32
    %226 = vector.broadcast %c4_i32_72 : i32 to vector<4x128xi32>
    %227 = arith.addi %18, %226 : vector<4x128xi32>
    %228 = arith.cmpi sle, %19, %227 : vector<4x128xi32>
    %cst_73 = arith.constant 0.000000e+00 : f32
    %229 = vector.shape_cast %224 : vector<1x128xf32> to vector<1x128xf32>
    %230 = vector.broadcast %229 : vector<1x128xf32> to vector<4x128xf32>
    %231 = vector.broadcast %cst_73 : f32 to vector<4x128xf32>
    %232 = arith.select %228, %230, %231 : vector<4x128xi1>, vector<4x128xf32>
    %cst_74 = arith.constant dense<0.000000e+00> : vector<4xf32>
    %233 = vector.multi_reduction <add>, %232, %cst_74 [1] : vector<4x128xf32> to vector<4xf32>
    %234 = vector.shape_cast %233 : vector<4xf32> to vector<4x1xf32>
    %235 = vector.broadcast %225 : vector<1x1xf32> to vector<4x1xf32>
    %236 = arith.cmpf olt, %234, %235 : vector<4x1xf32>
    %237 = arith.extui %236 : vector<4x1xi1> to vector<4x1xi32>
    %238 = arith.sitofp %237 : vector<4x1xi32> to vector<4x1xf32>
    %cst_75 = arith.constant dense<0.000000e+00> : vector<1xf32>
    %239 = vector.multi_reduction <add>, %238, %cst_75 [0] : vector<4x1xf32> to vector<1xf32>
    %240 = vector.shape_cast %239 : vector<1xf32> to vector<1x1xf32>
    %cst_76 = arith.constant 3.000000e+00 : f32
    %241 = vector.broadcast %cst_76 : f32 to vector<1x1xf32>
    %242 = arith.minimumf %240, %241 : vector<1x1xf32>
    %243 = arith.fptosi %242 : vector<1x1xf32> to vector<1x1xi32>
    %c4_i32_77 = arith.constant 4 : i32
    %244 = vector.broadcast %c4_i32_77 : i32 to vector<1x1xi32>
    %245 = arith.addi %243, %244 : vector<1x1xi32>
    %246 = vector.broadcast %245 : vector<1x1xi32> to vector<1x128xi32>
    %247 = arith.cmpi eq, %17, %246 : vector<1x128xi32>
    %cst_78 = arith.constant 0.000000e+00 : f32
    %248 = vector.broadcast %cst_78 : f32 to vector<1x128xf32>
    %249 = arith.select %247, %224, %248 : vector<1x128xi1>, vector<1x128xf32>
    %cst_79 = arith.constant dense<0.000000e+00> : vector<1xf32>
    %250 = vector.multi_reduction <add>, %249, %cst_79 [1] : vector<1x128xf32> to vector<1xf32>
    %251 = vector.shape_cast %250 : vector<1xf32> to vector<1x1xf32>
    %c1_i32 = arith.constant 1 : i32
    %252 = vector.broadcast %c1_i32 : i32 to vector<1x8xi32>
    %253 = arith.cmpi eq, %20, %252 : vector<1x8xi32>
    %254 = vector.shape_cast %243 : vector<1x1xi32> to vector<1x1xi32>
    %255 = vector.broadcast %254 : vector<1x1xi32> to vector<1x8xi32>
    %256 = arith.select %253, %255, %139 : vector<1x8xi1>, vector<1x8xi32>
    %c1_i32_80 = arith.constant 1 : i32
    %257 = vector.broadcast %c1_i32_80 : i32 to vector<1x8xi32>
    %258 = arith.cmpi eq, %20, %257 : vector<1x8xi32>
    %259 = vector.shape_cast %251 : vector<1x1xf32> to vector<1x1xf32>
    %260 = vector.broadcast %259 : vector<1x1xf32> to vector<1x8xf32>
    %261 = arith.select %258, %260, %144 : vector<1x8xi1>, vector<1x8xf32>
    %262 = vector.broadcast %242 : vector<1x1xf32> to vector<1x128xf32>
    %263 = arith.mulf %262, %0 : vector<1x128xf32>
    %264 = arith.truncf %174 : vector<1x32xf32> to vector<1x32xbf16>
    %cst_81 = arith.constant dense<0.000000e+00> : vector<1x128xf32>
    %265 = tpu.matmul %264, %1, %cst_81 {dimension_numbers = #tpu.dot_dimension_numbers<[1], [0], [0], [1], [0, 0, 1, 1], [], []>} : vector<1x32xbf16>, vector<32x128xbf16>, vector<1x128xf32> -> vector<1x128xf32>
    %266 = arith.addf %263, %265 : vector<1x128xf32>
    %267 = arith.addf %266, %5 : vector<1x128xf32>
    %cst_82 = arith.constant 2.000000e+00 : f32
    %268 = vector.broadcast %cst_82 : f32 to vector<1x128xf32>
    %269 = arith.mulf %268, %267 : vector<1x128xf32>
    %270 = arith.select %16, %267, %269 : vector<1x128xi1>, vector<1x128xf32>
    %cst_83 = arith.constant 0.000000e+00 : f32
    %271 = vector.broadcast %cst_83 : f32 to vector<1x128xf32>
    %272 = arith.subf %271, %270 : vector<1x128xf32>
    %273 = math.exp %272 : vector<1x128xf32>
    %cst_84 = arith.constant 1.000000e+00 : f32
    %274 = vector.broadcast %cst_84 : f32 to vector<1x128xf32>
    %275 = arith.addf %274, %273 : vector<1x128xf32>
    %cst_85 = arith.constant 1.000000e+00 : f32
    %276 = vector.broadcast %cst_85 : f32 to vector<1x128xf32>
    %277 = arith.divf %276, %275 : vector<1x128xf32>
    %cst_86 = arith.constant 2.000000e+00 : f32
    %278 = vector.broadcast %cst_86 : f32 to vector<1x128xf32>
    %279 = arith.mulf %278, %277 : vector<1x128xf32>
    %cst_87 = arith.constant 1.000000e+00 : f32
    %280 = vector.broadcast %cst_87 : f32 to vector<1x128xf32>
    %281 = arith.subf %279, %280 : vector<1x128xf32>
    %282 = arith.select %16, %277, %281 : vector<1x128xi1>, vector<1x128xf32>
    %283 = vector.extract_strided_slice %282 {offsets = [0, 0], sizes = [1, 32], strides = [1, 1]} : vector<1x128xf32> to vector<1x32xf32>
    %284 = vector.extract_strided_slice %282 {offsets = [0, 32], sizes = [1, 32], strides = [1, 1]} : vector<1x128xf32> to vector<1x32xf32>
    %285 = vector.extract_strided_slice %282 {offsets = [0, 64], sizes = [1, 32], strides = [1, 1]} : vector<1x128xf32> to vector<1x32xf32>
    %286 = vector.extract_strided_slice %282 {offsets = [0, 96], sizes = [1, 32], strides = [1, 1]} : vector<1x128xf32> to vector<1x32xf32>
    %287 = arith.mulf %284, %172 : vector<1x32xf32>
    %288 = arith.mulf %283, %285 : vector<1x32xf32>
    %289 = arith.addf %287, %288 : vector<1x32xf32>
    %290 = math.tanh %289 : vector<1x32xf32>
    %291 = arith.mulf %286, %290 : vector<1x32xf32>
    %292 = tpu.concatenate %291, %202 in 1 : vector<1x32xf32>, vector<1x32xf32> -> vector<1x64xf32>
    %293 = arith.truncf %292 : vector<1x64xf32> to vector<1x64xbf16>
    %cst_88 = arith.constant dense<0.000000e+00> : vector<1x128xf32>
    %294 = tpu.matmul %293, %3, %cst_88 {dimension_numbers = #tpu.dot_dimension_numbers<[1], [0], [0], [1], [0, 0, 1, 1], [], []>} : vector<1x64xbf16>, vector<64x128xbf16>, vector<1x128xf32> -> vector<1x128xf32>
    %295 = arith.addf %294, %7 : vector<1x128xf32>
    %cst_89 = arith.constant 2.000000e+00 : f32
    %296 = vector.broadcast %cst_89 : f32 to vector<1x128xf32>
    %297 = arith.mulf %296, %295 : vector<1x128xf32>
    %298 = arith.select %16, %295, %297 : vector<1x128xi1>, vector<1x128xf32>
    %cst_90 = arith.constant 0.000000e+00 : f32
    %299 = vector.broadcast %cst_90 : f32 to vector<1x128xf32>
    %300 = arith.subf %299, %298 : vector<1x128xf32>
    %301 = math.exp %300 : vector<1x128xf32>
    %cst_91 = arith.constant 1.000000e+00 : f32
    %302 = vector.broadcast %cst_91 : f32 to vector<1x128xf32>
    %303 = arith.addf %302, %301 : vector<1x128xf32>
    %cst_92 = arith.constant 1.000000e+00 : f32
    %304 = vector.broadcast %cst_92 : f32 to vector<1x128xf32>
    %305 = arith.divf %304, %303 : vector<1x128xf32>
    %cst_93 = arith.constant 2.000000e+00 : f32
    %306 = vector.broadcast %cst_93 : f32 to vector<1x128xf32>
    %307 = arith.mulf %306, %305 : vector<1x128xf32>
    %cst_94 = arith.constant 1.000000e+00 : f32
    %308 = vector.broadcast %cst_94 : f32 to vector<1x128xf32>
    %309 = arith.subf %307, %308 : vector<1x128xf32>
    %310 = arith.select %16, %305, %309 : vector<1x128xi1>, vector<1x128xf32>
    %311 = vector.extract_strided_slice %310 {offsets = [0, 0], sizes = [1, 32], strides = [1, 1]} : vector<1x128xf32> to vector<1x32xf32>
    %312 = vector.extract_strided_slice %310 {offsets = [0, 32], sizes = [1, 32], strides = [1, 1]} : vector<1x128xf32> to vector<1x32xf32>
    %313 = vector.extract_strided_slice %310 {offsets = [0, 64], sizes = [1, 32], strides = [1, 1]} : vector<1x128xf32> to vector<1x32xf32>
    %314 = vector.extract_strided_slice %310 {offsets = [0, 96], sizes = [1, 32], strides = [1, 1]} : vector<1x128xf32> to vector<1x32xf32>
    %315 = arith.mulf %312, %200 : vector<1x32xf32>
    %316 = arith.mulf %311, %313 : vector<1x32xf32>
    %317 = arith.addf %315, %316 : vector<1x32xf32>
    %318 = math.tanh %317 : vector<1x32xf32>
    %319 = arith.mulf %314, %318 : vector<1x32xf32>
    %320 = arith.truncf %319 : vector<1x32xf32> to vector<1x32xbf16>
    %cst_95 = arith.constant dense<0.000000e+00> : vector<1x128xf32>
    %321 = tpu.matmul %320, %8, %cst_95 {dimension_numbers = #tpu.dot_dimension_numbers<[1], [0], [0], [1], [0, 0, 1, 1], [], []>} : vector<1x32xbf16>, vector<32x128xbf16>, vector<1x128xf32> -> vector<1x128xf32>
    %322 = arith.addf %321, %9 : vector<1x128xf32>
    %c8_i32_96 = arith.constant 8 : i32
    %323 = vector.broadcast %c8_i32_96 : i32 to vector<1x128xi32>
    %324 = arith.cmpi sge, %17, %323 : vector<1x128xi32>
    %c12_i32 = arith.constant 12 : i32
    %325 = vector.broadcast %c12_i32 : i32 to vector<1x128xi32>
    %326 = arith.cmpi slt, %17, %325 : vector<1x128xi32>
    %327 = arith.andi %324, %326 : vector<1x128xi1>
    %cst_97 = arith.constant -1.000000e+30 : f32
    %328 = vector.broadcast %cst_97 : f32 to vector<1x128xf32>
    %329 = arith.select %327, %322, %328 : vector<1x128xi1>, vector<1x128xf32>
    %cst_98 = arith.constant dense<0xFF800000> : vector<1xf32>
    %330 = vector.multi_reduction <maximumf>, %329, %cst_98 [1] : vector<1x128xf32> to vector<1xf32>
    %331 = vector.shape_cast %330 : vector<1xf32> to vector<1x1xf32>
    %332 = vector.broadcast %331 : vector<1x1xf32> to vector<1x128xf32>
    %333 = arith.subf %329, %332 : vector<1x128xf32>
    %334 = math.exp %333 : vector<1x128xf32>
    %cst_99 = arith.constant 0.000000e+00 : f32
    %335 = vector.broadcast %cst_99 : f32 to vector<1x128xf32>
    %336 = arith.select %327, %334, %335 : vector<1x128xi1>, vector<1x128xf32>
    %cst_100 = arith.constant dense<0.000000e+00> : vector<1xf32>
    %337 = vector.multi_reduction <add>, %336, %cst_100 [1] : vector<1x128xf32> to vector<1xf32>
    %338 = vector.shape_cast %337 : vector<1xf32> to vector<1x1xf32>
    %339 = tpu.reciprocal %338 : vector<1x1xf32> -> vector<1x1xf32>
    %340 = vector.broadcast %339 : vector<1x1xf32> to vector<1x128xf32>
    %341 = arith.mulf %336, %340 : vector<1x128xf32>
    %342 = vector.extract_strided_slice %10 {offsets = [0, 2], sizes = [1, 1], strides = [1, 1]} : vector<1x128xf32> to vector<1x1xf32>
    %c8_i32_101 = arith.constant 8 : i32
    %343 = vector.broadcast %c8_i32_101 : i32 to vector<4x128xi32>
    %344 = arith.addi %18, %343 : vector<4x128xi32>
    %345 = arith.cmpi sle, %19, %344 : vector<4x128xi32>
    %cst_102 = arith.constant 0.000000e+00 : f32
    %346 = vector.shape_cast %341 : vector<1x128xf32> to vector<1x128xf32>
    %347 = vector.broadcast %346 : vector<1x128xf32> to vector<4x128xf32>
    %348 = vector.broadcast %cst_102 : f32 to vector<4x128xf32>
    %349 = arith.select %345, %347, %348 : vector<4x128xi1>, vector<4x128xf32>
    %cst_103 = arith.constant dense<0.000000e+00> : vector<4xf32>
    %350 = vector.multi_reduction <add>, %349, %cst_103 [1] : vector<4x128xf32> to vector<4xf32>
    %351 = vector.shape_cast %350 : vector<4xf32> to vector<4x1xf32>
    %352 = vector.broadcast %342 : vector<1x1xf32> to vector<4x1xf32>
    %353 = arith.cmpf olt, %351, %352 : vector<4x1xf32>
    %354 = arith.extui %353 : vector<4x1xi1> to vector<4x1xi32>
    %355 = arith.sitofp %354 : vector<4x1xi32> to vector<4x1xf32>
    %cst_104 = arith.constant dense<0.000000e+00> : vector<1xf32>
    %356 = vector.multi_reduction <add>, %355, %cst_104 [0] : vector<4x1xf32> to vector<1xf32>
    %357 = vector.shape_cast %356 : vector<1xf32> to vector<1x1xf32>
    %cst_105 = arith.constant 3.000000e+00 : f32
    %358 = vector.broadcast %cst_105 : f32 to vector<1x1xf32>
    %359 = arith.minimumf %357, %358 : vector<1x1xf32>
    %360 = arith.fptosi %359 : vector<1x1xf32> to vector<1x1xi32>
    %c8_i32_106 = arith.constant 8 : i32
    %361 = vector.broadcast %c8_i32_106 : i32 to vector<1x1xi32>
    %362 = arith.addi %360, %361 : vector<1x1xi32>
    %363 = vector.broadcast %362 : vector<1x1xi32> to vector<1x128xi32>
    %364 = arith.cmpi eq, %17, %363 : vector<1x128xi32>
    %cst_107 = arith.constant 0.000000e+00 : f32
    %365 = vector.broadcast %cst_107 : f32 to vector<1x128xf32>
    %366 = arith.select %364, %341, %365 : vector<1x128xi1>, vector<1x128xf32>
    %cst_108 = arith.constant dense<0.000000e+00> : vector<1xf32>
    %367 = vector.multi_reduction <add>, %366, %cst_108 [1] : vector<1x128xf32> to vector<1xf32>
    %368 = vector.shape_cast %367 : vector<1xf32> to vector<1x1xf32>
    %c2_i32 = arith.constant 2 : i32
    %369 = vector.broadcast %c2_i32 : i32 to vector<1x8xi32>
    %370 = arith.cmpi eq, %20, %369 : vector<1x8xi32>
    %371 = vector.shape_cast %360 : vector<1x1xi32> to vector<1x1xi32>
    %372 = vector.broadcast %371 : vector<1x1xi32> to vector<1x8xi32>
    %373 = arith.select %370, %372, %256 : vector<1x8xi1>, vector<1x8xi32>
    %c2_i32_109 = arith.constant 2 : i32
    %374 = vector.broadcast %c2_i32_109 : i32 to vector<1x8xi32>
    %375 = arith.cmpi eq, %20, %374 : vector<1x8xi32>
    %376 = vector.shape_cast %368 : vector<1x1xf32> to vector<1x1xf32>
    %377 = vector.broadcast %376 : vector<1x1xf32> to vector<1x8xf32>
    %378 = arith.select %375, %377, %261 : vector<1x8xi1>, vector<1x8xf32>
    %379 = vector.broadcast %359 : vector<1x1xf32> to vector<1x128xf32>
    %380 = arith.mulf %379, %0 : vector<1x128xf32>
    %381 = arith.truncf %291 : vector<1x32xf32> to vector<1x32xbf16>
    %cst_110 = arith.constant dense<0.000000e+00> : vector<1x128xf32>
    %382 = tpu.matmul %381, %1, %cst_110 {dimension_numbers = #tpu.dot_dimension_numbers<[1], [0], [0], [1], [0, 0, 1, 1], [], []>} : vector<1x32xbf16>, vector<32x128xbf16>, vector<1x128xf32> -> vector<1x128xf32>
    %383 = arith.addf %380, %382 : vector<1x128xf32>
    %384 = arith.addf %383, %5 : vector<1x128xf32>
    %cst_111 = arith.constant 2.000000e+00 : f32
    %385 = vector.broadcast %cst_111 : f32 to vector<1x128xf32>
    %386 = arith.mulf %385, %384 : vector<1x128xf32>
    %387 = arith.select %16, %384, %386 : vector<1x128xi1>, vector<1x128xf32>
    %cst_112 = arith.constant 0.000000e+00 : f32
    %388 = vector.broadcast %cst_112 : f32 to vector<1x128xf32>
    %389 = arith.subf %388, %387 : vector<1x128xf32>
    %390 = math.exp %389 : vector<1x128xf32>
    %cst_113 = arith.constant 1.000000e+00 : f32
    %391 = vector.broadcast %cst_113 : f32 to vector<1x128xf32>
    %392 = arith.addf %391, %390 : vector<1x128xf32>
    %cst_114 = arith.constant 1.000000e+00 : f32
    %393 = vector.broadcast %cst_114 : f32 to vector<1x128xf32>
    %394 = arith.divf %393, %392 : vector<1x128xf32>
    %cst_115 = arith.constant 2.000000e+00 : f32
    %395 = vector.broadcast %cst_115 : f32 to vector<1x128xf32>
    %396 = arith.mulf %395, %394 : vector<1x128xf32>
    %cst_116 = arith.constant 1.000000e+00 : f32
    %397 = vector.broadcast %cst_116 : f32 to vector<1x128xf32>
    %398 = arith.subf %396, %397 : vector<1x128xf32>
    %399 = arith.select %16, %394, %398 : vector<1x128xi1>, vector<1x128xf32>
    %400 = vector.extract_strided_slice %399 {offsets = [0, 0], sizes = [1, 32], strides = [1, 1]} : vector<1x128xf32> to vector<1x32xf32>
    %401 = vector.extract_strided_slice %399 {offsets = [0, 32], sizes = [1, 32], strides = [1, 1]} : vector<1x128xf32> to vector<1x32xf32>
    %402 = vector.extract_strided_slice %399 {offsets = [0, 64], sizes = [1, 32], strides = [1, 1]} : vector<1x128xf32> to vector<1x32xf32>
    %403 = vector.extract_strided_slice %399 {offsets = [0, 96], sizes = [1, 32], strides = [1, 1]} : vector<1x128xf32> to vector<1x32xf32>
    %404 = arith.mulf %401, %289 : vector<1x32xf32>
    %405 = arith.mulf %400, %402 : vector<1x32xf32>
    %406 = arith.addf %404, %405 : vector<1x32xf32>
    %407 = math.tanh %406 : vector<1x32xf32>
    %408 = arith.mulf %403, %407 : vector<1x32xf32>
    %409 = tpu.concatenate %408, %319 in 1 : vector<1x32xf32>, vector<1x32xf32> -> vector<1x64xf32>
    %410 = arith.truncf %409 : vector<1x64xf32> to vector<1x64xbf16>
    %cst_117 = arith.constant dense<0.000000e+00> : vector<1x128xf32>
    %411 = tpu.matmul %410, %3, %cst_117 {dimension_numbers = #tpu.dot_dimension_numbers<[1], [0], [0], [1], [0, 0, 1, 1], [], []>} : vector<1x64xbf16>, vector<64x128xbf16>, vector<1x128xf32> -> vector<1x128xf32>
    %412 = arith.addf %411, %7 : vector<1x128xf32>
    %cst_118 = arith.constant 2.000000e+00 : f32
    %413 = vector.broadcast %cst_118 : f32 to vector<1x128xf32>
    %414 = arith.mulf %413, %412 : vector<1x128xf32>
    %415 = arith.select %16, %412, %414 : vector<1x128xi1>, vector<1x128xf32>
    %cst_119 = arith.constant 0.000000e+00 : f32
    %416 = vector.broadcast %cst_119 : f32 to vector<1x128xf32>
    %417 = arith.subf %416, %415 : vector<1x128xf32>
    %418 = math.exp %417 : vector<1x128xf32>
    %cst_120 = arith.constant 1.000000e+00 : f32
    %419 = vector.broadcast %cst_120 : f32 to vector<1x128xf32>
    %420 = arith.addf %419, %418 : vector<1x128xf32>
    %cst_121 = arith.constant 1.000000e+00 : f32
    %421 = vector.broadcast %cst_121 : f32 to vector<1x128xf32>
    %422 = arith.divf %421, %420 : vector<1x128xf32>
    %cst_122 = arith.constant 2.000000e+00 : f32
    %423 = vector.broadcast %cst_122 : f32 to vector<1x128xf32>
    %424 = arith.mulf %423, %422 : vector<1x128xf32>
    %cst_123 = arith.constant 1.000000e+00 : f32
    %425 = vector.broadcast %cst_123 : f32 to vector<1x128xf32>
    %426 = arith.subf %424, %425 : vector<1x128xf32>
    %427 = arith.select %16, %422, %426 : vector<1x128xi1>, vector<1x128xf32>
    %428 = vector.extract_strided_slice %427 {offsets = [0, 0], sizes = [1, 32], strides = [1, 1]} : vector<1x128xf32> to vector<1x32xf32>
    %429 = vector.extract_strided_slice %427 {offsets = [0, 32], sizes = [1, 32], strides = [1, 1]} : vector<1x128xf32> to vector<1x32xf32>
    %430 = vector.extract_strided_slice %427 {offsets = [0, 64], sizes = [1, 32], strides = [1, 1]} : vector<1x128xf32> to vector<1x32xf32>
    %431 = vector.extract_strided_slice %427 {offsets = [0, 96], sizes = [1, 32], strides = [1, 1]} : vector<1x128xf32> to vector<1x32xf32>
    %432 = arith.mulf %429, %317 : vector<1x32xf32>
    %433 = arith.mulf %428, %430 : vector<1x32xf32>
    %434 = arith.addf %432, %433 : vector<1x32xf32>
    %435 = math.tanh %434 : vector<1x32xf32>
    %436 = arith.mulf %431, %435 : vector<1x32xf32>
    %437 = arith.truncf %436 : vector<1x32xf32> to vector<1x32xbf16>
    %cst_124 = arith.constant dense<0.000000e+00> : vector<1x128xf32>
    %438 = tpu.matmul %437, %8, %cst_124 {dimension_numbers = #tpu.dot_dimension_numbers<[1], [0], [0], [1], [0, 0, 1, 1], [], []>} : vector<1x32xbf16>, vector<32x128xbf16>, vector<1x128xf32> -> vector<1x128xf32>
    %439 = arith.addf %438, %9 : vector<1x128xf32>
    %c12_i32_125 = arith.constant 12 : i32
    %440 = vector.broadcast %c12_i32_125 : i32 to vector<1x128xi32>
    %441 = arith.cmpi sge, %17, %440 : vector<1x128xi32>
    %c16_i32 = arith.constant 16 : i32
    %442 = vector.broadcast %c16_i32 : i32 to vector<1x128xi32>
    %443 = arith.cmpi slt, %17, %442 : vector<1x128xi32>
    %444 = arith.andi %441, %443 : vector<1x128xi1>
    %cst_126 = arith.constant -1.000000e+30 : f32
    %445 = vector.broadcast %cst_126 : f32 to vector<1x128xf32>
    %446 = arith.select %444, %439, %445 : vector<1x128xi1>, vector<1x128xf32>
    %cst_127 = arith.constant dense<0xFF800000> : vector<1xf32>
    %447 = vector.multi_reduction <maximumf>, %446, %cst_127 [1] : vector<1x128xf32> to vector<1xf32>
    %448 = vector.shape_cast %447 : vector<1xf32> to vector<1x1xf32>
    %449 = vector.broadcast %448 : vector<1x1xf32> to vector<1x128xf32>
    %450 = arith.subf %446, %449 : vector<1x128xf32>
    %451 = math.exp %450 : vector<1x128xf32>
    %cst_128 = arith.constant 0.000000e+00 : f32
    %452 = vector.broadcast %cst_128 : f32 to vector<1x128xf32>
    %453 = arith.select %444, %451, %452 : vector<1x128xi1>, vector<1x128xf32>
    %cst_129 = arith.constant dense<0.000000e+00> : vector<1xf32>
    %454 = vector.multi_reduction <add>, %453, %cst_129 [1] : vector<1x128xf32> to vector<1xf32>
    %455 = vector.shape_cast %454 : vector<1xf32> to vector<1x1xf32>
    %456 = tpu.reciprocal %455 : vector<1x1xf32> -> vector<1x1xf32>
    %457 = vector.broadcast %456 : vector<1x1xf32> to vector<1x128xf32>
    %458 = arith.mulf %453, %457 : vector<1x128xf32>
    %459 = vector.extract_strided_slice %10 {offsets = [0, 3], sizes = [1, 1], strides = [1, 1]} : vector<1x128xf32> to vector<1x1xf32>
    %c12_i32_130 = arith.constant 12 : i32
    %460 = vector.broadcast %c12_i32_130 : i32 to vector<4x128xi32>
    %461 = arith.addi %18, %460 : vector<4x128xi32>
    %462 = arith.cmpi sle, %19, %461 : vector<4x128xi32>
    %cst_131 = arith.constant 0.000000e+00 : f32
    %463 = vector.shape_cast %458 : vector<1x128xf32> to vector<1x128xf32>
    %464 = vector.broadcast %463 : vector<1x128xf32> to vector<4x128xf32>
    %465 = vector.broadcast %cst_131 : f32 to vector<4x128xf32>
    %466 = arith.select %462, %464, %465 : vector<4x128xi1>, vector<4x128xf32>
    %cst_132 = arith.constant dense<0.000000e+00> : vector<4xf32>
    %467 = vector.multi_reduction <add>, %466, %cst_132 [1] : vector<4x128xf32> to vector<4xf32>
    %468 = vector.shape_cast %467 : vector<4xf32> to vector<4x1xf32>
    %469 = vector.broadcast %459 : vector<1x1xf32> to vector<4x1xf32>
    %470 = arith.cmpf olt, %468, %469 : vector<4x1xf32>
    %471 = arith.extui %470 : vector<4x1xi1> to vector<4x1xi32>
    %472 = arith.sitofp %471 : vector<4x1xi32> to vector<4x1xf32>
    %cst_133 = arith.constant dense<0.000000e+00> : vector<1xf32>
    %473 = vector.multi_reduction <add>, %472, %cst_133 [0] : vector<4x1xf32> to vector<1xf32>
    %474 = vector.shape_cast %473 : vector<1xf32> to vector<1x1xf32>
    %cst_134 = arith.constant 3.000000e+00 : f32
    %475 = vector.broadcast %cst_134 : f32 to vector<1x1xf32>
    %476 = arith.minimumf %474, %475 : vector<1x1xf32>
    %477 = arith.fptosi %476 : vector<1x1xf32> to vector<1x1xi32>
    %c12_i32_135 = arith.constant 12 : i32
    %478 = vector.broadcast %c12_i32_135 : i32 to vector<1x1xi32>
    %479 = arith.addi %477, %478 : vector<1x1xi32>
    %480 = vector.broadcast %479 : vector<1x1xi32> to vector<1x128xi32>
    %481 = arith.cmpi eq, %17, %480 : vector<1x128xi32>
    %cst_136 = arith.constant 0.000000e+00 : f32
    %482 = vector.broadcast %cst_136 : f32 to vector<1x128xf32>
    %483 = arith.select %481, %458, %482 : vector<1x128xi1>, vector<1x128xf32>
    %cst_137 = arith.constant dense<0.000000e+00> : vector<1xf32>
    %484 = vector.multi_reduction <add>, %483, %cst_137 [1] : vector<1x128xf32> to vector<1xf32>
    %485 = vector.shape_cast %484 : vector<1xf32> to vector<1x1xf32>
    %c3_i32 = arith.constant 3 : i32
    %486 = vector.broadcast %c3_i32 : i32 to vector<1x8xi32>
    %487 = arith.cmpi eq, %20, %486 : vector<1x8xi32>
    %488 = vector.shape_cast %477 : vector<1x1xi32> to vector<1x1xi32>
    %489 = vector.broadcast %488 : vector<1x1xi32> to vector<1x8xi32>
    %490 = arith.select %487, %489, %373 : vector<1x8xi1>, vector<1x8xi32>
    %c3_i32_138 = arith.constant 3 : i32
    %491 = vector.broadcast %c3_i32_138 : i32 to vector<1x8xi32>
    %492 = arith.cmpi eq, %20, %491 : vector<1x8xi32>
    %493 = vector.shape_cast %485 : vector<1x1xf32> to vector<1x1xf32>
    %494 = vector.broadcast %493 : vector<1x1xf32> to vector<1x8xf32>
    %495 = arith.select %492, %494, %378 : vector<1x8xi1>, vector<1x8xf32>
    %496 = vector.broadcast %476 : vector<1x1xf32> to vector<1x128xf32>
    %497 = arith.mulf %496, %0 : vector<1x128xf32>
    %498 = arith.truncf %408 : vector<1x32xf32> to vector<1x32xbf16>
    %cst_139 = arith.constant dense<0.000000e+00> : vector<1x128xf32>
    %499 = tpu.matmul %498, %1, %cst_139 {dimension_numbers = #tpu.dot_dimension_numbers<[1], [0], [0], [1], [0, 0, 1, 1], [], []>} : vector<1x32xbf16>, vector<32x128xbf16>, vector<1x128xf32> -> vector<1x128xf32>
    %500 = arith.addf %497, %499 : vector<1x128xf32>
    %501 = arith.addf %500, %5 : vector<1x128xf32>
    %cst_140 = arith.constant 2.000000e+00 : f32
    %502 = vector.broadcast %cst_140 : f32 to vector<1x128xf32>
    %503 = arith.mulf %502, %501 : vector<1x128xf32>
    %504 = arith.select %16, %501, %503 : vector<1x128xi1>, vector<1x128xf32>
    %cst_141 = arith.constant 0.000000e+00 : f32
    %505 = vector.broadcast %cst_141 : f32 to vector<1x128xf32>
    %506 = arith.subf %505, %504 : vector<1x128xf32>
    %507 = math.exp %506 : vector<1x128xf32>
    %cst_142 = arith.constant 1.000000e+00 : f32
    %508 = vector.broadcast %cst_142 : f32 to vector<1x128xf32>
    %509 = arith.addf %508, %507 : vector<1x128xf32>
    %cst_143 = arith.constant 1.000000e+00 : f32
    %510 = vector.broadcast %cst_143 : f32 to vector<1x128xf32>
    %511 = arith.divf %510, %509 : vector<1x128xf32>
    %cst_144 = arith.constant 2.000000e+00 : f32
    %512 = vector.broadcast %cst_144 : f32 to vector<1x128xf32>
    %513 = arith.mulf %512, %511 : vector<1x128xf32>
    %cst_145 = arith.constant 1.000000e+00 : f32
    %514 = vector.broadcast %cst_145 : f32 to vector<1x128xf32>
    %515 = arith.subf %513, %514 : vector<1x128xf32>
    %516 = arith.select %16, %511, %515 : vector<1x128xi1>, vector<1x128xf32>
    %517 = vector.extract_strided_slice %516 {offsets = [0, 0], sizes = [1, 32], strides = [1, 1]} : vector<1x128xf32> to vector<1x32xf32>
    %518 = vector.extract_strided_slice %516 {offsets = [0, 32], sizes = [1, 32], strides = [1, 1]} : vector<1x128xf32> to vector<1x32xf32>
    %519 = vector.extract_strided_slice %516 {offsets = [0, 64], sizes = [1, 32], strides = [1, 1]} : vector<1x128xf32> to vector<1x32xf32>
    %520 = vector.extract_strided_slice %516 {offsets = [0, 96], sizes = [1, 32], strides = [1, 1]} : vector<1x128xf32> to vector<1x32xf32>
    %521 = arith.mulf %518, %406 : vector<1x32xf32>
    %522 = arith.mulf %517, %519 : vector<1x32xf32>
    %523 = arith.addf %521, %522 : vector<1x32xf32>
    %524 = math.tanh %523 : vector<1x32xf32>
    %525 = arith.mulf %520, %524 : vector<1x32xf32>
    %526 = tpu.concatenate %525, %436 in 1 : vector<1x32xf32>, vector<1x32xf32> -> vector<1x64xf32>
    %527 = arith.truncf %526 : vector<1x64xf32> to vector<1x64xbf16>
    %cst_146 = arith.constant dense<0.000000e+00> : vector<1x128xf32>
    %528 = tpu.matmul %527, %3, %cst_146 {dimension_numbers = #tpu.dot_dimension_numbers<[1], [0], [0], [1], [0, 0, 1, 1], [], []>} : vector<1x64xbf16>, vector<64x128xbf16>, vector<1x128xf32> -> vector<1x128xf32>
    %529 = arith.addf %528, %7 : vector<1x128xf32>
    %cst_147 = arith.constant 2.000000e+00 : f32
    %530 = vector.broadcast %cst_147 : f32 to vector<1x128xf32>
    %531 = arith.mulf %530, %529 : vector<1x128xf32>
    %532 = arith.select %16, %529, %531 : vector<1x128xi1>, vector<1x128xf32>
    %cst_148 = arith.constant 0.000000e+00 : f32
    %533 = vector.broadcast %cst_148 : f32 to vector<1x128xf32>
    %534 = arith.subf %533, %532 : vector<1x128xf32>
    %535 = math.exp %534 : vector<1x128xf32>
    %cst_149 = arith.constant 1.000000e+00 : f32
    %536 = vector.broadcast %cst_149 : f32 to vector<1x128xf32>
    %537 = arith.addf %536, %535 : vector<1x128xf32>
    %cst_150 = arith.constant 1.000000e+00 : f32
    %538 = vector.broadcast %cst_150 : f32 to vector<1x128xf32>
    %539 = arith.divf %538, %537 : vector<1x128xf32>
    %cst_151 = arith.constant 2.000000e+00 : f32
    %540 = vector.broadcast %cst_151 : f32 to vector<1x128xf32>
    %541 = arith.mulf %540, %539 : vector<1x128xf32>
    %cst_152 = arith.constant 1.000000e+00 : f32
    %542 = vector.broadcast %cst_152 : f32 to vector<1x128xf32>
    %543 = arith.subf %541, %542 : vector<1x128xf32>
    %544 = arith.select %16, %539, %543 : vector<1x128xi1>, vector<1x128xf32>
    %545 = vector.extract_strided_slice %544 {offsets = [0, 0], sizes = [1, 32], strides = [1, 1]} : vector<1x128xf32> to vector<1x32xf32>
    %546 = vector.extract_strided_slice %544 {offsets = [0, 32], sizes = [1, 32], strides = [1, 1]} : vector<1x128xf32> to vector<1x32xf32>
    %547 = vector.extract_strided_slice %544 {offsets = [0, 64], sizes = [1, 32], strides = [1, 1]} : vector<1x128xf32> to vector<1x32xf32>
    %548 = vector.extract_strided_slice %544 {offsets = [0, 96], sizes = [1, 32], strides = [1, 1]} : vector<1x128xf32> to vector<1x32xf32>
    %549 = arith.mulf %546, %434 : vector<1x32xf32>
    %550 = arith.mulf %545, %547 : vector<1x32xf32>
    %551 = arith.addf %549, %550 : vector<1x32xf32>
    %552 = math.tanh %551 : vector<1x32xf32>
    %553 = arith.mulf %548, %552 : vector<1x32xf32>
    %554 = arith.truncf %553 : vector<1x32xf32> to vector<1x32xbf16>
    %cst_153 = arith.constant dense<0.000000e+00> : vector<1x128xf32>
    %555 = tpu.matmul %554, %8, %cst_153 {dimension_numbers = #tpu.dot_dimension_numbers<[1], [0], [0], [1], [0, 0, 1, 1], [], []>} : vector<1x32xbf16>, vector<32x128xbf16>, vector<1x128xf32> -> vector<1x128xf32>
    %556 = arith.addf %555, %9 : vector<1x128xf32>
    %c16_i32_154 = arith.constant 16 : i32
    %557 = vector.broadcast %c16_i32_154 : i32 to vector<1x128xi32>
    %558 = arith.cmpi sge, %17, %557 : vector<1x128xi32>
    %c20_i32 = arith.constant 20 : i32
    %559 = vector.broadcast %c20_i32 : i32 to vector<1x128xi32>
    %560 = arith.cmpi slt, %17, %559 : vector<1x128xi32>
    %561 = arith.andi %558, %560 : vector<1x128xi1>
    %cst_155 = arith.constant -1.000000e+30 : f32
    %562 = vector.broadcast %cst_155 : f32 to vector<1x128xf32>
    %563 = arith.select %561, %556, %562 : vector<1x128xi1>, vector<1x128xf32>
    %cst_156 = arith.constant dense<0xFF800000> : vector<1xf32>
    %564 = vector.multi_reduction <maximumf>, %563, %cst_156 [1] : vector<1x128xf32> to vector<1xf32>
    %565 = vector.shape_cast %564 : vector<1xf32> to vector<1x1xf32>
    %566 = vector.broadcast %565 : vector<1x1xf32> to vector<1x128xf32>
    %567 = arith.subf %563, %566 : vector<1x128xf32>
    %568 = math.exp %567 : vector<1x128xf32>
    %cst_157 = arith.constant 0.000000e+00 : f32
    %569 = vector.broadcast %cst_157 : f32 to vector<1x128xf32>
    %570 = arith.select %561, %568, %569 : vector<1x128xi1>, vector<1x128xf32>
    %cst_158 = arith.constant dense<0.000000e+00> : vector<1xf32>
    %571 = vector.multi_reduction <add>, %570, %cst_158 [1] : vector<1x128xf32> to vector<1xf32>
    %572 = vector.shape_cast %571 : vector<1xf32> to vector<1x1xf32>
    %573 = tpu.reciprocal %572 : vector<1x1xf32> -> vector<1x1xf32>
    %574 = vector.broadcast %573 : vector<1x1xf32> to vector<1x128xf32>
    %575 = arith.mulf %570, %574 : vector<1x128xf32>
    %576 = vector.extract_strided_slice %10 {offsets = [0, 4], sizes = [1, 1], strides = [1, 1]} : vector<1x128xf32> to vector<1x1xf32>
    %c16_i32_159 = arith.constant 16 : i32
    %577 = vector.broadcast %c16_i32_159 : i32 to vector<4x128xi32>
    %578 = arith.addi %18, %577 : vector<4x128xi32>
    %579 = arith.cmpi sle, %19, %578 : vector<4x128xi32>
    %cst_160 = arith.constant 0.000000e+00 : f32
    %580 = vector.shape_cast %575 : vector<1x128xf32> to vector<1x128xf32>
    %581 = vector.broadcast %580 : vector<1x128xf32> to vector<4x128xf32>
    %582 = vector.broadcast %cst_160 : f32 to vector<4x128xf32>
    %583 = arith.select %579, %581, %582 : vector<4x128xi1>, vector<4x128xf32>
    %cst_161 = arith.constant dense<0.000000e+00> : vector<4xf32>
    %584 = vector.multi_reduction <add>, %583, %cst_161 [1] : vector<4x128xf32> to vector<4xf32>
    %585 = vector.shape_cast %584 : vector<4xf32> to vector<4x1xf32>
    %586 = vector.broadcast %576 : vector<1x1xf32> to vector<4x1xf32>
    %587 = arith.cmpf olt, %585, %586 : vector<4x1xf32>
    %588 = arith.extui %587 : vector<4x1xi1> to vector<4x1xi32>
    %589 = arith.sitofp %588 : vector<4x1xi32> to vector<4x1xf32>
    %cst_162 = arith.constant dense<0.000000e+00> : vector<1xf32>
    %590 = vector.multi_reduction <add>, %589, %cst_162 [0] : vector<4x1xf32> to vector<1xf32>
    %591 = vector.shape_cast %590 : vector<1xf32> to vector<1x1xf32>
    %cst_163 = arith.constant 3.000000e+00 : f32
    %592 = vector.broadcast %cst_163 : f32 to vector<1x1xf32>
    %593 = arith.minimumf %591, %592 : vector<1x1xf32>
    %594 = arith.fptosi %593 : vector<1x1xf32> to vector<1x1xi32>
    %c16_i32_164 = arith.constant 16 : i32
    %595 = vector.broadcast %c16_i32_164 : i32 to vector<1x1xi32>
    %596 = arith.addi %594, %595 : vector<1x1xi32>
    %597 = vector.broadcast %596 : vector<1x1xi32> to vector<1x128xi32>
    %598 = arith.cmpi eq, %17, %597 : vector<1x128xi32>
    %cst_165 = arith.constant 0.000000e+00 : f32
    %599 = vector.broadcast %cst_165 : f32 to vector<1x128xf32>
    %600 = arith.select %598, %575, %599 : vector<1x128xi1>, vector<1x128xf32>
    %cst_166 = arith.constant dense<0.000000e+00> : vector<1xf32>
    %601 = vector.multi_reduction <add>, %600, %cst_166 [1] : vector<1x128xf32> to vector<1xf32>
    %602 = vector.shape_cast %601 : vector<1xf32> to vector<1x1xf32>
    %c4_i32_167 = arith.constant 4 : i32
    %603 = vector.broadcast %c4_i32_167 : i32 to vector<1x8xi32>
    %604 = arith.cmpi eq, %20, %603 : vector<1x8xi32>
    %605 = vector.shape_cast %594 : vector<1x1xi32> to vector<1x1xi32>
    %606 = vector.broadcast %605 : vector<1x1xi32> to vector<1x8xi32>
    %607 = arith.select %604, %606, %490 : vector<1x8xi1>, vector<1x8xi32>
    %c4_i32_168 = arith.constant 4 : i32
    %608 = vector.broadcast %c4_i32_168 : i32 to vector<1x8xi32>
    %609 = arith.cmpi eq, %20, %608 : vector<1x8xi32>
    %610 = vector.shape_cast %602 : vector<1x1xf32> to vector<1x1xf32>
    %611 = vector.broadcast %610 : vector<1x1xf32> to vector<1x8xf32>
    %612 = arith.select %609, %611, %495 : vector<1x8xi1>, vector<1x8xf32>
    %613 = vector.broadcast %593 : vector<1x1xf32> to vector<1x128xf32>
    %614 = arith.mulf %613, %0 : vector<1x128xf32>
    %615 = arith.truncf %525 : vector<1x32xf32> to vector<1x32xbf16>
    %cst_169 = arith.constant dense<0.000000e+00> : vector<1x128xf32>
    %616 = tpu.matmul %615, %1, %cst_169 {dimension_numbers = #tpu.dot_dimension_numbers<[1], [0], [0], [1], [0, 0, 1, 1], [], []>} : vector<1x32xbf16>, vector<32x128xbf16>, vector<1x128xf32> -> vector<1x128xf32>
    %617 = arith.addf %614, %616 : vector<1x128xf32>
    %618 = arith.addf %617, %5 : vector<1x128xf32>
    %cst_170 = arith.constant 2.000000e+00 : f32
    %619 = vector.broadcast %cst_170 : f32 to vector<1x128xf32>
    %620 = arith.mulf %619, %618 : vector<1x128xf32>
    %621 = arith.select %16, %618, %620 : vector<1x128xi1>, vector<1x128xf32>
    %cst_171 = arith.constant 0.000000e+00 : f32
    %622 = vector.broadcast %cst_171 : f32 to vector<1x128xf32>
    %623 = arith.subf %622, %621 : vector<1x128xf32>
    %624 = math.exp %623 : vector<1x128xf32>
    %cst_172 = arith.constant 1.000000e+00 : f32
    %625 = vector.broadcast %cst_172 : f32 to vector<1x128xf32>
    %626 = arith.addf %625, %624 : vector<1x128xf32>
    %cst_173 = arith.constant 1.000000e+00 : f32
    %627 = vector.broadcast %cst_173 : f32 to vector<1x128xf32>
    %628 = arith.divf %627, %626 : vector<1x128xf32>
    %cst_174 = arith.constant 2.000000e+00 : f32
    %629 = vector.broadcast %cst_174 : f32 to vector<1x128xf32>
    %630 = arith.mulf %629, %628 : vector<1x128xf32>
    %cst_175 = arith.constant 1.000000e+00 : f32
    %631 = vector.broadcast %cst_175 : f32 to vector<1x128xf32>
    %632 = arith.subf %630, %631 : vector<1x128xf32>
    %633 = arith.select %16, %628, %632 : vector<1x128xi1>, vector<1x128xf32>
    %634 = vector.extract_strided_slice %633 {offsets = [0, 0], sizes = [1, 32], strides = [1, 1]} : vector<1x128xf32> to vector<1x32xf32>
    %635 = vector.extract_strided_slice %633 {offsets = [0, 32], sizes = [1, 32], strides = [1, 1]} : vector<1x128xf32> to vector<1x32xf32>
    %636 = vector.extract_strided_slice %633 {offsets = [0, 64], sizes = [1, 32], strides = [1, 1]} : vector<1x128xf32> to vector<1x32xf32>
    %637 = vector.extract_strided_slice %633 {offsets = [0, 96], sizes = [1, 32], strides = [1, 1]} : vector<1x128xf32> to vector<1x32xf32>
    %638 = arith.mulf %635, %523 : vector<1x32xf32>
    %639 = arith.mulf %634, %636 : vector<1x32xf32>
    %640 = arith.addf %638, %639 : vector<1x32xf32>
    %641 = math.tanh %640 : vector<1x32xf32>
    %642 = arith.mulf %637, %641 : vector<1x32xf32>
    %643 = tpu.concatenate %642, %553 in 1 : vector<1x32xf32>, vector<1x32xf32> -> vector<1x64xf32>
    %644 = arith.truncf %643 : vector<1x64xf32> to vector<1x64xbf16>
    %cst_176 = arith.constant dense<0.000000e+00> : vector<1x128xf32>
    %645 = tpu.matmul %644, %3, %cst_176 {dimension_numbers = #tpu.dot_dimension_numbers<[1], [0], [0], [1], [0, 0, 1, 1], [], []>} : vector<1x64xbf16>, vector<64x128xbf16>, vector<1x128xf32> -> vector<1x128xf32>
    %646 = arith.addf %645, %7 : vector<1x128xf32>
    %cst_177 = arith.constant 2.000000e+00 : f32
    %647 = vector.broadcast %cst_177 : f32 to vector<1x128xf32>
    %648 = arith.mulf %647, %646 : vector<1x128xf32>
    %649 = arith.select %16, %646, %648 : vector<1x128xi1>, vector<1x128xf32>
    %cst_178 = arith.constant 0.000000e+00 : f32
    %650 = vector.broadcast %cst_178 : f32 to vector<1x128xf32>
    %651 = arith.subf %650, %649 : vector<1x128xf32>
    %652 = math.exp %651 : vector<1x128xf32>
    %cst_179 = arith.constant 1.000000e+00 : f32
    %653 = vector.broadcast %cst_179 : f32 to vector<1x128xf32>
    %654 = arith.addf %653, %652 : vector<1x128xf32>
    %cst_180 = arith.constant 1.000000e+00 : f32
    %655 = vector.broadcast %cst_180 : f32 to vector<1x128xf32>
    %656 = arith.divf %655, %654 : vector<1x128xf32>
    %cst_181 = arith.constant 2.000000e+00 : f32
    %657 = vector.broadcast %cst_181 : f32 to vector<1x128xf32>
    %658 = arith.mulf %657, %656 : vector<1x128xf32>
    %cst_182 = arith.constant 1.000000e+00 : f32
    %659 = vector.broadcast %cst_182 : f32 to vector<1x128xf32>
    %660 = arith.subf %658, %659 : vector<1x128xf32>
    %661 = arith.select %16, %656, %660 : vector<1x128xi1>, vector<1x128xf32>
    %662 = vector.extract_strided_slice %661 {offsets = [0, 0], sizes = [1, 32], strides = [1, 1]} : vector<1x128xf32> to vector<1x32xf32>
    %663 = vector.extract_strided_slice %661 {offsets = [0, 32], sizes = [1, 32], strides = [1, 1]} : vector<1x128xf32> to vector<1x32xf32>
    %664 = vector.extract_strided_slice %661 {offsets = [0, 64], sizes = [1, 32], strides = [1, 1]} : vector<1x128xf32> to vector<1x32xf32>
    %665 = vector.extract_strided_slice %661 {offsets = [0, 96], sizes = [1, 32], strides = [1, 1]} : vector<1x128xf32> to vector<1x32xf32>
    %666 = arith.mulf %663, %551 : vector<1x32xf32>
    %667 = arith.mulf %662, %664 : vector<1x32xf32>
    %668 = arith.addf %666, %667 : vector<1x32xf32>
    %669 = math.tanh %668 : vector<1x32xf32>
    %670 = arith.mulf %665, %669 : vector<1x32xf32>
    %671 = arith.truncf %670 : vector<1x32xf32> to vector<1x32xbf16>
    %cst_183 = arith.constant dense<0.000000e+00> : vector<1x128xf32>
    %672 = tpu.matmul %671, %8, %cst_183 {dimension_numbers = #tpu.dot_dimension_numbers<[1], [0], [0], [1], [0, 0, 1, 1], [], []>} : vector<1x32xbf16>, vector<32x128xbf16>, vector<1x128xf32> -> vector<1x128xf32>
    %673 = arith.addf %672, %9 : vector<1x128xf32>
    %c20_i32_184 = arith.constant 20 : i32
    %674 = vector.broadcast %c20_i32_184 : i32 to vector<1x128xi32>
    %675 = arith.cmpi sge, %17, %674 : vector<1x128xi32>
    %c24_i32 = arith.constant 24 : i32
    %676 = vector.broadcast %c24_i32 : i32 to vector<1x128xi32>
    %677 = arith.cmpi slt, %17, %676 : vector<1x128xi32>
    %678 = arith.andi %675, %677 : vector<1x128xi1>
    %cst_185 = arith.constant -1.000000e+30 : f32
    %679 = vector.broadcast %cst_185 : f32 to vector<1x128xf32>
    %680 = arith.select %678, %673, %679 : vector<1x128xi1>, vector<1x128xf32>
    %cst_186 = arith.constant dense<0xFF800000> : vector<1xf32>
    %681 = vector.multi_reduction <maximumf>, %680, %cst_186 [1] : vector<1x128xf32> to vector<1xf32>
    %682 = vector.shape_cast %681 : vector<1xf32> to vector<1x1xf32>
    %683 = vector.broadcast %682 : vector<1x1xf32> to vector<1x128xf32>
    %684 = arith.subf %680, %683 : vector<1x128xf32>
    %685 = math.exp %684 : vector<1x128xf32>
    %cst_187 = arith.constant 0.000000e+00 : f32
    %686 = vector.broadcast %cst_187 : f32 to vector<1x128xf32>
    %687 = arith.select %678, %685, %686 : vector<1x128xi1>, vector<1x128xf32>
    %cst_188 = arith.constant dense<0.000000e+00> : vector<1xf32>
    %688 = vector.multi_reduction <add>, %687, %cst_188 [1] : vector<1x128xf32> to vector<1xf32>
    %689 = vector.shape_cast %688 : vector<1xf32> to vector<1x1xf32>
    %690 = tpu.reciprocal %689 : vector<1x1xf32> -> vector<1x1xf32>
    %691 = vector.broadcast %690 : vector<1x1xf32> to vector<1x128xf32>
    %692 = arith.mulf %687, %691 : vector<1x128xf32>
    %693 = vector.extract_strided_slice %10 {offsets = [0, 5], sizes = [1, 1], strides = [1, 1]} : vector<1x128xf32> to vector<1x1xf32>
    %c20_i32_189 = arith.constant 20 : i32
    %694 = vector.broadcast %c20_i32_189 : i32 to vector<4x128xi32>
    %695 = arith.addi %18, %694 : vector<4x128xi32>
    %696 = arith.cmpi sle, %19, %695 : vector<4x128xi32>
    %cst_190 = arith.constant 0.000000e+00 : f32
    %697 = vector.shape_cast %692 : vector<1x128xf32> to vector<1x128xf32>
    %698 = vector.broadcast %697 : vector<1x128xf32> to vector<4x128xf32>
    %699 = vector.broadcast %cst_190 : f32 to vector<4x128xf32>
    %700 = arith.select %696, %698, %699 : vector<4x128xi1>, vector<4x128xf32>
    %cst_191 = arith.constant dense<0.000000e+00> : vector<4xf32>
    %701 = vector.multi_reduction <add>, %700, %cst_191 [1] : vector<4x128xf32> to vector<4xf32>
    %702 = vector.shape_cast %701 : vector<4xf32> to vector<4x1xf32>
    %703 = vector.broadcast %693 : vector<1x1xf32> to vector<4x1xf32>
    %704 = arith.cmpf olt, %702, %703 : vector<4x1xf32>
    %705 = arith.extui %704 : vector<4x1xi1> to vector<4x1xi32>
    %706 = arith.sitofp %705 : vector<4x1xi32> to vector<4x1xf32>
    %cst_192 = arith.constant dense<0.000000e+00> : vector<1xf32>
    %707 = vector.multi_reduction <add>, %706, %cst_192 [0] : vector<4x1xf32> to vector<1xf32>
    %708 = vector.shape_cast %707 : vector<1xf32> to vector<1x1xf32>
    %cst_193 = arith.constant 3.000000e+00 : f32
    %709 = vector.broadcast %cst_193 : f32 to vector<1x1xf32>
    %710 = arith.minimumf %708, %709 : vector<1x1xf32>
    %711 = arith.fptosi %710 : vector<1x1xf32> to vector<1x1xi32>
    %c20_i32_194 = arith.constant 20 : i32
    %712 = vector.broadcast %c20_i32_194 : i32 to vector<1x1xi32>
    %713 = arith.addi %711, %712 : vector<1x1xi32>
    %714 = vector.broadcast %713 : vector<1x1xi32> to vector<1x128xi32>
    %715 = arith.cmpi eq, %17, %714 : vector<1x128xi32>
    %cst_195 = arith.constant 0.000000e+00 : f32
    %716 = vector.broadcast %cst_195 : f32 to vector<1x128xf32>
    %717 = arith.select %715, %692, %716 : vector<1x128xi1>, vector<1x128xf32>
    %cst_196 = arith.constant dense<0.000000e+00> : vector<1xf32>
    %718 = vector.multi_reduction <add>, %717, %cst_196 [1] : vector<1x128xf32> to vector<1xf32>
    %719 = vector.shape_cast %718 : vector<1xf32> to vector<1x1xf32>
    %c5_i32 = arith.constant 5 : i32
    %720 = vector.broadcast %c5_i32 : i32 to vector<1x8xi32>
    %721 = arith.cmpi eq, %20, %720 : vector<1x8xi32>
    %722 = vector.shape_cast %711 : vector<1x1xi32> to vector<1x1xi32>
    %723 = vector.broadcast %722 : vector<1x1xi32> to vector<1x8xi32>
    %724 = arith.select %721, %723, %607 : vector<1x8xi1>, vector<1x8xi32>
    %c5_i32_197 = arith.constant 5 : i32
    %725 = vector.broadcast %c5_i32_197 : i32 to vector<1x8xi32>
    %726 = arith.cmpi eq, %20, %725 : vector<1x8xi32>
    %727 = vector.shape_cast %719 : vector<1x1xf32> to vector<1x1xf32>
    %728 = vector.broadcast %727 : vector<1x1xf32> to vector<1x8xf32>
    %729 = arith.select %726, %728, %612 : vector<1x8xi1>, vector<1x8xf32>
    %730 = vector.broadcast %710 : vector<1x1xf32> to vector<1x128xf32>
    %731 = arith.mulf %730, %0 : vector<1x128xf32>
    %732 = arith.truncf %642 : vector<1x32xf32> to vector<1x32xbf16>
    %cst_198 = arith.constant dense<0.000000e+00> : vector<1x128xf32>
    %733 = tpu.matmul %732, %1, %cst_198 {dimension_numbers = #tpu.dot_dimension_numbers<[1], [0], [0], [1], [0, 0, 1, 1], [], []>} : vector<1x32xbf16>, vector<32x128xbf16>, vector<1x128xf32> -> vector<1x128xf32>
    %734 = arith.addf %731, %733 : vector<1x128xf32>
    %735 = arith.addf %734, %5 : vector<1x128xf32>
    %cst_199 = arith.constant 2.000000e+00 : f32
    %736 = vector.broadcast %cst_199 : f32 to vector<1x128xf32>
    %737 = arith.mulf %736, %735 : vector<1x128xf32>
    %738 = arith.select %16, %735, %737 : vector<1x128xi1>, vector<1x128xf32>
    %cst_200 = arith.constant 0.000000e+00 : f32
    %739 = vector.broadcast %cst_200 : f32 to vector<1x128xf32>
    %740 = arith.subf %739, %738 : vector<1x128xf32>
    %741 = math.exp %740 : vector<1x128xf32>
    %cst_201 = arith.constant 1.000000e+00 : f32
    %742 = vector.broadcast %cst_201 : f32 to vector<1x128xf32>
    %743 = arith.addf %742, %741 : vector<1x128xf32>
    %cst_202 = arith.constant 1.000000e+00 : f32
    %744 = vector.broadcast %cst_202 : f32 to vector<1x128xf32>
    %745 = arith.divf %744, %743 : vector<1x128xf32>
    %cst_203 = arith.constant 2.000000e+00 : f32
    %746 = vector.broadcast %cst_203 : f32 to vector<1x128xf32>
    %747 = arith.mulf %746, %745 : vector<1x128xf32>
    %cst_204 = arith.constant 1.000000e+00 : f32
    %748 = vector.broadcast %cst_204 : f32 to vector<1x128xf32>
    %749 = arith.subf %747, %748 : vector<1x128xf32>
    %750 = arith.select %16, %745, %749 : vector<1x128xi1>, vector<1x128xf32>
    %751 = vector.extract_strided_slice %750 {offsets = [0, 0], sizes = [1, 32], strides = [1, 1]} : vector<1x128xf32> to vector<1x32xf32>
    %752 = vector.extract_strided_slice %750 {offsets = [0, 32], sizes = [1, 32], strides = [1, 1]} : vector<1x128xf32> to vector<1x32xf32>
    %753 = vector.extract_strided_slice %750 {offsets = [0, 64], sizes = [1, 32], strides = [1, 1]} : vector<1x128xf32> to vector<1x32xf32>
    %754 = vector.extract_strided_slice %750 {offsets = [0, 96], sizes = [1, 32], strides = [1, 1]} : vector<1x128xf32> to vector<1x32xf32>
    %755 = arith.mulf %752, %640 : vector<1x32xf32>
    %756 = arith.mulf %751, %753 : vector<1x32xf32>
    %757 = arith.addf %755, %756 : vector<1x32xf32>
    %758 = math.tanh %757 : vector<1x32xf32>
    %759 = arith.mulf %754, %758 : vector<1x32xf32>
    %760 = tpu.concatenate %759, %670 in 1 : vector<1x32xf32>, vector<1x32xf32> -> vector<1x64xf32>
    %761 = arith.truncf %760 : vector<1x64xf32> to vector<1x64xbf16>
    %cst_205 = arith.constant dense<0.000000e+00> : vector<1x128xf32>
    %762 = tpu.matmul %761, %3, %cst_205 {dimension_numbers = #tpu.dot_dimension_numbers<[1], [0], [0], [1], [0, 0, 1, 1], [], []>} : vector<1x64xbf16>, vector<64x128xbf16>, vector<1x128xf32> -> vector<1x128xf32>
    %763 = arith.addf %762, %7 : vector<1x128xf32>
    %cst_206 = arith.constant 2.000000e+00 : f32
    %764 = vector.broadcast %cst_206 : f32 to vector<1x128xf32>
    %765 = arith.mulf %764, %763 : vector<1x128xf32>
    %766 = arith.select %16, %763, %765 : vector<1x128xi1>, vector<1x128xf32>
    %cst_207 = arith.constant 0.000000e+00 : f32
    %767 = vector.broadcast %cst_207 : f32 to vector<1x128xf32>
    %768 = arith.subf %767, %766 : vector<1x128xf32>
    %769 = math.exp %768 : vector<1x128xf32>
    %cst_208 = arith.constant 1.000000e+00 : f32
    %770 = vector.broadcast %cst_208 : f32 to vector<1x128xf32>
    %771 = arith.addf %770, %769 : vector<1x128xf32>
    %cst_209 = arith.constant 1.000000e+00 : f32
    %772 = vector.broadcast %cst_209 : f32 to vector<1x128xf32>
    %773 = arith.divf %772, %771 : vector<1x128xf32>
    %cst_210 = arith.constant 2.000000e+00 : f32
    %774 = vector.broadcast %cst_210 : f32 to vector<1x128xf32>
    %775 = arith.mulf %774, %773 : vector<1x128xf32>
    %cst_211 = arith.constant 1.000000e+00 : f32
    %776 = vector.broadcast %cst_211 : f32 to vector<1x128xf32>
    %777 = arith.subf %775, %776 : vector<1x128xf32>
    %778 = arith.select %16, %773, %777 : vector<1x128xi1>, vector<1x128xf32>
    %779 = vector.extract_strided_slice %778 {offsets = [0, 0], sizes = [1, 32], strides = [1, 1]} : vector<1x128xf32> to vector<1x32xf32>
    %780 = vector.extract_strided_slice %778 {offsets = [0, 32], sizes = [1, 32], strides = [1, 1]} : vector<1x128xf32> to vector<1x32xf32>
    %781 = vector.extract_strided_slice %778 {offsets = [0, 64], sizes = [1, 32], strides = [1, 1]} : vector<1x128xf32> to vector<1x32xf32>
    %782 = vector.extract_strided_slice %778 {offsets = [0, 96], sizes = [1, 32], strides = [1, 1]} : vector<1x128xf32> to vector<1x32xf32>
    %783 = arith.mulf %780, %668 : vector<1x32xf32>
    %784 = arith.mulf %779, %781 : vector<1x32xf32>
    %785 = arith.addf %783, %784 : vector<1x32xf32>
    %786 = math.tanh %785 : vector<1x32xf32>
    %787 = arith.mulf %782, %786 : vector<1x32xf32>
    %788 = arith.truncf %787 : vector<1x32xf32> to vector<1x32xbf16>
    %cst_212 = arith.constant dense<0.000000e+00> : vector<1x128xf32>
    %789 = tpu.matmul %788, %8, %cst_212 {dimension_numbers = #tpu.dot_dimension_numbers<[1], [0], [0], [1], [0, 0, 1, 1], [], []>} : vector<1x32xbf16>, vector<32x128xbf16>, vector<1x128xf32> -> vector<1x128xf32>
    %790 = arith.addf %789, %9 : vector<1x128xf32>
    %c24_i32_213 = arith.constant 24 : i32
    %791 = vector.broadcast %c24_i32_213 : i32 to vector<1x128xi32>
    %792 = arith.cmpi sge, %17, %791 : vector<1x128xi32>
    %c28_i32 = arith.constant 28 : i32
    %793 = vector.broadcast %c28_i32 : i32 to vector<1x128xi32>
    %794 = arith.cmpi slt, %17, %793 : vector<1x128xi32>
    %795 = arith.andi %792, %794 : vector<1x128xi1>
    %cst_214 = arith.constant -1.000000e+30 : f32
    %796 = vector.broadcast %cst_214 : f32 to vector<1x128xf32>
    %797 = arith.select %795, %790, %796 : vector<1x128xi1>, vector<1x128xf32>
    %cst_215 = arith.constant dense<0xFF800000> : vector<1xf32>
    %798 = vector.multi_reduction <maximumf>, %797, %cst_215 [1] : vector<1x128xf32> to vector<1xf32>
    %799 = vector.shape_cast %798 : vector<1xf32> to vector<1x1xf32>
    %800 = vector.broadcast %799 : vector<1x1xf32> to vector<1x128xf32>
    %801 = arith.subf %797, %800 : vector<1x128xf32>
    %802 = math.exp %801 : vector<1x128xf32>
    %cst_216 = arith.constant 0.000000e+00 : f32
    %803 = vector.broadcast %cst_216 : f32 to vector<1x128xf32>
    %804 = arith.select %795, %802, %803 : vector<1x128xi1>, vector<1x128xf32>
    %cst_217 = arith.constant dense<0.000000e+00> : vector<1xf32>
    %805 = vector.multi_reduction <add>, %804, %cst_217 [1] : vector<1x128xf32> to vector<1xf32>
    %806 = vector.shape_cast %805 : vector<1xf32> to vector<1x1xf32>
    %807 = tpu.reciprocal %806 : vector<1x1xf32> -> vector<1x1xf32>
    %808 = vector.broadcast %807 : vector<1x1xf32> to vector<1x128xf32>
    %809 = arith.mulf %804, %808 : vector<1x128xf32>
    %810 = vector.extract_strided_slice %10 {offsets = [0, 6], sizes = [1, 1], strides = [1, 1]} : vector<1x128xf32> to vector<1x1xf32>
    %c24_i32_218 = arith.constant 24 : i32
    %811 = vector.broadcast %c24_i32_218 : i32 to vector<4x128xi32>
    %812 = arith.addi %18, %811 : vector<4x128xi32>
    %813 = arith.cmpi sle, %19, %812 : vector<4x128xi32>
    %cst_219 = arith.constant 0.000000e+00 : f32
    %814 = vector.shape_cast %809 : vector<1x128xf32> to vector<1x128xf32>
    %815 = vector.broadcast %814 : vector<1x128xf32> to vector<4x128xf32>
    %816 = vector.broadcast %cst_219 : f32 to vector<4x128xf32>
    %817 = arith.select %813, %815, %816 : vector<4x128xi1>, vector<4x128xf32>
    %cst_220 = arith.constant dense<0.000000e+00> : vector<4xf32>
    %818 = vector.multi_reduction <add>, %817, %cst_220 [1] : vector<4x128xf32> to vector<4xf32>
    %819 = vector.shape_cast %818 : vector<4xf32> to vector<4x1xf32>
    %820 = vector.broadcast %810 : vector<1x1xf32> to vector<4x1xf32>
    %821 = arith.cmpf olt, %819, %820 : vector<4x1xf32>
    %822 = arith.extui %821 : vector<4x1xi1> to vector<4x1xi32>
    %823 = arith.sitofp %822 : vector<4x1xi32> to vector<4x1xf32>
    %cst_221 = arith.constant dense<0.000000e+00> : vector<1xf32>
    %824 = vector.multi_reduction <add>, %823, %cst_221 [0] : vector<4x1xf32> to vector<1xf32>
    %825 = vector.shape_cast %824 : vector<1xf32> to vector<1x1xf32>
    %cst_222 = arith.constant 3.000000e+00 : f32
    %826 = vector.broadcast %cst_222 : f32 to vector<1x1xf32>
    %827 = arith.minimumf %825, %826 : vector<1x1xf32>
    %828 = arith.fptosi %827 : vector<1x1xf32> to vector<1x1xi32>
    %c24_i32_223 = arith.constant 24 : i32
    %829 = vector.broadcast %c24_i32_223 : i32 to vector<1x1xi32>
    %830 = arith.addi %828, %829 : vector<1x1xi32>
    %831 = vector.broadcast %830 : vector<1x1xi32> to vector<1x128xi32>
    %832 = arith.cmpi eq, %17, %831 : vector<1x128xi32>
    %cst_224 = arith.constant 0.000000e+00 : f32
    %833 = vector.broadcast %cst_224 : f32 to vector<1x128xf32>
    %834 = arith.select %832, %809, %833 : vector<1x128xi1>, vector<1x128xf32>
    %cst_225 = arith.constant dense<0.000000e+00> : vector<1xf32>
    %835 = vector.multi_reduction <add>, %834, %cst_225 [1] : vector<1x128xf32> to vector<1xf32>
    %836 = vector.shape_cast %835 : vector<1xf32> to vector<1x1xf32>
    %c6_i32 = arith.constant 6 : i32
    %837 = vector.broadcast %c6_i32 : i32 to vector<1x8xi32>
    %838 = arith.cmpi eq, %20, %837 : vector<1x8xi32>
    %839 = vector.shape_cast %828 : vector<1x1xi32> to vector<1x1xi32>
    %840 = vector.broadcast %839 : vector<1x1xi32> to vector<1x8xi32>
    %841 = arith.select %838, %840, %724 : vector<1x8xi1>, vector<1x8xi32>
    %c6_i32_226 = arith.constant 6 : i32
    %842 = vector.broadcast %c6_i32_226 : i32 to vector<1x8xi32>
    %843 = arith.cmpi eq, %20, %842 : vector<1x8xi32>
    %844 = vector.shape_cast %836 : vector<1x1xf32> to vector<1x1xf32>
    %845 = vector.broadcast %844 : vector<1x1xf32> to vector<1x8xf32>
    %846 = arith.select %843, %845, %729 : vector<1x8xi1>, vector<1x8xf32>
    %847 = vector.broadcast %827 : vector<1x1xf32> to vector<1x128xf32>
    %848 = arith.mulf %847, %0 : vector<1x128xf32>
    %849 = arith.truncf %759 : vector<1x32xf32> to vector<1x32xbf16>
    %cst_227 = arith.constant dense<0.000000e+00> : vector<1x128xf32>
    %850 = tpu.matmul %849, %1, %cst_227 {dimension_numbers = #tpu.dot_dimension_numbers<[1], [0], [0], [1], [0, 0, 1, 1], [], []>} : vector<1x32xbf16>, vector<32x128xbf16>, vector<1x128xf32> -> vector<1x128xf32>
    %851 = arith.addf %848, %850 : vector<1x128xf32>
    %852 = arith.addf %851, %5 : vector<1x128xf32>
    %cst_228 = arith.constant 2.000000e+00 : f32
    %853 = vector.broadcast %cst_228 : f32 to vector<1x128xf32>
    %854 = arith.mulf %853, %852 : vector<1x128xf32>
    %855 = arith.select %16, %852, %854 : vector<1x128xi1>, vector<1x128xf32>
    %cst_229 = arith.constant 0.000000e+00 : f32
    %856 = vector.broadcast %cst_229 : f32 to vector<1x128xf32>
    %857 = arith.subf %856, %855 : vector<1x128xf32>
    %858 = math.exp %857 : vector<1x128xf32>
    %cst_230 = arith.constant 1.000000e+00 : f32
    %859 = vector.broadcast %cst_230 : f32 to vector<1x128xf32>
    %860 = arith.addf %859, %858 : vector<1x128xf32>
    %cst_231 = arith.constant 1.000000e+00 : f32
    %861 = vector.broadcast %cst_231 : f32 to vector<1x128xf32>
    %862 = arith.divf %861, %860 : vector<1x128xf32>
    %cst_232 = arith.constant 2.000000e+00 : f32
    %863 = vector.broadcast %cst_232 : f32 to vector<1x128xf32>
    %864 = arith.mulf %863, %862 : vector<1x128xf32>
    %cst_233 = arith.constant 1.000000e+00 : f32
    %865 = vector.broadcast %cst_233 : f32 to vector<1x128xf32>
    %866 = arith.subf %864, %865 : vector<1x128xf32>
    %867 = arith.select %16, %862, %866 : vector<1x128xi1>, vector<1x128xf32>
    %868 = vector.extract_strided_slice %867 {offsets = [0, 0], sizes = [1, 32], strides = [1, 1]} : vector<1x128xf32> to vector<1x32xf32>
    %869 = vector.extract_strided_slice %867 {offsets = [0, 32], sizes = [1, 32], strides = [1, 1]} : vector<1x128xf32> to vector<1x32xf32>
    %870 = vector.extract_strided_slice %867 {offsets = [0, 64], sizes = [1, 32], strides = [1, 1]} : vector<1x128xf32> to vector<1x32xf32>
    %871 = vector.extract_strided_slice %867 {offsets = [0, 96], sizes = [1, 32], strides = [1, 1]} : vector<1x128xf32> to vector<1x32xf32>
    %872 = arith.mulf %869, %757 : vector<1x32xf32>
    %873 = arith.mulf %868, %870 : vector<1x32xf32>
    %874 = arith.addf %872, %873 : vector<1x32xf32>
    %875 = math.tanh %874 : vector<1x32xf32>
    %876 = arith.mulf %871, %875 : vector<1x32xf32>
    %877 = tpu.concatenate %876, %787 in 1 : vector<1x32xf32>, vector<1x32xf32> -> vector<1x64xf32>
    %878 = arith.truncf %877 : vector<1x64xf32> to vector<1x64xbf16>
    %cst_234 = arith.constant dense<0.000000e+00> : vector<1x128xf32>
    %879 = tpu.matmul %878, %3, %cst_234 {dimension_numbers = #tpu.dot_dimension_numbers<[1], [0], [0], [1], [0, 0, 1, 1], [], []>} : vector<1x64xbf16>, vector<64x128xbf16>, vector<1x128xf32> -> vector<1x128xf32>
    %880 = arith.addf %879, %7 : vector<1x128xf32>
    %cst_235 = arith.constant 2.000000e+00 : f32
    %881 = vector.broadcast %cst_235 : f32 to vector<1x128xf32>
    %882 = arith.mulf %881, %880 : vector<1x128xf32>
    %883 = arith.select %16, %880, %882 : vector<1x128xi1>, vector<1x128xf32>
    %cst_236 = arith.constant 0.000000e+00 : f32
    %884 = vector.broadcast %cst_236 : f32 to vector<1x128xf32>
    %885 = arith.subf %884, %883 : vector<1x128xf32>
    %886 = math.exp %885 : vector<1x128xf32>
    %cst_237 = arith.constant 1.000000e+00 : f32
    %887 = vector.broadcast %cst_237 : f32 to vector<1x128xf32>
    %888 = arith.addf %887, %886 : vector<1x128xf32>
    %cst_238 = arith.constant 1.000000e+00 : f32
    %889 = vector.broadcast %cst_238 : f32 to vector<1x128xf32>
    %890 = arith.divf %889, %888 : vector<1x128xf32>
    %cst_239 = arith.constant 2.000000e+00 : f32
    %891 = vector.broadcast %cst_239 : f32 to vector<1x128xf32>
    %892 = arith.mulf %891, %890 : vector<1x128xf32>
    %cst_240 = arith.constant 1.000000e+00 : f32
    %893 = vector.broadcast %cst_240 : f32 to vector<1x128xf32>
    %894 = arith.subf %892, %893 : vector<1x128xf32>
    %895 = arith.select %16, %890, %894 : vector<1x128xi1>, vector<1x128xf32>
    %896 = vector.extract_strided_slice %895 {offsets = [0, 0], sizes = [1, 32], strides = [1, 1]} : vector<1x128xf32> to vector<1x32xf32>
    %897 = vector.extract_strided_slice %895 {offsets = [0, 32], sizes = [1, 32], strides = [1, 1]} : vector<1x128xf32> to vector<1x32xf32>
    %898 = vector.extract_strided_slice %895 {offsets = [0, 64], sizes = [1, 32], strides = [1, 1]} : vector<1x128xf32> to vector<1x32xf32>
    %899 = vector.extract_strided_slice %895 {offsets = [0, 96], sizes = [1, 32], strides = [1, 1]} : vector<1x128xf32> to vector<1x32xf32>
    %900 = arith.mulf %897, %785 : vector<1x32xf32>
    %901 = arith.mulf %896, %898 : vector<1x32xf32>
    %902 = arith.addf %900, %901 : vector<1x32xf32>
    %903 = math.tanh %902 : vector<1x32xf32>
    %904 = arith.mulf %899, %903 : vector<1x32xf32>
    %905 = arith.truncf %904 : vector<1x32xf32> to vector<1x32xbf16>
    %cst_241 = arith.constant dense<0.000000e+00> : vector<1x128xf32>
    %906 = tpu.matmul %905, %8, %cst_241 {dimension_numbers = #tpu.dot_dimension_numbers<[1], [0], [0], [1], [0, 0, 1, 1], [], []>} : vector<1x32xbf16>, vector<32x128xbf16>, vector<1x128xf32> -> vector<1x128xf32>
    %907 = arith.addf %906, %9 : vector<1x128xf32>
    %c28_i32_242 = arith.constant 28 : i32
    %908 = vector.broadcast %c28_i32_242 : i32 to vector<1x128xi32>
    %909 = arith.cmpi sge, %17, %908 : vector<1x128xi32>
    %c32_i32 = arith.constant 32 : i32
    %910 = vector.broadcast %c32_i32 : i32 to vector<1x128xi32>
    %911 = arith.cmpi slt, %17, %910 : vector<1x128xi32>
    %912 = arith.andi %909, %911 : vector<1x128xi1>
    %cst_243 = arith.constant -1.000000e+30 : f32
    %913 = vector.broadcast %cst_243 : f32 to vector<1x128xf32>
    %914 = arith.select %912, %907, %913 : vector<1x128xi1>, vector<1x128xf32>
    %cst_244 = arith.constant dense<0xFF800000> : vector<1xf32>
    %915 = vector.multi_reduction <maximumf>, %914, %cst_244 [1] : vector<1x128xf32> to vector<1xf32>
    %916 = vector.shape_cast %915 : vector<1xf32> to vector<1x1xf32>
    %917 = vector.broadcast %916 : vector<1x1xf32> to vector<1x128xf32>
    %918 = arith.subf %914, %917 : vector<1x128xf32>
    %919 = math.exp %918 : vector<1x128xf32>
    %cst_245 = arith.constant 0.000000e+00 : f32
    %920 = vector.broadcast %cst_245 : f32 to vector<1x128xf32>
    %921 = arith.select %912, %919, %920 : vector<1x128xi1>, vector<1x128xf32>
    %cst_246 = arith.constant dense<0.000000e+00> : vector<1xf32>
    %922 = vector.multi_reduction <add>, %921, %cst_246 [1] : vector<1x128xf32> to vector<1xf32>
    %923 = vector.shape_cast %922 : vector<1xf32> to vector<1x1xf32>
    %924 = tpu.reciprocal %923 : vector<1x1xf32> -> vector<1x1xf32>
    %925 = vector.broadcast %924 : vector<1x1xf32> to vector<1x128xf32>
    %926 = arith.mulf %921, %925 : vector<1x128xf32>
    %927 = vector.extract_strided_slice %10 {offsets = [0, 7], sizes = [1, 1], strides = [1, 1]} : vector<1x128xf32> to vector<1x1xf32>
    %c28_i32_247 = arith.constant 28 : i32
    %928 = vector.broadcast %c28_i32_247 : i32 to vector<4x128xi32>
    %929 = arith.addi %18, %928 : vector<4x128xi32>
    %930 = arith.cmpi sle, %19, %929 : vector<4x128xi32>
    %cst_248 = arith.constant 0.000000e+00 : f32
    %931 = vector.shape_cast %926 : vector<1x128xf32> to vector<1x128xf32>
    %932 = vector.broadcast %931 : vector<1x128xf32> to vector<4x128xf32>
    %933 = vector.broadcast %cst_248 : f32 to vector<4x128xf32>
    %934 = arith.select %930, %932, %933 : vector<4x128xi1>, vector<4x128xf32>
    %cst_249 = arith.constant dense<0.000000e+00> : vector<4xf32>
    %935 = vector.multi_reduction <add>, %934, %cst_249 [1] : vector<4x128xf32> to vector<4xf32>
    %936 = vector.shape_cast %935 : vector<4xf32> to vector<4x1xf32>
    %937 = vector.broadcast %927 : vector<1x1xf32> to vector<4x1xf32>
    %938 = arith.cmpf olt, %936, %937 : vector<4x1xf32>
    %939 = arith.extui %938 : vector<4x1xi1> to vector<4x1xi32>
    %940 = arith.sitofp %939 : vector<4x1xi32> to vector<4x1xf32>
    %cst_250 = arith.constant dense<0.000000e+00> : vector<1xf32>
    %941 = vector.multi_reduction <add>, %940, %cst_250 [0] : vector<4x1xf32> to vector<1xf32>
    %942 = vector.shape_cast %941 : vector<1xf32> to vector<1x1xf32>
    %cst_251 = arith.constant 3.000000e+00 : f32
    %943 = vector.broadcast %cst_251 : f32 to vector<1x1xf32>
    %944 = arith.minimumf %942, %943 : vector<1x1xf32>
    %945 = arith.fptosi %944 : vector<1x1xf32> to vector<1x1xi32>
    %c28_i32_252 = arith.constant 28 : i32
    %946 = vector.broadcast %c28_i32_252 : i32 to vector<1x1xi32>
    %947 = arith.addi %945, %946 : vector<1x1xi32>
    %948 = vector.broadcast %947 : vector<1x1xi32> to vector<1x128xi32>
    %949 = arith.cmpi eq, %17, %948 : vector<1x128xi32>
    %cst_253 = arith.constant 0.000000e+00 : f32
    %950 = vector.broadcast %cst_253 : f32 to vector<1x128xf32>
    %951 = arith.select %949, %926, %950 : vector<1x128xi1>, vector<1x128xf32>
    %cst_254 = arith.constant dense<0.000000e+00> : vector<1xf32>
    %952 = vector.multi_reduction <add>, %951, %cst_254 [1] : vector<1x128xf32> to vector<1xf32>
    %953 = vector.shape_cast %952 : vector<1xf32> to vector<1x1xf32>
    %c7_i32 = arith.constant 7 : i32
    %954 = vector.broadcast %c7_i32 : i32 to vector<1x8xi32>
    %955 = arith.cmpi eq, %20, %954 : vector<1x8xi32>
    %956 = vector.shape_cast %945 : vector<1x1xi32> to vector<1x1xi32>
    %957 = vector.broadcast %956 : vector<1x1xi32> to vector<1x8xi32>
    %958 = arith.select %955, %957, %841 : vector<1x8xi1>, vector<1x8xi32>
    %c7_i32_255 = arith.constant 7 : i32
    %959 = vector.broadcast %c7_i32_255 : i32 to vector<1x8xi32>
    %960 = arith.cmpi eq, %20, %959 : vector<1x8xi32>
    %961 = vector.shape_cast %953 : vector<1x1xf32> to vector<1x1xf32>
    %962 = vector.broadcast %961 : vector<1x1xf32> to vector<1x8xf32>
    %963 = arith.select %960, %962, %846 : vector<1x8xi1>, vector<1x8xf32>
    %c0_256 = arith.constant 0 : index
    %c0_257 = arith.constant 0 : index
    %964 = vector.load %arg7[%c0_256, %c0_257] : memref<1x8xi32, #tpu.memory_space<vmem>>, vector<1x8xi32>
    tpu.vector_store %arg7[%c0_256, %c0_257], %958 {strides = array<i32>} : memref<1x8xi32, #tpu.memory_space<vmem>>, vector<1x8xi32>,
    %c0_258 = arith.constant 0 : index
    %c0_259 = arith.constant 0 : index
    %965 = vector.load %arg8[%c0_258, %c0_259] : memref<1x8xf32, #tpu.memory_space<vmem>>, vector<1x8xf32>
    tpu.vector_store %arg8[%c0_258, %c0_259], %963 {strides = array<i32>} : memref<1x8xf32, #tpu.memory_space<vmem>>, vector<1x8xf32>,
    return
  }
}

</mosaic_0001>

<bundles_post_ra>
// kernel: tpu_custom_call.1
= control target key start
LH: loop header
LB: loop body
LE: loop exit
PB: predicated region body
PF: predicated region fallthrough
CT: control target
= control target key end

     0   :  { %14 = vsyncpa [#allocation3], 0  ;;  %s4069_s0 = inlined_call_operand.hbm [shape: f32[1,128], index: 0, kind: input, shape index: {}]   ;;  %s4070_s1 = inlined_call_operand.hbm [shape: bf16[32,128], index: 1, kind: input, shape index: {}]   ;;  %s4071_s2 = inlined_call_operand.hbm [shape: bf16[1,64,128], index: 2, kind: input, shape index: {}]   ;;  %s4072_s3 = inlined_call_operand.vmem [shape: f32[2,1,128], index: 3, kind: input, shape index: {}]   ;;  %s4073_s4 = inlined_call_operand.hbm [shape: bf16[32,128], index: 4, kind: input, shape index: {}]   ;;  %s4074_s5 = inlined_call_operand.vmem [shape: f32[1,128], index: 5, kind: input, shape index: {}]   ;;  %s4075_s6 = inlined_call_operand.vmem [shape: f32[1,128], index: 6, kind: input, shape index: {}]   ;;  %s4076_s7 = inlined_call_operand.hbm [shape: s32[1,8], index: 7, kind: output, shape index: {0}]   ;;  %s4077_s8 = inlined_call_operand.hbm [shape: f32[1,8], index: 8, kind: output, shape index: {1}]  }
   0x1   :  { %15 = vsyncpa [#allocation6], 0 }
   0x2   :  { %16 = vsyncpa [#allocation9], 0 }
   0x3   :  { %17 = vsyncpa [#allocation4], 0 }
   0x4   :  { %18 = vsyncpa [#allocation12], 0  ;;  %s3024_s27 = smov [#allocation5]   ;;  %s2882_s9 = scalar_lea.hbm %s4070_s1, 256 }
   0x5   :  { %s34_s28 = sshll.u32 %s3024_s27, 4  ;;  %p2883_p0 = scmp.ne.s32.totalorder %s4070_s1, %s2882_s9  ;;  %s35_s28 = int_to_ptr.vmem [resolvable:$true] %s34_s28 }
   0x6   :  { %p2886_p1 = scmp.lt.u32.totalorder %s2882_s9, %s4070_s1 }
   0x8   :  { %p2888_p2 = pnand %p2886_p1, %p2883_p0 }
   0xa   :  { %2891 = shalt.err (!%p2888_p2)
}
   0xb   :  { %s2892_s14 = scalar_lea.vmem %s35_s28, 256  ;;  %p2897_p4 = scmp.lt.s32.totalorder %s35_s28, %s35_s28 }
   0xc   :  { %p2893_p3 = scmp.ne.s32.totalorder %s35_s28, %s2892_s14  ;;  %p2898_p5 = scmp.lt.s32.totalorder %s2892_s14, %s2892_s14 }
   0xe   :  { %p2899_p6 = por %p2898_p5, %p2897_p4 }
  0x10   :  { %p2900_p7 = pnand %p2899_p6, %p2893_p3 }
  0x12   :  { %2903 = shalt.err (!%p2900_p7)
}
  0x13   :  { %s3025_s15 = smov 64   ;;  %s3026_s16 = smov 4  }
  0x14   :  { %40 = dma.hbm_to_vmem [thread:$0]  %s4070_s1, 256, %s35_s28, [#allocation6], %s3025_s15, %s3025_s15, %s3026_s16  }
  0x15   :  { %s3027_s19 = smov [#allocation2]   ;;  %s3028_s21 = smov [#allocation7]  }
  0x16   :  { %s25_s20 = sshll.u32 %s3027_s19, 4  ;;  %s46_s22 = sshll.u32 %s3028_s21, 4  ;;  %s26_s20 = int_to_ptr.vmem [resolvable:$true] %s25_s20  ;;  %s47_s22 = int_to_ptr.vmem [resolvable:$true] %s46_s22 }
  0x17   :  { %s2904_s25 = scalar_lea.hbm %s4069_s0, 16 }
  0x18   :  { %p2905_p8 = scmp.ne.s32.totalorder %s4069_s0, %s2904_s25  ;;  %p2908_p9 = scmp.lt.u32.totalorder %s2904_s25, %s4069_s0 }
  0x1a   :  { %p2910_p10 = pnand %p2908_p9, %p2905_p8 }
  0x1c   :  { %2913 = shalt.err (!%p2910_p10)
}
  0x1d   :  { %s2914_s1 = scalar_lea.vmem %s26_s20, 16  ;;  %s2918_s28 = scalar_lea.vmem %s26_s20, 32 }
  0x1e   :  { %p2915_p11 = scmp.ne.s32.totalorder %s26_s20, %s2914_s1  ;;  %p2919_p12 = scmp.lt.s32.totalorder %s26_s20, %s26_s20 }
  0x1f   :  { %p2920_p13 = scmp.lt.s32.totalorder %s2918_s28, %s2914_s1 }
  0x21   :  { %p2921_p0 = por %p2920_p13, %p2919_p12 }
  0x23   :  { %p2922_p1 = pnand %p2921_p0, %p2915_p11 }
  0x25   :  { %2925 = shalt.err (!%p2922_p1)
}
  0x26   :  { %28 = dma.hbm_to_vmem [thread:$0]  %s4069_s0, 16, %s26_s20, [#allocation3]  }
  0x27   :  { %s2926_s13 = scalar_lea.hbm %s4071_s2, 512 }
  0x28   :  { %p2927_p2 = scmp.ne.s32.totalorder %s4071_s2, %s2926_s13  ;;  %p2930_p3 = scmp.lt.u32.totalorder %s2926_s13, %s4071_s2 }
  0x2a   :  { %p2932_p4 = pnand %p2930_p3, %p2927_p2 }
  0x2c   :  { %2935 = shalt.err (!%p2932_p4)
}
  0x2d   :  { %s2936_s21 = scalar_lea.vmem %s47_s22, 512  ;;  %p2941_p6 = scmp.lt.s32.totalorder %s47_s22, %s47_s22 }
  0x2e   :  { %p2937_p5 = scmp.ne.s32.totalorder %s47_s22, %s2936_s21  ;;  %p2942_p7 = scmp.lt.s32.totalorder %s2936_s21, %s2936_s21 }
  0x30   :  { %p2943_p8 = por %p2942_p7, %p2941_p6 }
  0x32   :  { %p2944_p9 = pnand %p2943_p8, %p2937_p5 }
  0x34   :  { %2947 = shalt.err (!%p2944_p9)
}
  0x35   :  { %52 = dma.hbm_to_vmem [thread:$0]  %s4071_s2, 512, %s47_s22, [#allocation6], %s3025_s15, %s3025_s15, %s3026_s16  }
  0x36   :  { %s3029_s23 = smov [#allocation8]   ;;  %s2948_s27 = scalar_lea.hbm %s4073_s4, 256 }
  0x37   :  { %s60_s24 = sshll.u32 %s3029_s23, 4  ;;  %p2949_p10 = scmp.ne.s32.totalorder %s4073_s4, %s2948_s27  ;;  %s61_s24 = int_to_ptr.vmem [resolvable:$true] %s60_s24 }
  0x38   :  { %p2952_p11 = scmp.lt.u32.totalorder %s2948_s27, %s4073_s4 }
  0x3a   :  { %p2954_p12 = pnand %p2952_p11, %p2949_p10 }
  0x3c   :  { %2957 = shalt.err (!%p2954_p12)
}
  0x3d   :  { %s2958_s9 = scalar_lea.vmem %s61_s24, 256  ;;  %p2963_p0 = scmp.lt.s32.totalorder %s61_s24, %s61_s24 }
  0x3e   :  { %p2959_p13 = scmp.ne.s32.totalorder %s61_s24, %s2958_s9  ;;  %p2964_p1 = scmp.lt.s32.totalorder %s2958_s9, %s2958_s9 }
  0x40   :  { %p2965_p2 = por %p2964_p1, %p2963_p0 }
  0x42   :  { %p2966_p3 = pnand %p2965_p2, %p2959_p13 }
  0x44   :  { %2969 = shalt.err (!%p2966_p3)
}
  0x45   :  { %66 = dma.hbm_to_vmem [thread:$0]  %s4073_s4, 256, %s61_s24, [#allocation9], %s3025_s15, %s3025_s15, %s3026_s16  }
  0x46   :  { %3014 = dma.done.wait [#allocation3], 16  }
  0x47   :  { %3015 = vsyncadd [#allocation3], 4294967280 }
  0x48   :  { %3016 = dma.done.wait [#allocation6], 768  }
  0x49   :  { %3017 = vsyncadd [#allocation6], 4294966528 }
  0x4a   :  { %3018 = dma.done.wait [#allocation9], 256  }
  0x4b   :  { %3019 = vsyncadd [#allocation9], 4294967040  ;;  %v3030_v0 = vmov 0.0   ;;  %vm3031_vm0 = vmmov 0   ;;  %v3032_v1 = vmov 0   ;;  %v3151_v2 = vld [vmem:[#allocation5] sm:$0xff]   ;;  %v106_v4 = vlaneseq }
  0x4c   :  { %2452 = vmatprep.subr.bf16.mxu0 %v3030_v0  ;;  %2456 = vmatprep.mubr.msk.bf16.mxu0 %vm3031_vm0, %v3030_v0  ;;  %v3154_v3 = vld [vmem:[#allocation5 + $0x8] sm:$0xff]   ;;  %v3161_v5 = vld [vmem:[#allocation2] sm:$0x1]  ;;  %v3170_v8 = vld [vmem:[%s4072_s3] sm:$0x1]  ;;  %s3033_s10 = smov 32  }
  0x4d   :  { %2460 = vmatprep.subr.bf16.mxu1 %v3030_v0  ;;  %2468 = vmatprep.mubr.msk.bf16.mxu1 %vm3031_vm0, %v3030_v0  ;;  %v3164_v6 = vand.u32 127, %v106_v4  ;;  %v113_v7 = vmul.f32 0.0, %v3161_v5  ;;  %v3188_v31 = vld [vmem:[#allocation7] sm:$0xff]   ;;  %v3191_v32 = vld [vmem:[#allocation7 + $0x8] sm:$0xff]   ;;  %v3195_v33 = vld [vmem:[#allocation7 + $0x10] sm:$0xff]   ;;  %vm126_vm4 = vcmask 261120  }
  0x4e   :  { %2711 = vset.pattern.permute.xlu0 %v3032_v1  ;;  %2718 = vset.pattern.permute.xlu1 %v3032_v1  ;;  %v3201_v35 = vld [vmem:[#allocation7 + $0x18] sm:$0xff]   ;;  %vm230_vm5 = vcmask 523264   ;;  %v3221_v41 = vld [vmem:[%s4072_s3 + $0x1] sm:$0x1]  ;;  %v3236_v63 = vld [vmem:[#allocation8 + $0x8] sm:$0xff]   ;;  %vm365_vm7 = vcmask 1040384  }
  0x4f   :  { %2453 = vmatpush3.bf16.msra.mxu0 %v3151_v2  ;;  %vm108_vm1 = vcmp.lt.s32.totalorder %v3164_v6, 64  ;;  %vm109_vm2 = vcmp.ge.s32.totalorder %v3164_v6, 96  ;;  %2461 = vmatpush3.bf16.msra.mxu1 %v3188_v31  ;;  %v3233_v62 = vld [vmem:[#allocation8] sm:$0xff]   ;;  %vm362_vm6 = vcmp.lt.s32.totalorder %v3164_v6, 4  ;;  %vm384_vm9 = vcmask 1043456  }
  0x50   :  { %2454 = vmatprep.subr.bf16.mxu0 %v3030_v0  ;;  %vm3175_vm3 = vmor %vm108_vm1, %vm109_vm2  ;;  %2462 = vmatprep.subr.bf16.mxu1 %v3030_v0  ;;  %vm397_vm10 = vcmask 3072   ;;  %vm629_vm12 = vcmp.ge.s32.totalorder %v3164_v6, 4  ;;  %vm630_vm13 = vcmp.lt.s32.totalorder %v3164_v6, 8  ;;  %vm658_vm1 = vcmask 11272  }
  0x51   :  { %vm3362_vm14 = vmand %vm629_vm12, %vm630_vm13  ;;  %vm923_vm12 = vcmask 19472  }
  0x53   :  { %2455 = vmatpush3.bf16.msra.mxu0 %v3154_v3  ;;  %2463 = vmatpush3.bf16.msra.mxu1 %v3191_v32 }
  0x54   :  { %2472 = vmatprep.subr.bf16.mxu0 %v3030_v0  ;;  %2464 = vmatprep.subr.bf16.mxu1 %v3030_v0 }
  0x56   :  { %2457 = vmatmul.mubr.bf16.vlgmr.msra.gmra.mrb[0].mxu0 %v3032_v1 }
  0x57   :  { %2476 = vmatprep.mubr.msk.bf16.mxu0 %vm3031_vm0, %v3030_v0  ;;  %2465 = vmatpush3.bf16.msra.mxu1 %v3195_v33 }
  0x58   :  { %2466 = vmatprep.subr.bf16.mxu1 %v3030_v0  ;;  %2473 = vmatpush3.bf16.msra.mxu0 %v3233_v62 }
  0x59   :  { %2474 = vmatprep.subr.bf16.mxu0 %v3030_v0 }
  0x5b   :  { %2467 = vmatpush3.bf16.msra.mxu1 %v3201_v35 }
  0x5c   :  { %2488 = vmatprep.subr.bf16.mxu1 %v3030_v0  ;;  %2475 = vmatpush3.bf16.msra.mxu0 %v3236_v63 }
  0x5d   :  { %2480 = vmatprep.subr.bf16.mxu0 %v3030_v0 }
 0x129   :  { %v164_v9 = vpop.f32.mrb[0].mxu0 }
 0x12a   :  { %v170_v10 = vadd.f32 %v164_v9, %v113_v7  ;;  %v2458_v11 = vpop.f32.mrb[1].mxu0 }
 0x12b   :  { %v167_v12 = vpop.f32.mrb[2].mxu0 }
 0x12c   :  { %v171_v13 = vadd.f32 %v170_v10, %v3170_v8  ;;  %v2459_v14 = vpop.f32.mrb[3].mxu0 }
 0x12d   :  { %v3265_v14 = vld [vmem:[%s4074_s5] sm:$0x1] }
 0x12e   :  { %v172_v16 = vmul.f32 2.0, %v171_v13 }
 0x130   :  { %v173_v17 = vsel %vm3175_vm3, %v171_v13, %v172_v16 }
 0x131   :  { %v174_v18 = vsub.f32 0.0, %v173_v17 }
 0x133   :  { %v175_v19 = vmul.f32 1.442695, %v174_v18 }
 0x135   :  { %2741 = vpow2.f32 %v175_v19 }
 0x13f   :  { %v2742_v20 = vpop.eup %2741 }
 0x140   :  { %v177_v21 = vadd.f32 1.0, %v2742_v20 }
 0x142   :  { %2743 = vrcp.f32 %v177_v21 }
 0x14c   :  { %v2744_v22 = vpop.eup %2743 }
 0x14d   :  { %v180_v23 = vmul.f32 2.0, %v2744_v22 }
 0x14f   :  { %v2310_v24 = vadd.f32 -1.0, %v180_v23 }
 0x151   :  { %v182_v25 = vsel %vm3175_vm3, %v2744_v22, %v2310_v24 }
 0x152   :  { %185 = vrot.lane.b32.xlu0 %v182_v25, %s3025_s15  ;;  %v183_v28 = vmul.f32 0.0, %v182_v25 }
 0x1c4   :  { %v186_v26 = vpop.permute.xlu0 %185 }
 0x1c5   :  { %v188_v27 = vmul.f32 %v186_v26, %v182_v25 }
 0x1c7   :  { %190 = vrot.lane.b32.xlu0 %v188_v27, %s3033_s10 }
 0x239   :  { %v191_v29 = vpop.permute.xlu0 %190 }
 0x23a   :  { %v3185_v30 = vadd.f32 %v191_v29, %v183_v28 }
 0x23c   :  { %2745 = vtanh.f32 %v3185_v30 }
 0x246   :  { %v2746_v34 = vpop.eup %2745 }
 0x247   :  { %196 = vrot.lane.b32.xlu1 %v2746_v34, %s3025_s15 }
 0x2b9   :  { %v197_v36 = vpop.permute.xlu1 %196 }
 0x2ba   :  { %v199_v37 = vmul.f32 %v197_v36, %v182_v25 }
 0x2bc   :  { %201 = vrot.lane.b32.xlu1 %v199_v37, %s3033_s10  ;;  %v424_v11 = vpack.c.bf16 %v199_v37, %v199_v37 }
 0x32e   :  { %v202_v38 = vpop.permute.xlu1 %201 }
 0x32f   :  { %v204_v39 = vsel %vm126_vm4, %v202_v38, 0.0 }
 0x330   :  { %v205_v40 = vpack.c.bf16 %v204_v39, %v204_v39  ;;  %v3276_v39 = vshrl.u32 %v106_v4, 7  ;;  %v3291_v4 = vld [vmem:[%s4075_s6] ss:$0 sm:$0xff] }
 0x332   :  { %2469 = vmatmul.mubr.msk.bf16.vlgmr.msra.gmra.mrb[0].mxu1 %vm230_vm5, %v205_v40  ;;  %v3279_v40 = vsub.s32 0, %v3276_v39  ;;  %vm378_vm8 = vcmp.le.s32.totalorder %v3164_v6, %v3276_v39 }
 0x333   :  { %2489 = vmatpush3.bf16.msra.mxu1 %v3188_v31  ;;  %2496 = vmatprep.mubr.msk.bf16.mxu1 %vm3031_vm0, %v3030_v0 }
 0x334   :  { %2490 = vmatprep.subr.bf16.mxu1 %v3030_v0 }
 0x337   :  { %2491 = vmatpush3.bf16.msra.mxu1 %v3191_v32 }
 0x338   :  { %2492 = vmatprep.subr.bf16.mxu1 %v3030_v0 }
 0x33b   :  { %2493 = vmatpush3.bf16.msra.mxu1 %v3195_v33 }
 0x33c   :  { %2494 = vmatprep.subr.bf16.mxu1 %v3030_v0 }
 0x33f   :  { %2495 = vmatpush3.bf16.msra.mxu1 %v3201_v35 }
 0x340   :  { %2516 = vmatprep.subr.bf16.mxu1 %v3030_v0 }
 0x405   :  { %v268_v42 = vpop.f32.mrb[0].mxu1 }
 0x406   :  { %v269_v43 = vadd.f32 %v3221_v41, %v268_v42  ;;  %v2470_v44 = vpop.f32.mrb[1].mxu1 }
 0x407   :  { %v271_v45 = vpop.f32.mrb[2].mxu1 }
 0x408   :  { %v274_v46 = vmul.f32 2.0, %v269_v43  ;;  %v2471_v47 = vpop.f32.mrb[3].mxu1 }
 0x40a   :  { %v275_v48 = vsel %vm3175_vm3, %v269_v43, %v274_v46 }
 0x40b   :  { %v276_v49 = vsub.f32 0.0, %v275_v48 }
 0x40d   :  { %v277_v50 = vmul.f32 1.442695, %v276_v49 }
 0x40f   :  { %2747 = vpow2.f32 %v277_v50 }
 0x419   :  { %v2748_v51 = vpop.eup %2747 }
 0x41a   :  { %v279_v52 = vadd.f32 1.0, %v2748_v51 }
 0x41c   :  { %2749 = vrcp.f32 %v279_v52 }
 0x426   :  { %v2750_v53 = vpop.eup %2749 }
 0x427   :  { %v282_v54 = vmul.f32 2.0, %v2750_v53 }
 0x429   :  { %v2316_v55 = vadd.f32 -1.0, %v282_v54 }
 0x42b   :  { %v284_v56 = vsel %vm3175_vm3, %v2750_v53, %v2316_v55 }
 0x42c   :  { %287 = vrot.lane.b32.xlu0 %v284_v56, %s3025_s15  ;;  %v285_v59 = vmul.f32 0.0, %v284_v56 }
 0x49e   :  { %v288_v57 = vpop.permute.xlu0 %287 }
 0x49f   :  { %v290_v58 = vmul.f32 %v288_v57, %v284_v56 }
 0x4a1   :  { %292 = vrot.lane.b32.xlu1 %v290_v58, %s3033_s10 }
 0x513   :  { %v293_v60 = vpop.permute.xlu1 %292 }
 0x514   :  { %v3230_v61 = vadd.f32 %v293_v60, %v285_v59 }
 0x516   :  { %2751 = vtanh.f32 %v3230_v61 }
 0x520   :  { %v2752_v1 = vpop.eup %2751 }
 0x521   :  { %298 = vrot.lane.b32.xlu0 %v2752_v1, %s3025_s15 }
 0x593   :  { %v299_v7 = vpop.permute.xlu0 %298 }
 0x594   :  { %v3242_v9 = vmul.f32 %v299_v7, %v284_v56 }
 0x596   :  { %v302_v10 = vpack.c.bf16 %v3242_v9, %v3242_v9 }
 0x598   :  { %304 = vrot.lane.b32.xlu1 %v302_v10, %s3033_s10 }
 0x59c   :  { %426 = vrot.lane.b32.xlu1 %v424_v11, %s3033_s10 }
 0x60a   :  { %v305_v12 = vpop.permute.xlu1 %304 }
 0x60b   :  { %2477 = vmatmul.mubr.msk.bf16.vlgmr.msra.gmra.mrb[4].mxu0 %vm126_vm4, %v305_v12 }
 0x60c   :  { %2481 = vmatpush3.bf16.msra.mxu0 %v3151_v2  ;;  %2484 = vmatprep.mubr.msk.bf16.mxu0 %vm3031_vm0, %v3030_v0 }
 0x60d   :  { %2482 = vmatprep.subr.bf16.mxu0 %v3030_v0 }
 0x60e   :  { %v427_v13 = vpop.permute.xlu1 %426 }
 0x610   :  { %2483 = vmatpush3.bf16.msra.mxu0 %v3154_v3 }
 0x611   :  { %2500 = vmatprep.subr.bf16.mxu0 %v3030_v0 }
 0x613   :  { %2485 = vmatmul.mubr.msk.bf16.vlgmr.msra.gmra.mrb[8].mxu0 %vm126_vm4, %v427_v13 }
 0x614   :  { %2501 = vmatpush3.bf16.msra.mxu0 %v3233_v62  ;;  %2504 = vmatprep.mubr.msk.bf16.mxu0 %vm3031_vm0, %v3030_v0 }
 0x615   :  { %2502 = vmatprep.subr.bf16.mxu0 %v3030_v0 }
 0x618   :  { %2503 = vmatpush3.bf16.msra.mxu0 %v3236_v63 }
 0x619   :  { %2508 = vmatprep.subr.bf16.mxu0 %v3030_v0 }
 0x6de   :  { %v355_v16 = vpop.f32.mrb[4].mxu0 }
 0x6df   :  { %v356_v17 = vadd.f32 %v355_v16, %v3265_v14  ;;  %v2478_v18 = vpop.f32.mrb[5].mxu0 }
 0x6e0   :  { %v358_v19 = vpop.f32.mrb[6].mxu0 }
 0x6e1   :  { %v2479_v20 = vpop.f32.mrb[7].mxu0  ;;  %v364_v21 = vsel %vm362_vm6, %v356_v17, -1e+30 }
 0x6e2   :  { %v366_v22 = vsel %vm365_vm7, %v364_v21, -inf }
 0x6e3   :  { %367 = vmax.xlane.f32.xlu0 %v366_v22 }
 0x6e6   :  { %v465_v23 = vpop.f32.mrb[8].mxu0 }
 0x6e7   :  { %v2486_v24 = vpop.f32.mrb[9].mxu0 }
 0x6e8   :  { %v468_v25 = vpop.f32.mrb[10].mxu0 }
 0x6e9   :  { %v2487_v26 = vpop.f32.mrb[11].mxu0 }
 0x770   :  { %v368_v27 = vpop.xlane.xlu0 %367 }
 0x771   :  { %v369_v28 = vsub.f32 %v364_v21, %v368_v27 }
 0x773   :  { %v370_v29 = vmul.f32 1.442695, %v369_v28 }
 0x775   :  { %2753 = vpow2.f32 %v370_v29 }
 0x77f   :  { %v2754_v34 = vpop.eup %2753 }
 0x780   :  { %v372_v36 = vsel %vm362_vm6, %v2754_v34, 0.0  ;;  %vm894_vm6 = vcmp.ge.s32.totalorder %v3164_v6, 8 }
 0x781   :  { %v373_v37 = vsel %vm365_vm7, %v372_v36, 0.0 }
 0x782   :  { %374 = vadd.xlane.f32.xlu1 %v373_v37 }
 0x80f   :  { %v375_v38 = vpop.xlane.xlu1 %374 }
 0x810   :  { %2755 = vrcp.f32 %v375_v38 }
 0x81a   :  { %v2756_v42 = vpop.eup %2755 }
 0x81b   :  { %v3281_v43 = vmul.f32 %v2756_v42, %v372_v36 }
 0x81d   :  { %v382_v44 = vrot.slane %v3281_v43, %v3279_v40 }
 0x81f   :  { %v383_v45 = vsel %vm378_vm8, %v382_v44, 0.0  ;;  %vm895_vm8 = vcmp.lt.s32.totalorder %v3164_v6, 12 }
 0x820   :  { %v385_v46 = vsel %vm384_vm9, %v383_v45, 0.0 }
 0x821   :  { %386 = vadd.xlane.f32.xlu0 %v385_v46 }
 0x8ae   :  { %v387_v47 = vpop.xlane.xlu0 %386 }
 0x8af   :  { %vm394_vm11 = vcmp.lt.f32.partialorder %v387_v47, %v3291_v4 }
 0x8b0   :  { %v2321_v48 = vsel %vm394_vm11, 1.0, %v3030_v0 }
 0x8b1   :  { %v398_v49 = vsel %vm397_vm10, %v2321_v48, 0.0  ;;  %vm3450_vm10 = vmand %vm894_vm6, %vm895_vm8  ;;  %vm1188_vm6 = vcmask 27672  }
 0x8b2   :  { %v399_v50 = vrot.slane %v398_v49, 4 }
 0x8b4   :  { %v400_v51 = vadd.f32 %v399_v50, %v398_v49 }
 0x8b6   :  { %v401_v52 = vrot.slane %v400_v51, 2 }
 0x8b8   :  { %v402_v53 = vadd.f32 %v401_v52, %v400_v51 }
 0x8ba   :  { %v403_v54 = vrot.slane %v402_v53, 1 }
 0x8bc   :  { %v3295_v55 = vadd.f32 %v403_v54, %v402_v53 }
 0x8be   :  { %v405_v56 = vmin.f32 %v3295_v55, 3.0 }
 0x8c0   :  { %420 = vperm.xlu0 %2711, %v405_v56  }
 0x93f   :  { %v421_v57 = vpop.permute.xlu0 %420 }
 0x940   :  { %v423_v58 = vmul.f32 %v421_v57, %v3161_v5 }
 0x942   :  { %v471_v59 = vadd.f32 %v465_v23, %v423_v58 }
 0x944   :  { %v472_v60 = vadd.f32 %v471_v59, %v3170_v8 }
 0x946   :  { %v473_v1 = vmul.f32 2.0, %v472_v60 }
 0x948   :  { %v474_v7 = vsel %vm3175_vm3, %v472_v60, %v473_v1 }
 0x949   :  { %v475_v10 = vsub.f32 0.0, %v474_v7 }
 0x94b   :  { %v476_v11 = vmul.f32 1.442695, %v475_v10 }
 0x94d   :  { %2757 = vpow2.f32 %v476_v11 }
 0x957   :  { %v2758_v12 = vpop.eup %2757 }
 0x958   :  { %v478_v13 = vadd.f32 1.0, %v2758_v12 }
 0x95a   :  { %2759 = vrcp.f32 %v478_v13 }
 0x964   :  { %v2760_v16 = vpop.eup %2759 }
 0x965   :  { %v481_v17 = vmul.f32 2.0, %v2760_v16 }
 0x967   :  { %v2323_v18 = vadd.f32 -1.0, %v481_v17 }
 0x969   :  { %v483_v19 = vsel %vm3175_vm3, %v2760_v16, %v2323_v18 }
 0x96a   :  { %486 = vrot.lane.b32.xlu1 %v483_v19, %s3025_s15  ;;  %v484_v22 = vmul.f32 %v483_v19, %v3185_v30 }
 0x9dc   :  { %v487_v20 = vpop.permute.xlu1 %486 }
 0x9dd   :  { %v489_v21 = vmul.f32 %v487_v20, %v483_v19 }
 0x9df   :  { %491 = vrot.lane.b32.xlu1 %v489_v21, %s3033_s10 }
 0xa51   :  { %v492_v23 = vpop.permute.xlu1 %491 }
 0xa52   :  { %v3309_v24 = vadd.f32 %v492_v23, %v484_v22 }
 0xa54   :  { %2761 = vtanh.f32 %v3309_v24 }
 0xa5e   :  { %v2762_v25 = vpop.eup %2761 }
 0xa5f   :  { %497 = vrot.lane.b32.xlu1 %v2762_v25, %s3025_s15 }
 0xad1   :  { %v498_v26 = vpop.permute.xlu1 %497 }
 0xad2   :  { %v500_v27 = vmul.f32 %v498_v26, %v483_v19 }
 0xad4   :  { %502 = vrot.lane.b32.xlu1 %v500_v27, %s3033_s10  ;;  %v689_v12 = vpack.c.bf16 %v500_v27, %v500_v27 }
 0xad8   :  { %506 = vrot.lane.b32.xlu1 %v3242_v9, %s3025_s15 }
 0xb46   :  { %v503_v28 = vpop.permute.xlu1 %502 }
 0xb4a   :  { %v507_v29 = vpop.permute.xlu1 %506 }
 0xb4b   :  { %v509_v34 = vsel %vm126_vm4, %v503_v28, %v507_v29 }
 0xb4c   :  { %v510_v30 = vpack.c.bf16 %v509_v34, %v509_v34 }
 0xb4e   :  { %2497 = vmatmul.mubr.msk.bf16.vlgmr.msra.gmra.mrb[4].mxu1 %vm230_vm5, %v510_v30 }
 0xb4f   :  { %2517 = vmatpush3.bf16.msra.mxu1 %v3188_v31  ;;  %2524 = vmatprep.mubr.msk.bf16.mxu1 %vm3031_vm0, %v3030_v0 }
 0xb50   :  { %2518 = vmatprep.subr.bf16.mxu1 %v3030_v0 }
 0xb53   :  { %2519 = vmatpush3.bf16.msra.mxu1 %v3191_v32 }
 0xb54   :  { %2520 = vmatprep.subr.bf16.mxu1 %v3030_v0 }
 0xb57   :  { %2521 = vmatpush3.bf16.msra.mxu1 %v3195_v33 }
 0xb58   :  { %2522 = vmatprep.subr.bf16.mxu1 %v3030_v0 }
 0xb5b   :  { %2523 = vmatpush3.bf16.msra.mxu1 %v3201_v35 }
 0xb5c   :  { %2544 = vmatprep.subr.bf16.mxu1 %v3030_v0 }
 0xc21   :  { %v548_v9 = vpop.f32.mrb[4].mxu1 }
 0xc22   :  { %v549_v36 = vadd.f32 %v3221_v41, %v548_v9  ;;  %v2498_v37 = vpop.f32.mrb[5].mxu1 }
 0xc23   :  { %v551_v38 = vpop.f32.mrb[6].mxu1 }
 0xc24   :  { %v554_v42 = vmul.f32 2.0, %v549_v36  ;;  %v2499_v44 = vpop.f32.mrb[7].mxu1 }
 0xc26   :  { %v555_v45 = vsel %vm3175_vm3, %v549_v36, %v554_v42  ;;  %v645_v42 = vadd.s32 4, %v3276_v39 }
 0xc27   :  { %v556_v46 = vsub.f32 0.0, %v555_v45 }
 0xc28   :  { %vm646_vm15 = vcmp.le.s32.totalorder %v3164_v6, %v645_v42 }
 0xc29   :  { %v557_v47 = vmul.f32 1.442695, %v556_v46 }
 0xc2b   :  { %2763 = vpow2.f32 %v557_v47 }
 0xc35   :  { %v2764_v48 = vpop.eup %2763 }
 0xc36   :  { %v559_v49 = vadd.f32 1.0, %v2764_v48 }
 0xc38   :  { %2765 = vrcp.f32 %v559_v49  ;;  %v3034_v49 = vmov 1  }
 0xc39   :  { %2712 = vset.pattern.permute.xlu0 %v3034_v49 }
 0xc42   :  { %v2766_v50 = vpop.eup %2765 }
 0xc43   :  { %v562_v51 = vmul.f32 2.0, %v2766_v50 }
 0xc45   :  { %v2325_v52 = vadd.f32 -1.0, %v562_v51 }
 0xc47   :  { %v564_v53 = vsel %vm3175_vm3, %v2766_v50, %v2325_v52 }
 0xc48   :  { %567 = vrot.lane.b32.xlu1 %v564_v53, %s3025_s15  ;;  %v565_v58 = vmul.f32 %v564_v53, %v3230_v61 }
 0xcba   :  { %v568_v54 = vpop.permute.xlu1 %567 }
 0xcbb   :  { %v570_v57 = vmul.f32 %v568_v54, %v564_v53 }
 0xcbd   :  { %572 = vrot.lane.b32.xlu1 %v570_v57, %s3033_s10 }
 0xd2f   :  { %v573_v59 = vpop.permute.xlu1 %572 }
 0xd30   :  { %v3336_v60 = vadd.f32 %v573_v59, %v565_v58 }
 0xd32   :  { %2767 = vtanh.f32 %v3336_v60 }
 0xd3c   :  { %v2768_v1 = vpop.eup %2767 }
 0xd3d   :  { %578 = vrot.lane.b32.xlu0 %v2768_v1, %s3025_s15 }
 0xdaf   :  { %v579_v7 = vpop.permute.xlu0 %578 }
 0xdb0   :  { %v3340_v10 = vmul.f32 %v579_v7, %v564_v53 }
 0xdb2   :  { %v582_v11 = vpack.c.bf16 %v3340_v10, %v3340_v10 }
 0xdb4   :  { %584 = vrot.lane.b32.xlu1 %v582_v11, %s3033_s10 }
 0xdb8   :  { %691 = vrot.lane.b32.xlu1 %v689_v12, %s3033_s10 }
 0xe26   :  { %v585_v61 = vpop.permute.xlu1 %584 }
 0xe27   :  { %2505 = vmatmul.mubr.msk.bf16.vlgmr.msra.gmra.mrb[12].mxu0 %vm126_vm4, %v585_v61 }
 0xe28   :  { %2509 = vmatpush3.bf16.msra.mxu0 %v3151_v2  ;;  %2512 = vmatprep.mubr.msk.bf16.mxu0 %vm3031_vm0, %v3030_v0 }
 0xe29   :  { %2510 = vmatprep.subr.bf16.mxu0 %v3030_v0 }
 0xe2a   :  { %v692_v13 = vpop.permute.xlu1 %691 }
 0xe2c   :  { %2511 = vmatpush3.bf16.msra.mxu0 %v3154_v3 }
 0xe2d   :  { %2528 = vmatprep.subr.bf16.mxu0 %v3030_v0 }
 0xe2f   :  { %2513 = vmatmul.mubr.msk.bf16.vlgmr.msra.gmra.mrb[16].mxu0 %vm126_vm4, %v692_v13 }
 0xe30   :  { %2529 = vmatpush3.bf16.msra.mxu0 %v3233_v62  ;;  %2532 = vmatprep.mubr.msk.bf16.mxu0 %vm3031_vm0, %v3030_v0 }
 0xe31   :  { %2530 = vmatprep.subr.bf16.mxu0 %v3030_v0 }
 0xe34   :  { %2531 = vmatpush3.bf16.msra.mxu0 %v3236_v63 }
 0xe35   :  { %2536 = vmatprep.subr.bf16.mxu0 %v3030_v0 }
 0xefa   :  { %v623_v16 = vpop.f32.mrb[12].mxu0 }
 0xefb   :  { %v624_v18 = vadd.f32 %v623_v16, %v3265_v14  ;;  %v2506_v19 = vpop.f32.mrb[13].mxu0 }
 0xefc   :  { %v626_v20 = vpop.f32.mrb[14].mxu0 }
 0xefd   :  { %v2507_v21 = vpop.f32.mrb[15].mxu0  ;;  %v632_v22 = vsel %vm3362_vm14, %v624_v18, -1e+30 }
 0xefe   :  { %v633_v23 = vsel %vm365_vm7, %v632_v22, -inf }
 0xeff   :  { %634 = vmax.xlane.f32.xlu0 %v633_v23 }
 0xf02   :  { %v730_v25 = vpop.f32.mrb[16].mxu0 }
 0xf03   :  { %v2514_v26 = vpop.f32.mrb[17].mxu0 }
 0xf04   :  { %v733_v27 = vpop.f32.mrb[18].mxu0 }
 0xf05   :  { %v2515_v28 = vpop.f32.mrb[19].mxu0 }
 0xf8c   :  { %v635_v29 = vpop.xlane.xlu0 %634 }
 0xf8d   :  { %v636_v34 = vsub.f32 %v632_v22, %v635_v29 }
 0xf8f   :  { %v637_v30 = vmul.f32 1.442695, %v636_v34 }
 0xf91   :  { %2769 = vpow2.f32 %v637_v30 }
 0xf9b   :  { %v2770_v9 = vpop.eup %2769 }
 0xf9c   :  { %v639_v36 = vsel %vm3362_vm14, %v2770_v9, 0.0  ;;  %vm1159_vm14 = vcmp.ge.s32.totalorder %v3164_v6, 12 }
 0xf9d   :  { %v640_v37 = vsel %vm365_vm7, %v639_v36, 0.0 }
 0xf9e   :  { %641 = vadd.xlane.f32.xlu1 %v640_v37 }
0x102b   :  { %v642_v38 = vpop.xlane.xlu1 %641 }
0x102c   :  { %2771 = vrcp.f32 %v642_v38 }
0x1036   :  { %v2772_v44 = vpop.eup %2771 }
0x1037   :  { %v3374_v45 = vmul.f32 %v2772_v44, %v639_v36 }
0x1039   :  { %v650_v46 = vrot.slane %v3374_v45, %v3279_v40 }
0x103b   :  { %v651_v47 = vsel %vm646_vm15, %v650_v46, 0.0  ;;  %vm1160_vm15 = vcmp.lt.s32.totalorder %v3164_v6, 16 }
0x103c   :  { %v652_v48 = vsel %vm384_vm9, %v651_v47, 0.0 }
0x103d   :  { %653 = vadd.xlane.f32.xlu0 %v652_v48 }
0x10ca   :  { %v654_v50 = vpop.xlane.xlu0 %653 }
0x10cb   :  { %vm655_vm2 = vcmp.lt.f32.partialorder %v654_v50, %v3291_v4 }
0x10cc   :  { %v2327_v51 = vsel %vm655_vm2, 1.0, %v3030_v0 }
0x10cd   :  { %v659_v52 = vsel %vm658_vm1, %v2327_v51, 0.0  ;;  %vm3542_vm1 = vmand %vm1159_vm14, %vm1160_vm15  ;;  %vm1453_vm14 = vcmask 35872  }
0x10ce   :  { %v660_v53 = vrot.slane %v659_v52, 4 }
0x10d0   :  { %v661_v54 = vadd.f32 %v660_v53, %v659_v52 }
0x10d2   :  { %v662_v57 = vrot.slane %v661_v54, 2 }
0x10d4   :  { %v663_v58 = vadd.f32 %v662_v57, %v661_v54 }
0x10d6   :  { %v664_v59 = vrot.slane %v663_v58, 1 }
0x10d8   :  { %v3383_v1 = vadd.f32 %v664_v59, %v663_v58 }
0x10da   :  { %v666_v7 = vmin.f32 %v3383_v1, 3.0 }
0x10dc   :  { %685 = vperm.xlu0 %2712, %v666_v7  }
0x115b   :  { %v686_v11 = vpop.permute.xlu0 %685 }
0x115c   :  { %v688_v12 = vmul.f32 %v686_v11, %v3161_v5 }
0x115e   :  { %v736_v61 = vadd.f32 %v730_v25, %v688_v12 }
0x1160   :  { %v737_v13 = vadd.f32 %v736_v61, %v3170_v8 }
0x1162   :  { %v738_v16 = vmul.f32 2.0, %v737_v13 }
0x1164   :  { %v739_v17 = vsel %vm3175_vm3, %v737_v13, %v738_v16 }
0x1165   :  { %v740_v18 = vsub.f32 0.0, %v739_v17 }
0x1167   :  { %v741_v19 = vmul.f32 1.442695, %v740_v18 }
0x1169   :  { %2773 = vpow2.f32 %v741_v19 }
0x1173   :  { %v2774_v20 = vpop.eup %2773 }
0x1174   :  { %v743_v21 = vadd.f32 1.0, %v2774_v20 }
0x1176   :  { %2775 = vrcp.f32 %v743_v21 }
0x1180   :  { %v2776_v22 = vpop.eup %2775 }
0x1181   :  { %v746_v23 = vmul.f32 2.0, %v2776_v22 }
0x1183   :  { %v2329_v26 = vadd.f32 -1.0, %v746_v23 }
0x1185   :  { %v748_v27 = vsel %vm3175_vm3, %v2776_v22, %v2329_v26 }
0x1186   :  { %751 = vrot.lane.b32.xlu1 %v748_v27, %s3025_s15  ;;  %v749_v29 = vmul.f32 %v748_v27, %v3309_v24 }
0x11f8   :  { %v752_v25 = vpop.permute.xlu1 %751 }
0x11f9   :  { %v754_v28 = vmul.f32 %v752_v25, %v748_v27 }
0x11fb   :  { %756 = vrot.lane.b32.xlu1 %v754_v28, %s3033_s10 }
0x126d   :  { %v757_v34 = vpop.permute.xlu1 %756 }
0x126e   :  { %v3397_v30 = vadd.f32 %v757_v34, %v749_v29 }
0x1270   :  { %2777 = vtanh.f32 %v3397_v30 }
0x127a   :  { %v2778_v9 = vpop.eup %2777 }
0x127b   :  { %762 = vrot.lane.b32.xlu1 %v2778_v9, %s3025_s15 }
0x12ed   :  { %v763_v36 = vpop.permute.xlu1 %762 }
0x12ee   :  { %v765_v37 = vmul.f32 %v763_v36, %v748_v27 }
0x12f0   :  { %767 = vrot.lane.b32.xlu1 %v765_v37, %s3033_s10  ;;  %v954_v26 = vpack.c.bf16 %v765_v37, %v765_v37 }
0x12f4   :  { %771 = vrot.lane.b32.xlu1 %v3340_v10, %s3025_s15 }
0x1362   :  { %v768_v38 = vpop.permute.xlu1 %767 }
0x1366   :  { %v772_v42 = vpop.permute.xlu1 %771 }
0x1367   :  { %v774_v44 = vsel %vm126_vm4, %v768_v38, %v772_v42 }
0x1368   :  { %v775_v24 = vpack.c.bf16 %v774_v44, %v774_v44 }
0x136a   :  { %2525 = vmatmul.mubr.msk.bf16.vlgmr.msra.gmra.mrb[8].mxu1 %vm230_vm5, %v775_v24 }
0x136b   :  { %2545 = vmatpush3.bf16.msra.mxu1 %v3188_v31  ;;  %2552 = vmatprep.mubr.msk.bf16.mxu1 %vm3031_vm0, %v3030_v0 }
0x136c   :  { %2546 = vmatprep.subr.bf16.mxu1 %v3030_v0 }
0x136f   :  { %2547 = vmatpush3.bf16.msra.mxu1 %v3191_v32 }
0x1370   :  { %2548 = vmatprep.subr.bf16.mxu1 %v3030_v0 }
0x1373   :  { %2549 = vmatpush3.bf16.msra.mxu1 %v3195_v33 }
0x1374   :  { %2550 = vmatprep.subr.bf16.mxu1 %v3030_v0 }
0x1377   :  { %2551 = vmatpush3.bf16.msra.mxu1 %v3201_v35 }
0x1378   :  { %2572 = vmatprep.subr.bf16.mxu1 %v3030_v0 }
0x143d   :  { %v813_v10 = vpop.f32.mrb[8].mxu1 }
0x143e   :  { %v814_v46 = vadd.f32 %v3221_v41, %v813_v10  ;;  %v2526_v47 = vpop.f32.mrb[9].mxu1 }
0x143f   :  { %v816_v48 = vpop.f32.mrb[10].mxu1 }
0x1440   :  { %v819_v50 = vmul.f32 2.0, %v814_v46  ;;  %v2527_v51 = vpop.f32.mrb[11].mxu1 }
0x1442   :  { %v820_v52 = vsel %vm3175_vm3, %v814_v46, %v819_v50 }
0x1443   :  { %v821_v53 = vsub.f32 0.0, %v820_v52  ;;  %v910_v52 = vadd.s32 8, %v3276_v39 }
0x1445   :  { %v822_v54 = vmul.f32 1.442695, %v821_v53  ;;  %vm911_vm11 = vcmp.le.s32.totalorder %v3164_v6, %v910_v52 }
0x1447   :  { %2779 = vpow2.f32 %v822_v54 }
0x1451   :  { %v2780_v57 = vpop.eup %2779 }
0x1452   :  { %v824_v58 = vadd.f32 1.0, %v2780_v57 }
0x1454   :  { %2781 = vrcp.f32 %v824_v58 }
0x145e   :  { %v2782_v59 = vpop.eup %2781 }
0x145f   :  { %v827_v11 = vmul.f32 2.0, %v2782_v59 }
0x1461   :  { %v2331_v12 = vadd.f32 -1.0, %v827_v11  ;;  %v3035_v11 = vmov 2  }
0x1462   :  { %2713 = vset.pattern.permute.xlu0 %v3035_v11 }
0x1463   :  { %v829_v61 = vsel %vm3175_vm3, %v2782_v59, %v2331_v12 }
0x1464   :  { %832 = vrot.lane.b32.xlu1 %v829_v61, %s3025_s15  ;;  %v830_v17 = vmul.f32 %v829_v61, %v3336_v60 }
0x14d6   :  { %v833_v13 = vpop.permute.xlu1 %832 }
0x14d7   :  { %v835_v16 = vmul.f32 %v833_v13, %v829_v61 }
0x14d9   :  { %837 = vrot.lane.b32.xlu0 %v835_v16, %s3033_s10 }
0x154b   :  { %v838_v18 = vpop.permute.xlu0 %837 }
0x154c   :  { %v3424_v19 = vadd.f32 %v838_v18, %v830_v17 }
0x154e   :  { %2783 = vtanh.f32 %v3424_v19 }
0x1558   :  { %v2784_v20 = vpop.eup %2783 }
0x1559   :  { %843 = vrot.lane.b32.xlu1 %v2784_v20, %s3025_s15 }
0x15cb   :  { %v844_v21 = vpop.permute.xlu1 %843 }
0x15cc   :  { %v3428_v22 = vmul.f32 %v844_v21, %v829_v61 }
0x15ce   :  { %v847_v23 = vpack.c.bf16 %v3428_v22, %v3428_v22 }
0x15d0   :  { %849 = vrot.lane.b32.xlu0 %v847_v23, %s3033_s10 }
0x15d4   :  { %956 = vrot.lane.b32.xlu0 %v954_v26, %s3033_s10 }
0x1642   :  { %v850_v60 = vpop.permute.xlu0 %849 }
0x1643   :  { %2533 = vmatmul.mubr.msk.bf16.vlgmr.msra.gmra.mrb[20].mxu0 %vm126_vm4, %v850_v60 }
0x1644   :  { %2537 = vmatpush3.bf16.msra.mxu0 %v3151_v2  ;;  %2540 = vmatprep.mubr.msk.bf16.mxu0 %vm3031_vm0, %v3030_v0 }
0x1645   :  { %2538 = vmatprep.subr.bf16.mxu0 %v3030_v0 }
0x1646   :  { %v957_v27 = vpop.permute.xlu0 %956 }
0x1648   :  { %2539 = vmatpush3.bf16.msra.mxu0 %v3154_v3 }
0x1649   :  { %2556 = vmatprep.subr.bf16.mxu0 %v3030_v0 }
0x164b   :  { %2541 = vmatmul.mubr.msk.bf16.vlgmr.msra.gmra.mrb[24].mxu0 %vm126_vm4, %v957_v27 }
0x164c   :  { %2557 = vmatpush3.bf16.msra.mxu0 %v3233_v62  ;;  %2560 = vmatprep.mubr.msk.bf16.mxu0 %vm3031_vm0, %v3030_v0 }
0x164d   :  { %2558 = vmatprep.subr.bf16.mxu0 %v3030_v0 }
0x1650   :  { %2559 = vmatpush3.bf16.msra.mxu0 %v3236_v63 }
0x1651   :  { %2564 = vmatprep.subr.bf16.mxu0 %v3030_v0 }
0x1716   :  { %v888_v2 = vpop.f32.mrb[20].mxu0 }
0x1717   :  { %v889_v25 = vadd.f32 %v888_v2, %v3265_v14  ;;  %v2534_v28 = vpop.f32.mrb[21].mxu0 }
0x1718   :  { %v891_v29 = vpop.f32.mrb[22].mxu0 }
0x1719   :  { %v2535_v34 = vpop.f32.mrb[23].mxu0  ;;  %v897_v9 = vsel %vm3450_vm10, %v889_v25, -1e+30 }
0x171a   :  { %v898_v36 = vsel %vm365_vm7, %v897_v9, -inf }
0x171b   :  { %899 = vmax.xlane.f32.xlu1 %v898_v36 }
0x171e   :  { %v995_v37 = vpop.f32.mrb[24].mxu0 }
0x171f   :  { %v2542_v38 = vpop.f32.mrb[25].mxu0 }
0x1720   :  { %v998_v42 = vpop.f32.mrb[26].mxu0 }
0x1721   :  { %v2543_v44 = vpop.f32.mrb[27].mxu0 }
0x17a8   :  { %v900_v24 = vpop.xlane.xlu1 %899 }
0x17a9   :  { %v901_v10 = vsub.f32 %v897_v9, %v900_v24 }
0x17ab   :  { %v902_v46 = vmul.f32 1.442695, %v901_v10 }
0x17ad   :  { %2785 = vpow2.f32 %v902_v46 }
0x17b7   :  { %v2786_v47 = vpop.eup %2785 }
0x17b8   :  { %v904_v48 = vsel %vm3450_vm10, %v2786_v47, 0.0  ;;  %vm1424_vm10 = vcmp.ge.s32.totalorder %v3164_v6, 16 }
0x17b9   :  { %v905_v50 = vsel %vm365_vm7, %v904_v48, 0.0 }
0x17ba   :  { %906 = vadd.xlane.f32.xlu0 %v905_v50 }
0x1847   :  { %v907_v51 = vpop.xlane.xlu0 %906 }
0x1848   :  { %2787 = vrcp.f32 %v907_v51 }
0x1852   :  { %v2788_v53 = vpop.eup %2787 }
0x1853   :  { %v3462_v54 = vmul.f32 %v2788_v53, %v904_v48 }
0x1855   :  { %v915_v57 = vrot.slane %v3462_v54, %v3279_v40 }
0x1857   :  { %v916_v58 = vsel %vm911_vm11, %v915_v57, 0.0  ;;  %vm1425_vm11 = vcmp.lt.s32.totalorder %v3164_v6, 20 }
0x1858   :  { %v917_v59 = vsel %vm384_vm9, %v916_v58, 0.0 }
0x1859   :  { %918 = vadd.xlane.f32.xlu1 %v917_v59 }
0x18e6   :  { %v919_v12 = vpop.xlane.xlu1 %918 }
0x18e7   :  { %vm920_vm13 = vcmp.lt.f32.partialorder %v919_v12, %v3291_v4 }
0x18e8   :  { %v2333_v61 = vsel %vm920_vm13, 1.0, %v3030_v0 }
0x18e9   :  { %v924_v13 = vsel %vm923_vm12, %v2333_v61, 0.0  ;;  %vm3654_vm12 = vmand %vm1424_vm10, %vm1425_vm11  ;;  %vm1718_vm10 = vcmask 44072  }
0x18ea   :  { %v925_v16 = vrot.slane %v924_v13, 4 }
0x18ec   :  { %v926_v17 = vadd.f32 %v925_v16, %v924_v13 }
0x18ee   :  { %v927_v18 = vrot.slane %v926_v17, 2 }
0x18f0   :  { %v928_v20 = vadd.f32 %v927_v18, %v926_v17 }
0x18f2   :  { %v929_v21 = vrot.slane %v928_v20, 1 }
0x18f4   :  { %v3471_v23 = vadd.f32 %v929_v21, %v928_v20 }
0x18f6   :  { %v931_v26 = vmin.f32 %v3471_v23, 3.0 }
0x18f8   :  { %950 = vperm.xlu0 %2713, %v931_v26  }
0x1977   :  { %v951_v60 = vpop.permute.xlu0 %950 }
0x1978   :  { %v953_v27 = vmul.f32 %v951_v60, %v3161_v5 }
0x197a   :  { %v1001_v2 = vadd.f32 %v995_v37, %v953_v27 }
0x197c   :  { %v1002_v3 = vadd.f32 %v1001_v2, %v3170_v8 }
0x197e   :  { %v1003_v25 = vmul.f32 2.0, %v1002_v3 }
0x1980   :  { %v1004_v28 = vsel %vm3175_vm3, %v1002_v3, %v1003_v25 }
0x1981   :  { %v1005_v29 = vsub.f32 0.0, %v1004_v28 }
0x1983   :  { %v1006_v34 = vmul.f32 1.442695, %v1005_v29 }
0x1985   :  { %2789 = vpow2.f32 %v1006_v34 }
0x198f   :  { %v2790_v9 = vpop.eup %2789 }
0x1990   :  { %v1008_v36 = vadd.f32 1.0, %v2790_v9  ;;  %v3523_v9 = vld [vmem:[#allocation5] sm:$0xff]  }
0x1992   :  { %2791 = vrcp.f32 %v1008_v36  ;;  %v3529_v36 = vld [vmem:[#allocation5 + $0x8] sm:$0xff]  }
0x199c   :  { %v2792_v38 = vpop.eup %2791 }
0x199d   :  { %v1011_v42 = vmul.f32 2.0, %v2792_v38 }
0x199f   :  { %v2335_v44 = vadd.f32 -1.0, %v1011_v42 }
0x19a1   :  { %v1013_v24 = vsel %vm3175_vm3, %v2792_v38, %v2335_v44 }
0x19a2   :  { %1016 = vrot.lane.b32.xlu1 %v1013_v24, %s3025_s15  ;;  %v1014_v37 = vmul.f32 %v1013_v24, %v3397_v30 }
0x1a14   :  { %v1017_v5 = vpop.permute.xlu1 %1016 }
0x1a15   :  { %v1019_v8 = vmul.f32 %v1017_v5, %v1013_v24 }
0x1a17   :  { %1021 = vrot.lane.b32.xlu1 %v1019_v8, %s3033_s10 }
0x1a89   :  { %v1022_v10 = vpop.permute.xlu1 %1021 }
0x1a8a   :  { %v3485_v46 = vadd.f32 %v1022_v10, %v1014_v37 }
0x1a8c   :  { %2793 = vtanh.f32 %v3485_v46 }
0x1a96   :  { %v2794_v47 = vpop.eup %2793 }
0x1a97   :  { %1027 = vrot.lane.b32.xlu1 %v2794_v47, %s3025_s15 }
0x1b09   :  { %v1028_v48 = vpop.permute.xlu1 %1027 }
0x1b0a   :  { %v1030_v50 = vmul.f32 %v1028_v48, %v1013_v24 }
0x1b0c   :  { %1032 = vrot.lane.b32.xlu1 %v1030_v50, %s3033_s10  ;;  %v1219_v34 = vpack.c.bf16 %v1030_v50, %v1030_v50 }
0x1b10   :  { %1036 = vrot.lane.b32.xlu1 %v3428_v22, %s3025_s15 }
0x1b7e   :  { %v1033_v51 = vpop.permute.xlu1 %1032 }
0x1b82   :  { %v1037_v52 = vpop.permute.xlu1 %1036 }
0x1b83   :  { %v1039_v53 = vsel %vm126_vm4, %v1033_v51, %v1037_v52 }
0x1b84   :  { %v1040_v30 = vpack.c.bf16 %v1039_v53, %v1039_v53 }
0x1b86   :  { %2553 = vmatmul.mubr.msk.bf16.vlgmr.msra.gmra.mrb[12].mxu1 %vm230_vm5, %v1040_v30 }
0x1b87   :  { %2573 = vmatpush3.bf16.msra.mxu1 %v3188_v31  ;;  %2580 = vmatprep.mubr.msk.bf16.mxu1 %vm3031_vm0, %v3030_v0 }
0x1b88   :  { %2574 = vmatprep.subr.bf16.mxu1 %v3030_v0 }
0x1b8b   :  { %2575 = vmatpush3.bf16.msra.mxu1 %v3191_v32 }
0x1b8c   :  { %2576 = vmatprep.subr.bf16.mxu1 %v3030_v0 }
0x1b8f   :  { %2577 = vmatpush3.bf16.msra.mxu1 %v3195_v33 }
0x1b90   :  { %2578 = vmatprep.subr.bf16.mxu1 %v3030_v0 }
0x1b93   :  { %2579 = vmatpush3.bf16.msra.mxu1 %v3201_v35 }
0x1b94   :  { %2600 = vmatprep.subr.bf16.mxu1 %v3030_v0 }
0x1c59   :  { %v1078_v22 = vpop.f32.mrb[12].mxu1 }
0x1c5a   :  { %v1079_v31 = vadd.f32 %v3221_v41, %v1078_v22  ;;  %v2554_v57 = vpop.f32.mrb[13].mxu1 }
0x1c5b   :  { %v1081_v58 = vpop.f32.mrb[14].mxu1  ;;  %v1175_v57 = vadd.s32 12, %v3276_v39 }
0x1c5c   :  { %v1084_v59 = vmul.f32 2.0, %v1079_v31  ;;  %v2555_v12 = vpop.f32.mrb[15].mxu1 }
0x1c5d   :  { %vm1176_vm2 = vcmp.le.s32.totalorder %v3164_v6, %v1175_v57 }
0x1c5e   :  { %v1085_v32 = vsel %vm3175_vm3, %v1079_v31, %v1084_v59 }
0x1c5f   :  { %v1086_v61 = vsub.f32 0.0, %v1085_v32 }
0x1c61   :  { %v1087_v13 = vmul.f32 1.442695, %v1086_v61 }
0x1c63   :  { %2795 = vpow2.f32 %v1087_v13  ;;  %v3036_v13 = vmov 3  }
0x1c64   :  { %2714 = vset.pattern.permute.xlu0 %v3036_v13 }
0x1c6d   :  { %v2796_v33 = vpop.eup %2795 }
0x1c6e   :  { %v1089_v16 = vadd.f32 1.0, %v2796_v33 }
0x1c70   :  { %2797 = vrcp.f32 %v1089_v16 }
0x1c7a   :  { %v2798_v17 = vpop.eup %2797 }
0x1c7b   :  { %v1092_v35 = vmul.f32 2.0, %v2798_v17 }
0x1c7d   :  { %v2337_v18 = vadd.f32 -1.0, %v1092_v35 }
0x1c7f   :  { %v1094_v20 = vsel %vm3175_vm3, %v2798_v17, %v2337_v18 }
0x1c80   :  { %1097 = vrot.lane.b32.xlu1 %v1094_v20, %s3025_s15  ;;  %v1095_v60 = vmul.f32 %v1094_v20, %v3424_v19 }
0x1cf2   :  { %v1098_v41 = vpop.permute.xlu1 %1097 }
0x1cf3   :  { %v1100_v21 = vmul.f32 %v1098_v41, %v1094_v20 }
0x1cf5   :  { %1102 = vrot.lane.b32.xlu1 %v1100_v21, %s3033_s10 }
0x1d67   :  { %v1103_v27 = vpop.permute.xlu1 %1102 }
0x1d68   :  { %v3512_v2 = vadd.f32 %v1103_v27, %v1095_v60 }
0x1d6a   :  { %2799 = vtanh.f32 %v3512_v2 }
0x1d74   :  { %v2800_v3 = vpop.eup %2799 }
0x1d75   :  { %1108 = vrot.lane.b32.xlu1 %v2800_v3, %s3025_s15 }
0x1de7   :  { %v1109_v25 = vpop.permute.xlu1 %1108 }
0x1de8   :  { %v3516_v28 = vmul.f32 %v1109_v25, %v1094_v20  ;;  %v3568_v25 = vld [vmem:[#allocation2] sm:$0x1] }
0x1dea   :  { %v1112_v29 = vpack.c.bf16 %v3516_v28, %v3516_v28 }
0x1dec   :  { %1114 = vrot.lane.b32.xlu0 %v1112_v29, %s3033_s10 }
0x1df0   :  { %1221 = vrot.lane.b32.xlu0 %v1219_v34, %s3033_s10  ;;  %v3574_v34 = vld [vmem:[%s4072_s3] sm:$0x1] }
0x1e5e   :  { %v1115_v19 = vpop.permute.xlu0 %1114 }
0x1e5f   :  { %2561 = vmatmul.mubr.msk.bf16.vlgmr.msra.gmra.mrb[28].mxu0 %vm126_vm4, %v1115_v19 }
0x1e60   :  { %2565 = vmatpush3.bf16.msra.mxu0 %v3523_v9  ;;  %2568 = vmatprep.mubr.msk.bf16.mxu0 %vm3031_vm0, %v3030_v0 }
0x1e61   :  { %2566 = vmatprep.subr.bf16.mxu0 %v3030_v0 }
0x1e62   :  { %v1222_v38 = vpop.permute.xlu0 %1221 }
0x1e64   :  { %2567 = vmatpush3.bf16.msra.mxu0 %v3529_v36 }
0x1e65   :  { %2584 = vmatprep.subr.bf16.mxu0 %v3030_v0 }
0x1e67   :  { %2569 = vmatmul.mubr.msk.bf16.vlgmr.msra.gmra.mrb[32].mxu0 %vm126_vm4, %v1222_v38 }
0x1e68   :  { %2585 = vmatpush3.bf16.msra.mxu0 %v3233_v62  ;;  %2588 = vmatprep.mubr.msk.bf16.mxu0 %vm3031_vm0, %v3030_v0 }
0x1e69   :  { %2586 = vmatprep.subr.bf16.mxu0 %v3030_v0 }
0x1e6c   :  { %2587 = vmatpush3.bf16.msra.mxu0 %v3236_v63 }
0x1e6d   :  { %2592 = vmatprep.subr.bf16.mxu0 %v3030_v0 }
0x1f32   :  { %v1153_v42 = vpop.f32.mrb[28].mxu0 }
0x1f33   :  { %v1154_v62 = vadd.f32 %v1153_v42, %v3265_v14  ;;  %v2562_v24 = vpop.f32.mrb[29].mxu0 }
0x1f34   :  { %v1156_v5 = vpop.f32.mrb[30].mxu0 }
0x1f35   :  { %v2563_v8 = vpop.f32.mrb[31].mxu0  ;;  %v1162_v37 = vsel %vm3542_vm1, %v1154_v62, -1e+30 }
0x1f36   :  { %v1163_v63 = vsel %vm365_vm7, %v1162_v37, -inf }
0x1f37   :  { %1164 = vmax.xlane.f32.xlu1 %v1163_v63 }
0x1f3a   :  { %v1260_v10 = vpop.f32.mrb[32].mxu0 }
0x1f3b   :  { %v2570_v47 = vpop.f32.mrb[33].mxu0 }
0x1f3c   :  { %v1263_v48 = vpop.f32.mrb[34].mxu0 }
0x1f3d   :  { %v2571_v50 = vpop.f32.mrb[35].mxu0 }
0x1fc4   :  { %v1165_v51 = vpop.xlane.xlu1 %1164 }
0x1fc5   :  { %v1166_v52 = vsub.f32 %v1162_v37, %v1165_v51 }
0x1fc7   :  { %v1167_v53 = vmul.f32 1.442695, %v1166_v52 }
0x1fc9   :  { %2801 = vpow2.f32 %v1167_v53 }
0x1fd3   :  { %v2802_v30 = vpop.eup %2801 }
0x1fd4   :  { %v1169_v14 = vsel %vm3542_vm1, %v2802_v30, 0.0  ;;  %vm1689_vm1 = vcmp.ge.s32.totalorder %v3164_v6, 20 }
0x1fd5   :  { %v1170_v22 = vsel %vm365_vm7, %v1169_v14, 0.0 }
0x1fd6   :  { %1171 = vadd.xlane.f32.xlu0 %v1170_v22 }
0x2063   :  { %v1172_v31 = vpop.xlane.xlu0 %1171 }
0x2064   :  { %2803 = vrcp.f32 %v1172_v31 }
0x206e   :  { %v2804_v58 = vpop.eup %2803 }
0x206f   :  { %v3554_v59 = vmul.f32 %v2804_v58, %v1169_v14  ;;  %v3593_v58 = vld [vmem:[#allocation7] sm:$0xff]  }
0x2071   :  { %v1180_v12 = vrot.slane %v3554_v59, %v3279_v40 }
0x2073   :  { %v1181_v32 = vsel %vm1176_vm2, %v1180_v12, 0.0  ;;  %v3599_v12 = vld [vmem:[#allocation7 + $0x8] sm:$0xff]   ;;  %vm1690_vm2 = vcmp.lt.s32.totalorder %v3164_v6, 24 }
0x2074   :  { %v1182_v61 = vsel %vm384_vm9, %v1181_v32, 0.0  ;;  %v3607_v32 = vld [vmem:[#allocation7 + $0x18] sm:$0xff]  }
0x2075   :  { %1183 = vadd.xlane.f32.xlu1 %v1182_v61 }
0x2102   :  { %v1184_v33 = vpop.xlane.xlu1 %1183 }
0x2103   :  { %vm1185_vm8 = vcmp.lt.f32.partialorder %v1184_v33, %v3291_v4  ;;  %v3614_v33 = vld [vmem:[%s4072_s3 + $0x1] sm:$0x1] }
0x2104   :  { %v2339_v16 = vsel %vm1185_vm8, 1.0, %v3030_v0 }
0x2105   :  { %v1189_v17 = vsel %vm1188_vm6, %v2339_v16, 0.0  ;;  %vm3752_vm6 = vmand %vm1689_vm1, %vm1690_vm2 }
0x2106   :  { %v1190_v35 = vrot.slane %v1189_v17, 4 }
0x2108   :  { %v1191_v18 = vadd.f32 %v1190_v35, %v1189_v17 }
0x210a   :  { %v1192_v20 = vrot.slane %v1191_v18, 2 }
0x210c   :  { %v1193_v41 = vadd.f32 %v1192_v20, %v1191_v18 }
0x210e   :  { %v1194_v21 = vrot.slane %v1193_v41, 1 }
0x2110   :  { %v3563_v60 = vadd.f32 %v1194_v21, %v1193_v41 }
0x2112   :  { %v1196_v27 = vmin.f32 %v3563_v60, 3.0 }
0x2114   :  { %1215 = vperm.xlu0 %2714, %v1196_v27  }
0x2193   :  { %v1216_v3 = vpop.permute.xlu0 %1215 }
0x2194   :  { %v1218_v4 = vmul.f32 %v3568_v25, %v1216_v3 }
0x2196   :  { %v1266_v29 = vadd.f32 %v1260_v10, %v1218_v4 }
0x2198   :  { %v1267_v19 = vadd.f32 %v3574_v34, %v1266_v29 }
0x219a   :  { %v1268_v38 = vmul.f32 2.0, %v1267_v19 }
0x219c   :  { %v1269_v42 = vsel %vm3175_vm3, %v1267_v19, %v1268_v38 }
0x219d   :  { %v1270_v44 = vsub.f32 0.0, %v1269_v42 }
0x219f   :  { %v1271_v62 = vmul.f32 1.442695, %v1270_v44 }
0x21a1   :  { %2805 = vpow2.f32 %v1271_v62 }
0x21ab   :  { %v2806_v24 = vpop.eup %2805 }
0x21ac   :  { %v1273_v5 = vadd.f32 1.0, %v2806_v24 }
0x21ae   :  { %2807 = vrcp.f32 %v1273_v5 }
0x21b8   :  { %v2808_v8 = vpop.eup %2807 }
0x21b9   :  { %v1276_v37 = vmul.f32 2.0, %v2808_v8 }
0x21bb   :  { %v2341_v63 = vadd.f32 -1.0, %v1276_v37 }
0x21bd   :  { %v1278_v10 = vsel %vm3175_vm3, %v2808_v8, %v2341_v63 }
0x21be   :  { %1281 = vrot.lane.b32.xlu1 %v1278_v10, %s3025_s15  ;;  %v1279_v50 = vmul.f32 %v1278_v10, %v3485_v46 }
0x2230   :  { %v1282_v47 = vpop.permute.xlu1 %1281 }
0x2231   :  { %v1284_v48 = vmul.f32 %v1282_v47, %v1278_v10 }
0x2233   :  { %1286 = vrot.lane.b32.xlu1 %v1284_v48, %s3033_s10 }
0x22a5   :  { %v1287_v51 = vpop.permute.xlu1 %1286 }
0x22a6   :  { %v3584_v52 = vadd.f32 %v1287_v51, %v1279_v50 }
0x22a8   :  { %2809 = vtanh.f32 %v3584_v52 }
0x22b2   :  { %v2810_v53 = vpop.eup %2809 }
0x22b3   :  { %1292 = vrot.lane.b32.xlu1 %v2810_v53, %s3025_s15  ;;  %v3642_v53 = vld [vmem:[#allocation8] sm:$0xff]  }
0x2325   :  { %v1293_v30 = vpop.permute.xlu1 %1292 }
0x2326   :  { %v1295_v14 = vmul.f32 %v1293_v30, %v1278_v10  ;;  %v3648_v30 = vld [vmem:[#allocation8 + $0x8] sm:$0xff]  }
0x2328   :  { %1297 = vrot.lane.b32.xlu1 %v1295_v14, %s3033_s10  ;;  %v1484_v50 = vpack.c.bf16 %v1295_v14, %v1295_v14 }
0x232c   :  { %1301 = vrot.lane.b32.xlu1 %v3516_v28, %s3025_s15  ;;  %v3603_v28 = vld [vmem:[#allocation7 + $0x10] sm:$0xff]  }
0x239a   :  { %v1298_v22 = vpop.permute.xlu1 %1297 }
0x239e   :  { %v1302_v31 = vpop.permute.xlu1 %1301 }
0x239f   :  { %v1304_v57 = vsel %vm126_vm4, %v1298_v22, %v1302_v31  ;;  %v3661_v31 = vld [vmem:[%s4074_s5] sm:$0x1] }
0x23a0   :  { %v1305_v46 = vpack.c.bf16 %v1304_v57, %v1304_v57 }
0x23a2   :  { %2581 = vmatmul.mubr.msk.bf16.vlgmr.msra.gmra.mrb[16].mxu1 %vm230_vm5, %v1305_v46 }
0x23a3   :  { %2601 = vmatpush3.bf16.msra.mxu1 %v3593_v58  ;;  %2608 = vmatprep.mubr.msk.bf16.mxu1 %vm3031_vm0, %v3030_v0 }
0x23a4   :  { %2602 = vmatprep.subr.bf16.mxu1 %v3030_v0 }
0x23a7   :  { %2603 = vmatpush3.bf16.msra.mxu1 %v3599_v12 }
0x23a8   :  { %2604 = vmatprep.subr.bf16.mxu1 %v3030_v0 }
0x23ab   :  { %2605 = vmatpush3.bf16.msra.mxu1 %v3603_v28 }
0x23ac   :  { %2606 = vmatprep.subr.bf16.mxu1 %v3030_v0 }
0x23af   :  { %2607 = vmatpush3.bf16.msra.mxu1 %v3607_v32 }
0x23b0   :  { %2628 = vmatprep.subr.bf16.mxu1 %v3030_v0 }
0x2475   :  { %v1343_v61 = vpop.f32.mrb[16].mxu1 }
0x2476   :  { %v1344_v16 = vadd.f32 %v3614_v33, %v1343_v61  ;;  %v2582_v17 = vpop.f32.mrb[17].mxu1 }
0x2477   :  { %v1346_v35 = vpop.f32.mrb[18].mxu1 }
0x2478   :  { %v1349_v18 = vmul.f32 2.0, %v1344_v16  ;;  %v2583_v20 = vpop.f32.mrb[19].mxu1 }
0x247a   :  { %v1350_v41 = vsel %vm3175_vm3, %v1344_v16, %v1349_v18 }
0x247b   :  { %v1351_v21 = vsub.f32 0.0, %v1350_v41 }
0x247d   :  { %v1352_v3 = vmul.f32 1.442695, %v1351_v21 }
0x247f   :  { %2811 = vpow2.f32 %v1352_v3 }
0x2489   :  { %v2812_v4 = vpop.eup %2811 }
0x248a   :  { %v1354_v29 = vadd.f32 1.0, %v2812_v4 }
0x248c   :  { %2813 = vrcp.f32 %v1354_v29 }
0x2496   :  { %v2814_v19 = vpop.eup %2813 }
0x2497   :  { %v1357_v38 = vmul.f32 2.0, %v2814_v19 }
0x2499   :  { %v2343_v42 = vadd.f32 -1.0, %v1357_v38 }
0x249b   :  { %v1359_v44 = vsel %vm3175_vm3, %v2814_v19, %v2343_v42 }
0x249c   :  { %1362 = vrot.lane.b32.xlu1 %v1359_v44, %s3025_s15  ;;  %v1360_v5 = vmul.f32 %v1359_v44, %v3512_v2 }
0x250e   :  { %v1363_v62 = vpop.permute.xlu1 %1362 }
0x250f   :  { %v1365_v24 = vmul.f32 %v1363_v62, %v1359_v44  ;;  %v1440_v62 = vadd.s32 16, %v3276_v39 }
0x2511   :  { %1367 = vrot.lane.b32.xlu1 %v1365_v24, %s3033_s10  ;;  %vm1441_vm13 = vcmp.le.s32.totalorder %v3164_v6, %v1440_v62 }
0x2583   :  { %v1368_v8 = vpop.permute.xlu1 %1367 }
0x2584   :  { %v3624_v37 = vadd.f32 %v1368_v8, %v1360_v5 }
0x2586   :  { %2815 = vtanh.f32 %v3624_v37 }
0x2590   :  { %v2816_v63 = vpop.eup %2815 }
0x2591   :  { %1373 = vrot.lane.b32.xlu0 %v2816_v63, %s3025_s15 }
0x2603   :  { %v1374_v10 = vpop.permute.xlu0 %1373 }
0x2604   :  { %v3628_v47 = vmul.f32 %v1374_v10, %v1359_v44 }
0x2606   :  { %v1377_v48 = vpack.c.bf16 %v3628_v47, %v3628_v47 }
0x2608   :  { %1379 = vrot.lane.b32.xlu1 %v1377_v48, %s3033_s10  ;;  %v3037_v48 = vmov 4  }
0x2609   :  { %2715 = vset.pattern.permute.xlu0 %v3037_v48 }
0x260c   :  { %1486 = vrot.lane.b32.xlu1 %v1484_v50, %s3033_s10 }
0x267a   :  { %v1380_v2 = vpop.permute.xlu1 %1379 }
0x267b   :  { %2589 = vmatmul.mubr.msk.bf16.vlgmr.msra.gmra.mrb[36].mxu0 %vm126_vm4, %v1380_v2  ;;  %v3681_v2 = vld [vmem:[%s4075_s6] ss:$0 sm:$0xff]  ;;  %s3041_s6 = smov [#allocation11]  }
0x267c   :  { %2593 = vmatpush3.bf16.msra.mxu0 %v3523_v9  ;;  %2596 = vmatprep.mubr.msk.bf16.mxu0 %vm3031_vm0, %v3030_v0 }
0x267d   :  { %2594 = vmatprep.subr.bf16.mxu0 %v3030_v0 }
0x267e   :  { %v1487_v51 = vpop.permute.xlu1 %1486 }
0x2680   :  { %2595 = vmatpush3.bf16.msra.mxu0 %v3529_v36 }
0x2681   :  { %2612 = vmatprep.subr.bf16.mxu0 %v3030_v0 }
0x2683   :  { %2597 = vmatmul.mubr.msk.bf16.vlgmr.msra.gmra.mrb[40].mxu0 %vm126_vm4, %v1487_v51 }
0x2684   :  { %2613 = vmatpush3.bf16.msra.mxu0 %v3642_v53  ;;  %2616 = vmatprep.mubr.msk.bf16.mxu0 %vm3031_vm0, %v3030_v0 }
0x2685   :  { %2614 = vmatprep.subr.bf16.mxu0 %v3030_v0 }
0x2688   :  { %2615 = vmatpush3.bf16.msra.mxu0 %v3648_v30 }
0x2689   :  { %2620 = vmatprep.subr.bf16.mxu0 %v3030_v0 }
0x274e   :  { %v1418_v14 = vpop.f32.mrb[36].mxu0 }
0x274f   :  { %v1419_v57 = vadd.f32 %v3661_v31, %v1418_v14  ;;  %v2590_v46 = vpop.f32.mrb[37].mxu0 }
0x2750   :  { %v1421_v61 = vpop.f32.mrb[38].mxu0 }
0x2751   :  { %v2591_v16 = vpop.f32.mrb[39].mxu0  ;;  %v1427_v17 = vsel %vm3654_vm12, %v1419_v57, -1e+30 }
0x2752   :  { %v1428_v35 = vsel %vm365_vm7, %v1427_v17, -inf }
0x2753   :  { %1429 = vmax.xlane.f32.xlu0 %v1428_v35 }
0x2756   :  { %v1525_v18 = vpop.f32.mrb[40].mxu0 }
0x2757   :  { %v2598_v20 = vpop.f32.mrb[41].mxu0 }
0x2758   :  { %v1528_v41 = vpop.f32.mrb[42].mxu0 }
0x2759   :  { %v2599_v21 = vpop.f32.mrb[43].mxu0 }
0x27e0   :  { %v1430_v3 = vpop.xlane.xlu0 %1429 }
0x27e1   :  { %v1431_v4 = vsub.f32 %v1427_v17, %v1430_v3 }
0x27e3   :  { %v1432_v29 = vmul.f32 1.442695, %v1431_v4 }
0x27e5   :  { %2817 = vpow2.f32 %v1432_v29 }
0x27ef   :  { %v2818_v19 = vpop.eup %2817 }
0x27f0   :  { %v1434_v38 = vsel %vm3654_vm12, %v2818_v19, 0.0  ;;  %vm1954_vm12 = vcmp.ge.s32.totalorder %v3164_v6, 24 }
0x27f1   :  { %v1435_v42 = vsel %vm365_vm7, %v1434_v38, 0.0 }
0x27f2   :  { %1436 = vadd.xlane.f32.xlu1 %v1435_v42 }
0x287f   :  { %v1437_v44 = vpop.xlane.xlu1 %1436 }
0x2880   :  { %2819 = vrcp.f32 %v1437_v44 }
0x288a   :  { %v2820_v24 = vpop.eup %2819 }
0x288b   :  { %v3671_v5 = vmul.f32 %v2820_v24, %v1434_v38 }
0x288d   :  { %v1445_v8 = vrot.slane %v3671_v5, %v3279_v40 }
0x288f   :  { %v1446_v63 = vsel %vm1441_vm13, %v1445_v8, 0.0  ;;  %vm1955_vm13 = vcmp.lt.s32.totalorder %v3164_v6, 28 }
0x2890   :  { %v1447_v10 = vsel %vm384_vm9, %v1446_v63, 0.0 }
0x2891   :  { %1448 = vadd.xlane.f32.xlu0 %v1447_v10 }
0x291e   :  { %v1449_v50 = vpop.xlane.xlu0 %1448 }
0x291f   :  { %vm1450_vm15 = vcmp.lt.f32.partialorder %v1449_v50, %v3681_v2 }
0x2920   :  { %v2345_v51 = vsel %vm1450_vm15, 1.0, %v3030_v0  ;;  %vm1983_vm15 = vcmask 52272  }
0x2921   :  { %v1454_v14 = vsel %vm1453_vm14, %v2345_v51, 0.0  ;;  %vm3838_vm14 = vmand %vm1954_vm12, %vm1955_vm13 }
0x2922   :  { %v1455_v22 = vrot.slane %v1454_v14, 4 }
0x2924   :  { %v1456_v57 = vadd.f32 %v1455_v22, %v1454_v14 }
0x2926   :  { %v1457_v46 = vrot.slane %v1456_v57, 2 }
0x2928   :  { %v1458_v61 = vadd.f32 %v1457_v46, %v1456_v57 }
0x292a   :  { %v1459_v16 = vrot.slane %v1458_v61, 1 }
0x292c   :  { %v3685_v17 = vadd.f32 %v1459_v16, %v1458_v61 }
0x292e   :  { %v1461_v35 = vmin.f32 %v3685_v17, 3.0 }
0x2930   :  { %1480 = vperm.xlu0 %2715, %v1461_v35   ;;  %v3918_v55 = vtrunc.f32 %v1461_v35 }
0x2932   :  { %v2685_v23 = vcvt.f32.s32 %v3918_v55 }
0x2934   :  { %v1463_v60 = vadd.s32 16, %v2685_v23 }
0x29af   :  { %v1481_v20 = vpop.permute.xlu0 %1480 }
0x29b0   :  { %v1483_v41 = vmul.f32 %v3568_v25, %v1481_v20 }
0x29b2   :  { %v1531_v21 = vadd.f32 %v1525_v18, %v1483_v41 }
0x29b4   :  { %v1532_v3 = vadd.f32 %v3574_v34, %v1531_v21 }
0x29b6   :  { %v1533_v4 = vmul.f32 2.0, %v1532_v3 }
0x29b8   :  { %v1534_v29 = vsel %vm3175_vm3, %v1532_v3, %v1533_v4 }
0x29b9   :  { %v1535_v19 = vsub.f32 0.0, %v1534_v29 }
0x29bb   :  { %v1536_v38 = vmul.f32 1.442695, %v1535_v19 }
0x29bd   :  { %2821 = vpow2.f32 %v1536_v38 }
0x29c7   :  { %v2822_v42 = vpop.eup %2821 }
0x29c8   :  { %v1538_v44 = vadd.f32 1.0, %v2822_v42 }
0x29ca   :  { %2823 = vrcp.f32 %v1538_v44 }
0x29d4   :  { %v2824_v62 = vpop.eup %2823 }
0x29d5   :  { %v1541_v24 = vmul.f32 2.0, %v2824_v62 }
0x29d7   :  { %v2347_v8 = vadd.f32 -1.0, %v1541_v24 }
0x29d9   :  { %v1543_v63 = vsel %vm3175_vm3, %v2824_v62, %v2347_v8 }
0x29da   :  { %1546 = vrot.lane.b32.xlu1 %v1543_v63, %s3025_s15  ;;  %v1544_v50 = vmul.f32 %v1543_v63, %v3584_v52 }
0x2a4c   :  { %v1547_v18 = vpop.permute.xlu1 %1546 }
0x2a4d   :  { %v1549_v10 = vmul.f32 %v1547_v18, %v1543_v63 }
0x2a4f   :  { %1551 = vrot.lane.b32.xlu1 %v1549_v10, %s3033_s10 }
0x2ac1   :  { %v1552_v51 = vpop.permute.xlu1 %1551 }
0x2ac2   :  { %v3699_v14 = vadd.f32 %v1552_v51, %v1544_v50 }
0x2ac4   :  { %2825 = vtanh.f32 %v3699_v14 }
0x2ace   :  { %v2826_v22 = vpop.eup %2825 }
0x2acf   :  { %1557 = vrot.lane.b32.xlu1 %v2826_v22, %s3025_s15 }
0x2b41   :  { %v1558_v57 = vpop.permute.xlu1 %1557 }
0x2b42   :  { %v1560_v46 = vmul.f32 %v1558_v57, %v1543_v63 }
0x2b44   :  { %1562 = vrot.lane.b32.xlu1 %v1560_v46, %s3033_s10 }
0x2b48   :  { %1566 = vrot.lane.b32.xlu1 %v3628_v47, %s3025_s15 }
0x2bb6   :  { %v1563_v61 = vpop.permute.xlu1 %1562 }
0x2bba   :  { %v1567_v16 = vpop.permute.xlu1 %1566 }
0x2bbb   :  { %v1569_v20 = vsel %vm126_vm4, %v1563_v61, %v1567_v16 }
0x2bbc   :  { %v1570_v52 = vpack.c.bf16 %v1569_v20, %v1569_v20 }
0x2bbe   :  { %2609 = vmatmul.mubr.msk.bf16.vlgmr.msra.gmra.mrb[20].mxu1 %vm230_vm5, %v1570_v52 }
0x2bbf   :  { %2629 = vmatpush3.bf16.msra.mxu1 %v3593_v58  ;;  %2636 = vmatprep.mubr.msk.bf16.mxu1 %vm3031_vm0, %v3030_v0 }
0x2bc0   :  { %2630 = vmatprep.subr.bf16.mxu1 %v3030_v0 }
0x2bc3   :  { %2631 = vmatpush3.bf16.msra.mxu1 %v3599_v12 }
0x2bc4   :  { %2632 = vmatprep.subr.bf16.mxu1 %v3030_v0 }
0x2bc7   :  { %2633 = vmatpush3.bf16.msra.mxu1 %v3603_v28 }
0x2bc8   :  { %2634 = vmatprep.subr.bf16.mxu1 %v3030_v0 }
0x2bcb   :  { %2635 = vmatpush3.bf16.msra.mxu1 %v3607_v32 }
0x2bcc   :  { %2656 = vmatprep.subr.bf16.mxu1 %v3030_v0 }
0x2c91   :  { %v1608_v47 = vpop.f32.mrb[20].mxu1 }
0x2c92   :  { %v1609_v41 = vadd.f32 %v3614_v33, %v1608_v47  ;;  %v2610_v21 = vpop.f32.mrb[21].mxu1  ;;  %v1749_v47 = vpack.c.bf16 %v1560_v46, %v1560_v46 }
0x2c93   :  { %v1611_v3 = vpop.f32.mrb[22].mxu1  ;;  %v3038_v21 = vmov 5  }
0x2c94   :  { %v1614_v4 = vmul.f32 2.0, %v1609_v41  ;;  %v2611_v29 = vpop.f32.mrb[23].mxu1  ;;  %2716 = vset.pattern.permute.xlu0 %v3038_v21 }
0x2c96   :  { %v1615_v19 = vsel %vm3175_vm3, %v1609_v41, %v1614_v4 }
0x2c97   :  { %v1616_v38 = vsub.f32 0.0, %v1615_v19 }
0x2c99   :  { %v1617_v42 = vmul.f32 1.442695, %v1616_v38 }
0x2c9b   :  { %2827 = vpow2.f32 %v1617_v42 }
0x2ca5   :  { %v2828_v44 = vpop.eup %2827 }
0x2ca6   :  { %v1619_v62 = vadd.f32 1.0, %v2828_v44 }
0x2ca8   :  { %2829 = vrcp.f32 %v1619_v62 }
0x2cb2   :  { %v2830_v24 = vpop.eup %2829 }
0x2cb3   :  { %v1622_v8 = vmul.f32 2.0, %v2830_v24 }
0x2cb5   :  { %v2349_v63 = vadd.f32 -1.0, %v1622_v8 }
0x2cb7   :  { %v1624_v18 = vsel %vm3175_vm3, %v2830_v24, %v2349_v63 }
0x2cb8   :  { %1627 = vrot.lane.b32.xlu1 %v1624_v18, %s3025_s15  ;;  %v1625_v51 = vmul.f32 %v1624_v18, %v3624_v37 }
0x2d2a   :  { %v1628_v10 = vpop.permute.xlu1 %1627 }
0x2d2b   :  { %v1630_v50 = vmul.f32 %v1628_v10, %v1624_v18 }
0x2d2d   :  { %1632 = vrot.lane.b32.xlu1 %v1630_v50, %s3033_s10 }
0x2d9f   :  { %v1633_v22 = vpop.permute.xlu1 %1632 }
0x2da0   :  { %v3726_v57 = vadd.f32 %v1633_v22, %v1625_v51 }
0x2da2   :  { %2831 = vtanh.f32 %v3726_v57 }
0x2dac   :  { %v2832_v61 = vpop.eup %2831 }
0x2dad   :  { %1638 = vrot.lane.b32.xlu0 %v2832_v61, %s3025_s15 }
0x2e1f   :  { %v1639_v16 = vpop.permute.xlu0 %1638 }
0x2e20   :  { %v3730_v20 = vmul.f32 %v1639_v16, %v1624_v18  ;;  %v1705_v16 = vadd.s32 20, %v3276_v39 }
0x2e22   :  { %v1642_v52 = vpack.c.bf16 %v3730_v20, %v3730_v20  ;;  %vm1706_vm8 = vcmp.le.s32.totalorder %v3164_v6, %v1705_v16 }
0x2e24   :  { %1644 = vrot.lane.b32.xlu1 %v1642_v52, %s3033_s10 }
0x2e28   :  { %1751 = vrot.lane.b32.xlu1 %v1749_v47, %s3033_s10 }
0x2e96   :  { %v1645_v37 = vpop.permute.xlu1 %1644 }
0x2e97   :  { %2617 = vmatmul.mubr.msk.bf16.vlgmr.msra.gmra.mrb[44].mxu0 %vm126_vm4, %v1645_v37 }
0x2e98   :  { %2621 = vmatpush3.bf16.msra.mxu0 %v3523_v9  ;;  %2624 = vmatprep.mubr.msk.bf16.mxu0 %vm3031_vm0, %v3030_v0 }
0x2e99   :  { %2622 = vmatprep.subr.bf16.mxu0 %v3030_v0 }
0x2e9a   :  { %v1752_v41 = vpop.permute.xlu1 %1751 }
0x2e9c   :  { %2623 = vmatpush3.bf16.msra.mxu0 %v3529_v36 }
0x2e9d   :  { %2640 = vmatprep.subr.bf16.mxu0 %v3030_v0 }
0x2e9f   :  { %2625 = vmatmul.mubr.msk.bf16.vlgmr.msra.gmra.mrb[48].mxu0 %vm126_vm4, %v1752_v41 }
0x2ea0   :  { %2641 = vmatpush3.bf16.msra.mxu0 %v3642_v53  ;;  %2644 = vmatprep.mubr.msk.bf16.mxu0 %vm3031_vm0, %v3030_v0 }
0x2ea1   :  { %2642 = vmatprep.subr.bf16.mxu0 %v3030_v0 }
0x2ea4   :  { %2643 = vmatpush3.bf16.msra.mxu0 %v3648_v30 }
0x2ea5   :  { %2648 = vmatprep.subr.bf16.mxu0 %v3030_v0 }
0x2f6a   :  { %v1683_v46 = vpop.f32.mrb[44].mxu0 }
0x2f6b   :  { %v1684_v3 = vadd.f32 %v3661_v31, %v1683_v46  ;;  %v2618_v4 = vpop.f32.mrb[45].mxu0 }
0x2f6c   :  { %v1686_v29 = vpop.f32.mrb[46].mxu0 }
0x2f6d   :  { %v2619_v19 = vpop.f32.mrb[47].mxu0  ;;  %v1692_v38 = vsel %vm3752_vm6, %v1684_v3, -1e+30 }
0x2f6e   :  { %v1693_v42 = vsel %vm365_vm7, %v1692_v38, -inf }
0x2f6f   :  { %1694 = vmax.xlane.f32.xlu0 %v1693_v42 }
0x2f72   :  { %v1790_v44 = vpop.f32.mrb[48].mxu0 }
0x2f73   :  { %v2626_v62 = vpop.f32.mrb[49].mxu0 }
0x2f74   :  { %v1793_v24 = vpop.f32.mrb[50].mxu0 }
0x2f75   :  { %v2627_v8 = vpop.f32.mrb[51].mxu0 }
0x2ffc   :  { %v1695_v63 = vpop.xlane.xlu0 %1694 }
0x2ffd   :  { %v1696_v18 = vsub.f32 %v1692_v38, %v1695_v63 }
0x2fff   :  { %v1697_v10 = vmul.f32 1.442695, %v1696_v18 }
0x3001   :  { %2833 = vpow2.f32 %v1697_v10 }
0x300b   :  { %v2834_v50 = vpop.eup %2833 }
0x300c   :  { %v1699_v51 = vsel %vm3752_vm6, %v2834_v50, 0.0 }
0x300d   :  { %v1700_v22 = vsel %vm365_vm7, %v1699_v51, 0.0 }
0x300e   :  { %1701 = vadd.xlane.f32.xlu1 %v1700_v22 }
0x309b   :  { %v1702_v61 = vpop.xlane.xlu1 %1701 }
0x309c   :  { %2835 = vrcp.f32 %v1702_v61 }
0x30a6   :  { %v2836_v52 = vpop.eup %2835 }
0x30a7   :  { %v3764_v47 = vmul.f32 %v2836_v52, %v1699_v51 }
0x30a9   :  { %v1710_v37 = vrot.slane %v3764_v47, %v3279_v40 }
0x30ab   :  { %v1711_v41 = vsel %vm1706_vm8, %v1710_v37, 0.0 }
0x30ac   :  { %v1712_v46 = vsel %vm384_vm9, %v1711_v41, 0.0 }
0x30ad   :  { %1713 = vadd.xlane.f32.xlu0 %v1712_v46 }
0x313a   :  { %v1714_v3 = vpop.xlane.xlu0 %1713 }
0x313b   :  { %vm1715_vm11 = vcmp.lt.f32.partialorder %v1714_v3, %v3681_v2 }
0x313c   :  { %v2351_v4 = vsel %vm1715_vm11, 1.0, %v3030_v0 }
0x313d   :  { %v1719_v29 = vsel %vm1718_vm10, %v2351_v4, 0.0  ;;  %vm2248_vm10 = vcmask 60472  }
0x313e   :  { %v1720_v19 = vrot.slane %v1719_v29, 4 }
0x3140   :  { %v1721_v38 = vadd.f32 %v1720_v19, %v1719_v29 }
0x3142   :  { %v1722_v42 = vrot.slane %v1721_v38, 2 }
0x3144   :  { %v1723_v62 = vadd.f32 %v1722_v42, %v1721_v38 }
0x3146   :  { %v1724_v24 = vrot.slane %v1723_v62, 1 }
0x3148   :  { %v3773_v8 = vadd.f32 %v1724_v24, %v1723_v62 }
0x314a   :  { %v1726_v63 = vmin.f32 %v3773_v8, 3.0 }
0x314c   :  { %1745 = vperm.xlu0 %2716, %v1726_v63  }
0x31cb   :  { %v1746_v18 = vpop.permute.xlu0 %1745 }
0x31cc   :  { %v1748_v10 = vmul.f32 %v3568_v25, %v1746_v18 }
0x31ce   :  { %v1796_v50 = vadd.f32 %v1790_v44, %v1748_v10 }
0x31d0   :  { %v1797_v51 = vadd.f32 %v3574_v34, %v1796_v50 }
0x31d2   :  { %v1798_v22 = vmul.f32 2.0, %v1797_v51 }
0x31d4   :  { %v1799_v61 = vsel %vm3175_vm3, %v1797_v51, %v1798_v22 }
0x31d5   :  { %v1800_v16 = vsub.f32 0.0, %v1799_v61 }
0x31d7   :  { %v1801_v52 = vmul.f32 1.442695, %v1800_v16 }
0x31d9   :  { %2837 = vpow2.f32 %v1801_v52 }
0x31e3   :  { %v2838_v37 = vpop.eup %2837 }
0x31e4   :  { %v1803_v41 = vadd.f32 1.0, %v2838_v37 }
0x31e6   :  { %2839 = vrcp.f32 %v1803_v41 }
0x31f0   :  { %v2840_v46 = vpop.eup %2839 }
0x31f1   :  { %v1806_v3 = vmul.f32 2.0, %v2840_v46 }
0x31f3   :  { %v2353_v4 = vadd.f32 -1.0, %v1806_v3 }
0x31f5   :  { %v1808_v29 = vsel %vm3175_vm3, %v2840_v46, %v2353_v4 }
0x31f6   :  { %1811 = vrot.lane.b32.xlu1 %v1808_v29, %s3025_s15  ;;  %v1809_v38 = vmul.f32 %v1808_v29, %v3699_v14 }
0x3268   :  { %v1812_v44 = vpop.permute.xlu1 %1811 }
0x3269   :  { %v1814_v19 = vmul.f32 %v1812_v44, %v1808_v29 }
0x326b   :  { %1816 = vrot.lane.b32.xlu1 %v1814_v19, %s3033_s10 }
0x32dd   :  { %v1817_v42 = vpop.permute.xlu1 %1816 }
0x32de   :  { %v3787_v62 = vadd.f32 %v1817_v42, %v1809_v38 }
0x32e0   :  { %2841 = vtanh.f32 %v3787_v62 }
0x32ea   :  { %v2842_v24 = vpop.eup %2841 }
0x32eb   :  { %1822 = vrot.lane.b32.xlu1 %v2842_v24, %s3025_s15 }
0x335d   :  { %v1823_v18 = vpop.permute.xlu1 %1822 }
0x335e   :  { %v1825_v10 = vmul.f32 %v1823_v18, %v1808_v29 }
0x3360   :  { %1827 = vrot.lane.b32.xlu1 %v1825_v10, %s3033_s10 }
0x3364   :  { %1831 = vrot.lane.b32.xlu1 %v3730_v20, %s3025_s15 }
0x33d2   :  { %v1828_v50 = vpop.permute.xlu1 %1827 }
0x33d6   :  { %v1832_v51 = vpop.permute.xlu1 %1831 }
0x33d7   :  { %v1834_v22 = vsel %vm126_vm4, %v1828_v50, %v1832_v51 }
0x33d8   :  { %v1835_v14 = vpack.c.bf16 %v1834_v22, %v1834_v22 }
0x33da   :  { %2637 = vmatmul.mubr.msk.bf16.vlgmr.msra.gmra.mrb[24].mxu1 %vm230_vm5, %v1835_v14 }
0x33db   :  { %2657 = vmatpush3.bf16.msra.mxu1 %v3593_v58  ;;  %2664 = vmatprep.mubr.msk.bf16.mxu1 %vm3031_vm0, %v3030_v0 }
0x33dc   :  { %2658 = vmatprep.subr.bf16.mxu1 %v3030_v0 }
0x33df   :  { %2659 = vmatpush3.bf16.msra.mxu1 %v3599_v12 }
0x33e0   :  { %2660 = vmatprep.subr.bf16.mxu1 %v3030_v0 }
0x33e3   :  { %2661 = vmatpush3.bf16.msra.mxu1 %v3603_v28 }
0x33e4   :  { %2662 = vmatprep.subr.bf16.mxu1 %v3030_v0 }
0x33e7   :  { %2663 = vmatpush3.bf16.msra.mxu1 %v3607_v32 }
0x34ad   :  { %v1873_v20 = vpop.f32.mrb[24].mxu1 }
0x34ae   :  { %v1874_v61 = vadd.f32 %v3614_v33, %v1873_v20  ;;  %v2638_v16 = vpop.f32.mrb[25].mxu1  ;;  %v2014_v20 = vpack.c.bf16 %v1825_v10, %v1825_v10 }
0x34af   :  { %v1876_v58 = vpop.f32.mrb[26].mxu1 }
0x34b0   :  { %v1879_v52 = vmul.f32 2.0, %v1874_v61  ;;  %v2639_v37 = vpop.f32.mrb[27].mxu1 }
0x34b2   :  { %v1880_v41 = vsel %vm3175_vm3, %v1874_v61, %v1879_v52 }
0x34b3   :  { %v1881_v46 = vsub.f32 0.0, %v1880_v41 }
0x34b5   :  { %v1882_v12 = vmul.f32 1.442695, %v1881_v46 }
0x34b7   :  { %2843 = vpow2.f32 %v1882_v12 }
0x34c1   :  { %v2844_v3 = vpop.eup %2843 }
0x34c2   :  { %v1884_v4 = vadd.f32 1.0, %v2844_v3 }
0x34c4   :  { %2845 = vrcp.f32 %v1884_v4 }
0x34ce   :  { %v2846_v28 = vpop.eup %2845 }
0x34cf   :  { %v1887_v29 = vmul.f32 2.0, %v2846_v28 }
0x34d1   :  { %v2355_v44 = vadd.f32 -1.0, %v1887_v29 }
0x34d3   :  { %v1889_v32 = vsel %vm3175_vm3, %v2846_v28, %v2355_v44 }
0x34d4   :  { %1892 = vrot.lane.b32.xlu1 %v1889_v32, %s3025_s15  ;;  %v1890_v42 = vmul.f32 %v1889_v32, %v3726_v57 }
0x3546   :  { %v1893_v19 = vpop.permute.xlu1 %1892 }
0x3547   :  { %v1895_v38 = vmul.f32 %v1893_v19, %v1889_v32 }
0x3549   :  { %1897 = vrot.lane.b32.xlu0 %v1895_v38, %s3033_s10  ;;  %v1970_v38 = vadd.s32 24, %v3276_v39 }
0x35bb   :  { %v1898_v24 = vpop.permute.xlu0 %1897 }
0x35bc   :  { %v3813_v18 = vadd.f32 %v1898_v24, %v1890_v42 }
0x35be   :  { %2847 = vtanh.f32 %v3813_v18 }
0x35c8   :  { %v2848_v50 = vpop.eup %2847 }
0x35c9   :  { %1903 = vrot.lane.b32.xlu1 %v2848_v50, %s3025_s15 }
0x363b   :  { %v1904_v51 = vpop.permute.xlu1 %1903 }
0x363c   :  { %v3817_v22 = vmul.f32 %v1904_v51, %v1889_v32 }
0x363e   :  { %v1907_v14 = vpack.c.bf16 %v3817_v22, %v3817_v22 }
0x3640   :  { %1909 = vrot.lane.b32.xlu0 %v1907_v14, %s3033_s10 }
0x3644   :  { %2016 = vrot.lane.b32.xlu0 %v2014_v20, %s3033_s10  ;;  %v3039_v20 = vmov 6  }
0x3645   :  { %2717 = vset.pattern.permute.xlu0 %v3039_v20 }
0x36b2   :  { %v1910_v57 = vpop.permute.xlu0 %1909 }
0x36b3   :  { %2645 = vmatmul.mubr.msk.bf16.vlgmr.msra.gmra.mrb[52].mxu0 %vm126_vm4, %v1910_v57 }
0x36b4   :  { %2649 = vmatpush3.bf16.msra.mxu0 %v3523_v9  ;;  %2652 = vmatprep.mubr.msk.bf16.mxu0 %vm3031_vm0, %v3030_v0 }
0x36b5   :  { %2650 = vmatprep.subr.bf16.mxu0 %v3030_v0 }
0x36b6   :  { %v2017_v61 = vpop.permute.xlu0 %2016 }
0x36b8   :  { %2651 = vmatpush3.bf16.msra.mxu0 %v3529_v36 }
0x36b9   :  { %2668 = vmatprep.subr.bf16.mxu0 %v3030_v0 }
0x36bb   :  { %2653 = vmatmul.mubr.msk.bf16.vlgmr.msra.gmra.mrb[56].mxu0 %vm126_vm4, %v2017_v61 }
0x36bc   :  { %2669 = vmatpush3.bf16.msra.mxu0 %v3642_v53  ;;  %2672 = vmatprep.mubr.msk.bf16.mxu0 %vm3031_vm0, %v3030_v0  ;;  %vm1971_vm0 = vcmp.le.s32.totalorder %v3164_v6, %v1970_v38 }
0x36bd   :  { %2670 = vmatprep.subr.bf16.mxu0 %v3030_v0 }
0x36c0   :  { %2671 = vmatpush3.bf16.msra.mxu0 %v3648_v30 }
0x3786   :  { %v1948_v9 = vpop.f32.mrb[52].mxu0 }
0x3787   :  { %v1949_v10 = vadd.f32 %v3661_v31, %v1948_v9  ;;  %v2646_v16 = vpop.f32.mrb[53].mxu0 }
0x3788   :  { %v1951_v53 = vpop.f32.mrb[54].mxu0 }
0x3789   :  { %v1957_v58 = vsel %vm3838_vm14, %v1949_v10, -1e+30  ;;  %v2647_v52 = vpop.f32.mrb[55].mxu0 }
0x378a   :  { %v1958_v37 = vsel %vm365_vm7, %v1957_v58, -inf }
0x378b   :  { %1959 = vmax.xlane.f32.xlu1 %v1958_v37 }
0x378e   :  { %v2055_v30 = vpop.f32.mrb[56].mxu0 }
0x378f   :  { %v2654_v41 = vpop.f32.mrb[57].mxu0 }
0x3790   :  { %v2058_v46 = vpop.f32.mrb[58].mxu0 }
0x3791   :  { %v2655_v12 = vpop.f32.mrb[59].mxu0 }
0x3818   :  { %v1960_v3 = vpop.xlane.xlu1 %1959 }
0x3819   :  { %v1961_v4 = vsub.f32 %v1957_v58, %v1960_v3 }
0x381b   :  { %v1962_v28 = vmul.f32 1.442695, %v1961_v4 }
0x381d   :  { %2849 = vpow2.f32 %v1962_v28 }
0x3827   :  { %v2850_v29 = vpop.eup %2849 }
0x3828   :  { %v1964_v44 = vsel %vm3838_vm14, %v2850_v29, 0.0 }
0x3829   :  { %v1965_v32 = vsel %vm365_vm7, %v1964_v44, 0.0 }
0x382a   :  { %1966 = vadd.xlane.f32.xlu0 %v1965_v32 }
0x38b7   :  { %v1967_v19 = vpop.xlane.xlu0 %1966 }
0x38b8   :  { %2851 = vrcp.f32 %v1967_v19 }
0x38c2   :  { %v2852_v42 = vpop.eup %2851 }
0x38c3   :  { %v3850_v24 = vmul.f32 %v2852_v42, %v1964_v44 }
0x38c5   :  { %v1975_v50 = vrot.slane %v3850_v24, %v3279_v40 }
0x38c7   :  { %v1976_v51 = vsel %vm1971_vm0, %v1975_v50, 0.0 }
0x38c8   :  { %v1977_v14 = vsel %vm384_vm9, %v1976_v51, 0.0 }
0x38c9   :  { %1978 = vadd.xlane.f32.xlu1 %v1977_v14 }
0x3956   :  { %v1979_v57 = vpop.xlane.xlu1 %1978 }
0x3957   :  { %vm1980_vm1 = vcmp.lt.f32.partialorder %v1979_v57, %v3681_v2 }
0x3958   :  { %v2357_v61 = vsel %vm1980_vm1, 1.0, %v3030_v0  ;;  %vm677_vm1 = vcmp.eq.s32.totalorder %v3164_v6, 1 }
0x3959   :  { %v1984_v9 = vsel %vm1983_vm15, %v2357_v61, 0.0  ;;  %vm415_vm15 = vcmp.eq.s32.totalorder %v3164_v6, 0 }
0x395a   :  { %v1985_v36 = vrot.slane %v1984_v9, 4 }
0x395c   :  { %v1986_v10 = vadd.f32 %v1985_v36, %v1984_v9 }
0x395e   :  { %v1987_v16 = vrot.slane %v1986_v10, 2 }
0x3960   :  { %v1988_v53 = vadd.f32 %v1987_v16, %v1986_v10 }
0x3962   :  { %v1989_v58 = vrot.slane %v1988_v53, 1 }
0x3964   :  { %v3859_v52 = vadd.f32 %v1989_v58, %v1988_v53 }
0x3966   :  { %v1991_v37 = vmin.f32 %v3859_v52, 3.0 }
0x3968   :  { %2010 = vperm.xlu0 %2717, %v1991_v37   ;;  %v3934_v17 = vtrunc.f32 %v1991_v37 }
0x396a   :  { %v2689_v8 = vcvt.f32.s32 %v3934_v17 }
0x396c   :  { %2719 = vset.pattern.permute.xlu0 %v3034_v49 }
0x39e7   :  { %v2011_v41 = vpop.permute.xlu0 %2010 }
0x39e8   :  { %v2013_v46 = vmul.f32 %v3568_v25, %v2011_v41 }
0x39ea   :  { %v2061_v12 = vadd.f32 %v2055_v30, %v2013_v46 }
0x39ec   :  { %v2062_v3 = vadd.f32 %v3574_v34, %v2061_v12 }
0x39ee   :  { %v2063_v4 = vmul.f32 2.0, %v2062_v3 }
0x39f0   :  { %v2064_v28 = vsel %vm3175_vm3, %v2062_v3, %v2063_v4 }
0x39f1   :  { %v2065_v29 = vsub.f32 0.0, %v2064_v28 }
0x39f3   :  { %v2066_v44 = vmul.f32 1.442695, %v2065_v29 }
0x39f5   :  { %2853 = vpow2.f32 %v2066_v44 }
0x39ff   :  { %v2854_v32 = vpop.eup %2853 }
0x3a00   :  { %v2068_v19 = vadd.f32 1.0, %v2854_v32 }
0x3a02   :  { %2855 = vrcp.f32 %v2068_v19 }
0x3a0c   :  { %v2856_v38 = vpop.eup %2855 }
0x3a0d   :  { %v2071_v42 = vmul.f32 2.0, %v2856_v38 }
0x3a0f   :  { %v2359_v50 = vadd.f32 -1.0, %v2071_v42 }
0x3a11   :  { %v2073_v49 = vsel %vm3175_vm3, %v2856_v38, %v2359_v50 }
0x3a12   :  { %2076 = vrot.lane.b32.xlu1 %v2073_v49, %s3025_s15  ;;  %v2074_v30 = vmul.f32 %v2073_v49, %v3787_v62 }
0x3a84   :  { %v2077_v25 = vpop.permute.xlu1 %2076 }
0x3a85   :  { %v2079_v34 = vmul.f32 %v2077_v25, %v2073_v49 }
0x3a87   :  { %2081 = vrot.lane.b32.xlu1 %v2079_v34, %s3033_s10 }
0x3af9   :  { %v2082_v51 = vpop.permute.xlu1 %2081 }
0x3afa   :  { %v2084_v14 = vadd.f32 %v2082_v51, %v2074_v30 }
0x3afc   :  { %2857 = vtanh.f32 %v2084_v14 }
0x3b06   :  { %v2858_v57 = vpop.eup %2857 }
0x3b07   :  { %2087 = vrot.lane.b32.xlu1 %v2858_v57, %s3025_s15 }
0x3b79   :  { %v2088_v61 = vpop.permute.xlu1 %2087 }
0x3b7a   :  { %v2090_v9 = vmul.f32 %v2088_v61, %v2073_v49 }
0x3b7c   :  { %2092 = vrot.lane.b32.xlu1 %v2090_v9, %s3033_s10 }
0x3b80   :  { %2096 = vrot.lane.b32.xlu1 %v3817_v22, %s3025_s15 }
0x3bee   :  { %v2093_v36 = vpop.permute.xlu1 %2092 }
0x3bf2   :  { %v2097_v10 = vpop.permute.xlu1 %2096 }
0x3bf3   :  { %v2099_v16 = vsel %vm126_vm4, %v2093_v36, %v2097_v10 }
0x3bf4   :  { %v2100_v53 = vpack.c.bf16 %v2099_v16, %v2099_v16 }
0x3bf6   :  { %2665 = vmatmul.mubr.msk.bf16.vlgmr.msra.gmra.mrb[28].mxu1 %vm230_vm5, %v2100_v53  ;;  %vm2220_vm5 = vcmp.lt.s32.totalorder %v3164_v6, 32 }
0x3cc9   :  { %v2138_v62 = vpop.f32.mrb[28].mxu1 }
0x3cca   :  { %v2139_v58 = vadd.f32 %v3614_v33, %v2138_v62  ;;  %v2666_v41 = vpop.f32.mrb[29].mxu1 }
0x3ccb   :  { %v2141_v46 = vpop.f32.mrb[30].mxu1  ;;  %v3905_v41 = vtrunc.f32 %v931_v26  ;;  %v3926_v26 = vtrunc.f32 %v1726_v63  ;;  %v1993_v63 = vadd.s32 24, %v2689_v8 }
0x3ccc   :  { %v2144_v12 = vmul.f32 2.0, %v2139_v58  ;;  %v2667_v3 = vpop.f32.mrb[31].mxu1 }
0x3cce   :  { %v2145_v4 = vsel %vm3175_vm3, %v2139_v58, %v2144_v12  ;;  %v2676_v58 = vtrunc.f32 %v405_v56  ;;  %v2681_v12 = vcvt.f32.s32 %v3905_v41 }
0x3ccf   :  { %v2146_v28 = vsub.f32 0.0, %v2145_v4 }
0x3cd0   :  { %v2677_v46 = vcvt.f32.s32 %v2676_v58  ;;  %v933_v3 = vadd.s32 8, %v2681_v12 }
0x3cd1   :  { %v2147_v29 = vmul.f32 1.442695, %v2146_v28 }
0x3cd3   :  { %2859 = vpow2.f32 %v2147_v29 }
0x3cdd   :  { %v2860_v22 = vpop.eup %2859 }
0x3cde   :  { %v2149_v44 = vadd.f32 1.0, %v2860_v22 }
0x3ce0   :  { %2861 = vrcp.f32 %v2149_v44 }
0x3cea   :  { %v2862_v32 = vpop.eup %2861 }
0x3ceb   :  { %v2152_v19 = vmul.f32 2.0, %v2862_v32 }
0x3ced   :  { %v2361_v38 = vadd.f32 -1.0, %v2152_v19  ;;  %v2235_v19 = vadd.s32 28, %v3276_v39 }
0x3cef   :  { %v2154_v42 = vsel %vm3175_vm3, %v2862_v32, %v2361_v38  ;;  %vm2219_vm3 = vcmp.ge.s32.totalorder %v3164_v6, 28 }
0x3cf0   :  { %2157 = vrot.lane.b32.xlu1 %v2154_v42, %s3025_s15  ;;  %v2155_v49 = vmul.f32 %v2154_v42, %v3813_v18  ;;  %vm3893_vm2 = vmand %vm2219_vm3, %vm2220_vm5  ;;  %vm942_vm5 = vcmp.eq.s32.totalorder %v3164_v6, 2 }
0x3d62   :  { %v2158_v33 = vpop.permute.xlu1 %2157 }
0x3d63   :  { %v2160_v50 = vmul.f32 %v2158_v33, %v2154_v42 }
0x3d65   :  { %2162 = vrot.lane.b32.xlu1 %v2160_v50, %s3033_s10 }
0x3dd7   :  { %v2163_v25 = vpop.permute.xlu1 %2162 }
0x3dd8   :  { %v2165_v34 = vadd.f32 %v2163_v25, %v2155_v49 }
0x3dda   :  { %2863 = vtanh.f32 %v2165_v34 }
0x3de4   :  { %v2864_v30 = vpop.eup %2863 }
0x3de5   :  { %2168 = vrot.lane.b32.xlu1 %v2864_v30, %s3025_s15  ;;  %v2678_v30 = vtrunc.f32 %v666_v7  ;;  %s2292_s15 = sshll.u32 %s3041_s6, 4  ;;  %s2293_s15 = int_to_ptr.vmem [resolvable:$true] %s2292_s15 }
0x3de6   :  { %s2970_s25 = scalar_lea.vmem %s2293_s15, 16  ;;  %s2974_s26 = scalar_lea.vmem %s2293_s15, 32 }
0x3de7   :  { %p2971_p4 = scmp.ne.s32.totalorder %s2293_s15, %s2970_s25  ;;  %p2975_p5 = scmp.lt.s32.totalorder %s2293_s15, %s2293_s15 }
0x3de8   :  { %p2976_p6 = scmp.lt.s32.totalorder %s2974_s26, %s2970_s25 }
0x3dea   :  { %p2977_p7 = por %p2976_p6, %p2975_p5 }
0x3dec   :  { %p2978_p8 = pnand %p2977_p7, %p2971_p4 }
0x3e57   :  { %v2169_v51 = vpop.permute.xlu1 %2168 }
0x3e58   :  { %v2171_v14 = vmul.f32 %v2169_v51, %v2154_v42  ;;  %v2679_v51 = vcvt.f32.s32 %v2678_v30 }
0x3e5a   :  { %v2172_v57 = vpack.c.bf16 %v2171_v14, %v2171_v14  ;;  %v668_v14 = vadd.s32 4, %v2679_v51 }
0x3e5c   :  { %2174 = vrot.lane.b32.xlu0 %v2172_v57, %s3033_s10 }
0x3ece   :  { %v2175_v15 = vpop.permute.xlu0 %2174 }
0x3ecf   :  { %2673 = vmatmul.mubr.msk.bf16.vlgmr.msra.gmra.mrb[60].mxu0 %vm126_vm4, %v2175_v15  ;;  %vm2236_vm4 = vcmp.le.s32.totalorder %v3164_v6, %v2235_v19 }
0x3fa2   :  { %v2213_v61 = vpop.f32.mrb[60].mxu0 }
0x3fa3   :  { %v2214_v9 = vadd.f32 %v3661_v31, %v2213_v61  ;;  %v2674_v36 = vpop.f32.mrb[61].mxu0  ;;  %v3910_v31 = vtrunc.f32 %v1196_v27  ;;  %v2687_v27 = vcvt.f32.s32 %v3926_v26 }
0x3fa4   :  { %v2216_v10 = vpop.f32.mrb[62].mxu0 }
0x3fa5   :  { %v2222_v16 = vsel %vm3893_vm2, %v2214_v9, -1e+30  ;;  %v2675_v53 = vpop.f32.mrb[63].mxu0  ;;  %v2683_v4 = vcvt.f32.s32 %v3910_v31  ;;  %v1728_v35 = vadd.s32 20, %v2687_v27 }
0x3fa6   :  { %v2223_v62 = vsel %vm365_vm7, %v2222_v16, -inf }
0x3fa7   :  { %2224 = vmax.xlane.f32.xlu1 %v2223_v62  ;;  %v1198_v56 = vadd.s32 12, %v2683_v4 }
0x3fb8   :  { %408 = vperm.xlu1 %2718, %v2677_v46  }
0x3fbc   :  { %2720 = vset.pattern.permute.xlu1 %v3035_v11 }
0x3fbd   :  { %935 = vperm.xlu1 %2720, %v933_v3  }
0x3fc1   :  { %2721 = vset.pattern.permute.xlu1 %v3036_v13 }
0x3fc2   :  { %1200 = vperm.xlu1 %2721, %v1198_v56  }
0x3fc6   :  { %2722 = vset.pattern.permute.xlu1 %v3037_v48 }
0x3fc7   :  { %1465 = vperm.xlu1 %2722, %v1463_v60  }
0x3fcb   :  { %2723 = vset.pattern.permute.xlu1 %v3038_v21 }
0x3fcc   :  { %1730 = vperm.xlu1 %2723, %v1728_v35  }
0x3fd0   :  { %2724 = vset.pattern.permute.xlu1 %v3039_v20 }
0x3fd1   :  { %1995 = vperm.xlu1 %2724, %v1993_v63  }
0x4034   :  { %v2225_v28 = vpop.xlane.xlu1 %2224 }
0x4035   :  { %v2226_v29 = vsub.f32 %v2222_v16, %v2225_v28 }
0x4037   :  { %v2227_v52 = vmul.f32 1.442695, %v2226_v29 }
0x4038   :  { %v3947_v42 = vpop.permute.xlu1 %408 }
0x4039   :  { %2865 = vpow2.f32 %v2227_v52  ;;  %vm410_vm6 = vcmp.eq.s32.totalorder %v3164_v6, %v3947_v42 }
0x403a   :  { %v411_v34 = vsel %vm410_vm6, %v3281_v43, 0.0  ;;  %vm2002_vm6 = vcmp.eq.s32.totalorder %v3164_v6, 6 }
0x403b   :  { %v412_v39 = vsel %vm365_vm7, %v411_v34, 0.0 }
0x403c   :  { %v936_v57 = vpop.permute.xlu1 %935 }
0x4041   :  { %v1201_v15 = vpop.permute.xlu1 %1200 }
0x4042   :  { %vm1202_vm13 = vcmp.eq.s32.totalorder %v3164_v6, %v1201_v15 }
0x4043   :  { %v2866_v37 = vpop.eup %2865  ;;  %v1203_v28 = vsel %vm1202_vm13, %v3554_v59, 0.0 }
0x4044   :  { %v2229_v22 = vsel %vm3893_vm2, %v2866_v37, 0.0  ;;  %vm1207_vm2 = vcmp.eq.s32.totalorder %v3164_v6, 3 }
0x4045   :  { %v2230_v44 = vsel %vm365_vm7, %v2229_v22, 0.0 }
0x4046   :  { %2231 = vadd.xlane.f32.xlu0 %v2230_v44  ;;  %v1466_v61 = vpop.permute.xlu1 %1465 }
0x4047   :  { %vm1467_vm14 = vcmp.eq.s32.totalorder %v3164_v6, %v1466_v61 }
0x4048   :  { %v1468_v52 = vsel %vm1467_vm14, %v3671_v5, 0.0 }
0x4049   :  { %v1469_v37 = vsel %vm365_vm7, %v1468_v52, 0.0 }
0x404b   :  { %v1731_v43 = vpop.permute.xlu1 %1730 }
0x404c   :  { %vm1732_vm8 = vcmp.eq.s32.totalorder %v3164_v6, %v1731_v43 }
0x404d   :  { %v1733_v7 = vsel %vm1732_vm8, %v3764_v47, 0.0  ;;  %vm2273_vm8 = vcmask 57344  }
0x404e   :  { %v1734_v9 = vsel %vm365_vm7, %v1733_v7, 0.0 }
0x4050   :  { %v1996_v29 = vpop.permute.xlu1 %1995 }
0x4051   :  { %vm1997_vm0 = vcmp.eq.s32.totalorder %v3164_v6, %v1996_v29 }
0x40d3   :  { %v2232_v32 = vpop.xlane.xlu0 %2231 }
0x40d4   :  { %2867 = vrcp.f32 %v2232_v32 }
0x40de   :  { %v2868_v38 = vpop.eup %2867 }
0x40df   :  { %v3949_v33 = vmul.f32 %v2868_v38, %v2229_v22  ;;  %v1998_v22 = vsel %vm1997_vm0, %v3850_v24, 0.0 }
0x40e1   :  { %v2240_v50 = vrot.slane %v3949_v33, %v3279_v40  ;;  %v3040_v40 = vmov 7  }
0x40e2   :  { %2725 = vset.pattern.permute.xlu1 %v3040_v40 }
0x40e3   :  { %v2241_v49 = vsel %vm2236_vm4, %v2240_v50, 0.0  ;;  %vm1472_vm4 = vcmp.eq.s32.totalorder %v3164_v6, 4 }
0x40e4   :  { %v2242_v25 = vsel %vm384_vm9, %v2241_v49, 0.0  ;;  %vm937_vm9 = vcmp.eq.s32.totalorder %v3164_v6, %v936_v57 }
0x40e5   :  { %2243 = vadd.xlane.f32.xlu0 %v2242_v25  ;;  %v938_v18 = vsel %vm937_vm9, %v3462_v54, 0.0  ;;  %vm2267_vm9 = vcmp.eq.s32.totalorder %v3164_v6, 7 }
0x40e6   :  { %v939_v1 = vsel %vm365_vm7, %v938_v18, 0.0 }
0x40e9   :  { %413 = vadd.xlane.f32.xlu0 %v412_v39 }
0x40ff   :  { %670 = vperm.xlu0 %2719, %v668_v14  }
0x4103   :  { %679 = vperm.xlu0 %2719, %v2679_v51  }
0x4107   :  { %2727 = vset.pattern.permute.xlu0 %v3036_v13 }
0x4122   :  { %940 = vadd.xlane.f32.xlu0 %v939_v1 }
0x4126   :  { %1735 = vadd.xlane.f32.xlu0 %v1734_v9 }
0x4172   :  { %v2244_v13 = vpop.xlane.xlu0 %2243 }
0x4173   :  { %vm2245_vm11 = vcmp.lt.f32.partialorder %v2244_v13, %v3681_v2 }
0x4174   :  { %v2363_v36 = vsel %vm2245_vm11, 1.0, %v3030_v0 }
0x4175   :  { %v2249_v10 = vsel %vm2248_vm10, %v2363_v36, 0.0 }
0x4176   :  { %v2250_v16 = vrot.slane %v2249_v10, 4  ;;  %v414_v62 = vpop.xlane.xlu0 %413 }
0x4177   :  { %v417_v59 = vsel %vm415_vm15, %v414_v62, 0.0 }
0x4178   :  { %v2251_v53 = vadd.f32 %v2250_v16, %v2249_v10 }
0x417a   :  { %v2252_v54 = vrot.slane %v2251_v53, 2 }
0x417c   :  { %v2253_v58 = vadd.f32 %v2252_v54, %v2251_v53 }
0x417e   :  { %v2254_v46 = vrot.slane %v2253_v58, 1  ;;  %v671_v3 = vpop.permute.xlu0 %670 }
0x417f   :  { %vm672_vm12 = vcmp.eq.s32.totalorder %v3164_v6, %v671_v3 }
0x4180   :  { %v673_v47 = vsel %vm672_vm12, %v3374_v45, 0.0  ;;  %v2255_v56 = vadd.f32 %v2254_v46, %v2253_v58  ;;  %v1204_v45 = vsel %vm365_vm7, %v1203_v28, 0.0 }
0x4181   :  { %v674_v60 = vsel %vm365_vm7, %v673_v47, 0.0 }
0x4182   :  { %675 = vadd.xlane.f32.xlu1 %v674_v60  ;;  %v2256_v35 = vmin.f32 %v2255_v56, 3.0 }
0x4184   :  { %v2690_v2 = vtrunc.f32 %v2256_v35 }
0x4186   :  { %v2691_v63 = vcvt.f32.s32 %v2690_v2 }
0x4188   :  { %v2258_v0 = vadd.s32 28, %v2691_v63 }
0x4193   :  { %2260 = vperm.xlu1 %2725, %v2258_v0  }
0x4197   :  { %2726 = vset.pattern.permute.xlu1 %v3035_v11  ;;  %v1999_v11 = vsel %vm365_vm7, %v1998_v22, 0.0 }
0x41b7   :  { %1205 = vadd.xlane.f32.xlu1 %v1204_v45 }
0x41bb   :  { %1470 = vadd.xlane.f32.xlu1 %v1469_v37 }
0x41bf   :  { %2000 = vadd.xlane.f32.xlu1 %v1999_v11 }
0x41d0   :  { %944 = vperm.xlu1 %2726, %v2681_v12  }
0x41d4   :  { %2728 = vset.pattern.permute.xlu1 %v3037_v48 }
0x41d5   :  { %1474 = vperm.xlu1 %2728, %v2685_v23   ;;  %v680_v23 = vpop.permute.xlu0 %679 }
0x41d9   :  { %2729 = vset.pattern.permute.xlu1 %v3038_v21 }
0x41da   :  { %1739 = vperm.xlu1 %2729, %v2687_v27   ;;  %v941_v27 = vpop.xlane.xlu0 %940 }
0x41de   :  { %2730 = vset.pattern.permute.xlu1 %v3039_v20 }
0x41df   :  { %2004 = vperm.xlu1 %2730, %v2689_v8  }
0x41e3   :  { %2731 = vset.pattern.permute.xlu1 %v3040_v40 }
0x41e4   :  { %2269 = vperm.xlu1 %2731, %v2691_v63  }
0x420f   :  { %v676_v5 = vpop.xlane.xlu1 %675 }
0x4210   :  { %v682_v48 = vsel %vm677_vm1, %v676_v5, %v417_v59 }
0x4211   :  { %v947_v17 = vsel %vm942_vm5, %v941_v27, %v682_v48 }
0x4213   :  { %v2261_v21 = vpop.permute.xlu1 %2260 }
0x4214   :  { %vm2262_vm3 = vcmp.eq.s32.totalorder %v3164_v6, %v2261_v21 }
0x4215   :  { %v2263_v24 = vsel %vm2262_vm3, %v3949_v33, 0.0 }
0x4216   :  { %v2264_v20 = vsel %vm365_vm7, %v2263_v24, 0.0  ;;  %vm1737_vm7 = vcmp.eq.s32.totalorder %v3164_v6, 5 }
0x4217   :  { %2265 = vadd.xlane.f32.xlu0 %v2264_v20 }
0x422d   :  { %1209 = vperm.xlu0 %2727, %v2683_v4   ;;  %v1736_v4 = vpop.xlane.xlu0 %1735 }
0x4231   :  { %2732 = vset.pattern.permute.xlu0 %v3040_v40 }
0x4244   :  { %v1206_v41 = vpop.xlane.xlu1 %1205 }
0x4245   :  { %v1212_v31 = vsel %vm1207_vm2, %v1206_v41, %v947_v17 }
0x4248   :  { %v1471_v12 = vpop.xlane.xlu1 %1470 }
0x4249   :  { %v1477_v44 = vsel %vm1472_vm4, %v1471_v12, %v1212_v31 }
0x424a   :  { %v1742_v32 = vsel %vm1737_vm7, %v1736_v4, %v1477_v44 }
0x424c   :  { %v2001_v55 = vpop.xlane.xlu1 %2000 }
0x424d   :  { %v2007_v19 = vsel %vm2002_vm6, %v2001_v55, %v1742_v32 }
0x4250   :  { %v945_v26 = vpop.permute.xlu1 %944 }
0x4254   :  { %v1475_v8 = vpop.permute.xlu1 %1474 }
0x4259   :  { %v1740_v38 = vpop.permute.xlu1 %1739 }
0x42a4   :  { %v2266_v33 = vpop.xlane.xlu0 %2265 }
0x42a5   :  { %v2272_v50 = vsel %vm2267_vm9, %v2266_v33, %v2007_v19 }
0x42a6   :  { %2275 = vst.msk [vmem:[#allocation11] sm:$0x1] %vm2273_vm8, %v2272_v50 }
0x42a7   :  { %2981 = shalt.err (!%p2978_p8)
}
0x42a8   :  { %s2982_s30 = scalar_lea.hbm %s4077_s8, 16 }
0x42a9   :  { %p2983_p9 = scmp.ne.s32.totalorder %s4077_s8, %s2982_s30  ;;  %p2986_p10 = scmp.lt.u32.totalorder %s2982_s30, %s4077_s8 }
0x42ab   :  { %p2988_p11 = pnand %p2986_p10, %p2983_p9 }
0x42ad   :  { %2991 = shalt.err (!%p2988_p11)
}
0x42ae   :  { %2295 = dma.vmem_to_hbm [thread:$0]  %s2293_s15, 16, %s4077_s8, [#allocation12]   ;;  %v416_v49 = vsel %vm415_vm15, %v3947_v42, 0  ;;  %v2005_v25 = vpop.permute.xlu1 %2004  ;;  %v1210_v30 = vpop.permute.xlu0 %1209 }
0x42af   :  { %v681_v34 = vsel %vm677_vm1, %v680_v23, %v416_v49  ;;  %s3042_s16 = smov [#allocation10]  }
0x42b0   :  { %v946_v39 = vsel %vm942_vm5, %v945_v26, %v681_v34  ;;  %s2282_s10 = sshll.u32 %s3042_s16, 4  ;;  %s2283_s10 = int_to_ptr.vmem [resolvable:$true] %s2282_s10 }
0x42b1   :  { %v1211_v51 = vsel %vm1207_vm2, %v1210_v30, %v946_v39  ;;  %s2992_s8 = scalar_lea.vmem %s2283_s10, 16  ;;  %s2996_s11 = scalar_lea.vmem %s2283_s10, 32 }
0x42b2   :  { %v1476_v14 = vsel %vm1472_vm4, %v1475_v8, %v1211_v51  ;;  %v2270_v42 = vpop.permute.xlu1 %2269  ;;  %p2993_p12 = scmp.ne.s32.totalorder %s2283_s10, %s2992_s8  ;;  %p2997_p13 = scmp.lt.s32.totalorder %s2283_s10, %s2283_s10 }
0x42b3   :  { %v1741_v40 = vsel %vm1737_vm7, %v1740_v38, %v1476_v14  ;;  %p2998_p0 = scmp.lt.s32.totalorder %s2996_s11, %s2992_s8 }
0x42b4   :  { %v2006_v57 = vsel %vm2002_vm6, %v2005_v25, %v1741_v40 }
0x42b5   :  { %v2271_v15 = vsel %vm2267_vm9, %v2270_v42, %v2006_v57  ;;  %p2999_p1 = por %p2998_p0, %p2997_p13 }
0x42b6   :  { %2274 = vst.msk [vmem:[#allocation10] sm:$0x1] %vm2273_vm8, %v2271_v15 }
0x42b7   :  { %p3000_p2 = pnand %p2999_p1, %p2993_p12 }
0x42b9   :  { %3003 = shalt.err (!%p3000_p2)
}
0x42ba   :  { %s3004_s14 = scalar_lea.hbm %s4076_s7, 16 }
0x42bb   :  { %p3005_p3 = scmp.ne.s32.totalorder %s4076_s7, %s3004_s14  ;;  %p3008_p4 = scmp.lt.u32.totalorder %s3004_s14, %s4076_s7 }
0x42bd   :  { %p3010_p5 = pnand %p3008_p4, %p3005_p3 }
0x42bf   :  { %3013 = shalt.err (!%p3010_p5)
}
0x42c0   :  { %2285 = dma.vmem_to_hbm [thread:$0]  %s2283_s10, 16, %s4076_s7, [#allocation4]  }
0x42c1   :  { %3020 = dma.done.wait [#allocation4], 16  }
0x42c2   :  { %3021 = vsyncadd [#allocation4], 4294967280 }
0x42c3   :  { %3022 = dma.done.wait [#allocation12], 16  }
0x42c4   :  { %3023 = vsyncadd [#allocation12], 4294967280 }
0x42c5   :  { %2302 = vsyncpa [#allocation3], 1 }
0x42c6   :  { %2303 = vsyncpa [#allocation6], 1 }
0x42c7   :  { %2304 = vsyncpa [#allocation9], 1 }
0x42c8   :  { %2305 = vsyncpa [#allocation4], 1 }
0x42c9   :  { %2306 = vsyncpa [#allocation12], 1 }

</bundles_post_ra>
